<compile_context>
chip_gen: v5e
topology: v5e:2x2
jax: 0.10.0
libtpu: 0.0.40
codegen_flags: <defaults>
</compile_context>

<pallas_src>
import numpy as np
import jax
import jax.numpy as jnp
from jax.experimental import pallas as pl
from jax.experimental.pallas import tpu as pltpu

# Channel sizes (lane-padded to 128 multiples; padded lanes carry zero weights
# and zero biases, and LeakyReLU(0)=0, so padding never leaks into real lanes).
C1, C2, C3 = 512, 512, 256
F1, F2, OUT = 1000, 200, 10
F1P, F2P, OP = 1024, 256, 128


def _lrelu(v):
    return jnp.where(v > 0, v, 0.2 * v)


# ---------------------------------------------------------------------------
# Fused kernel: conv stack + per-element avg-pool (as matmul) + MLP + head
# ---------------------------------------------------------------------------
def make_fused_kernel(n_elements):
    E = int(n_elements)

    def kernel(x_ref, w1_ref, b1_ref, w2_ref, b2_ref, w3_ref, b3_ref,
               p_ref, wf1_ref, bf1_ref, wf2_ref, bf2_ref, wo_ref, bo_ref,
               feat_ref, logit_ref):
        # ---- conv stack on the merged (TB*H, .) matrix -----------------------
        # First layer has K = n_neighbors (tiny), keep it f32 (free on MXU).
        h = _lrelu(jnp.dot(x_ref[...], w1_ref[...],
                           preferred_element_type=jnp.float32) + b1_ref[...])
        h = _lrelu(jnp.dot(h.astype(jnp.bfloat16), w2_ref[...],
                           preferred_element_type=jnp.float32) + b2_ref[...])
        h = _lrelu(jnp.dot(h.astype(jnp.bfloat16), w3_ref[...],
                           preferred_element_type=jnp.float32) + b3_ref[...])
        # h: (TB*H, 256) f32

        # ---- per-element average pool as MXU matmuls, folded into wf1 --------
        # pooled_e = P[e] @ h  : (TB, 256), exact f32 averaging weights.
        # f1 += pooled_e @ wf1[e::E]  reproduces z @ wf1 in PyTorch's
        # channel-major flatten order without ever materializing z.
        f1 = bf1_ref[...]                                   # (1, F1P) f32
        for e in range(E):                                  # static unroll, E small
            pooled = jnp.dot(p_ref[e], h,
                             preferred_element_type=jnp.float32)        # (TB, 256)
            f1 = f1 + jnp.dot(pooled.astype(jnp.bfloat16), wf1_ref[e],
                              preferred_element_type=jnp.float32)       # (TB, F1P)
        f1 = _lrelu(f1)

        # ---- feature MLP tail + output head ----------------------------------
        f2 = _lrelu(jnp.dot(f1.astype(jnp.bfloat16), wf2_ref[...],
                            preferred_element_type=jnp.float32) + bf2_ref[...])
        feat_ref[...] = f2                                   # (TB, F2P) lane-dense
        logit_ref[...] = jnp.dot(f2.astype(jnp.bfloat16), wo_ref[...],
                                 preferred_element_type=jnp.float32) + bo_ref[...]

    return kernel


# ---------------------------------------------------------------------------
# One-time host-side parameter prep (hoisted out of the forward path)
# ---------------------------------------------------------------------------
def pick_tile_batch(B):
    """TB >= 8 and ideally TB*H >= 256; keep >=2 grid steps when the batch
    allows it so v7x's two TensorCores both get work."""
    tb = 32
    while tb > 8 and pl.cdiv(B, tb) < 2:
        tb //= 2
    return tb


def prepare_params(params, n_atoms_elements, n_neighbors, tb):
    """Lane padding, bf16 casts, per-element wf1 slicing, static pooling
    matrices.  Call ONCE; reuse the result for every forward."""
    (w1, b1, w2, b2, w3, b3, wf1, bf1, wf2, bf2, wo, bo) = params
    E = len(n_atoms_elements)
    H = int(sum(n_atoms_elements))
    assert w1.shape == (n_neighbors, C1)

    w1f = jnp.asarray(w1, jnp.float32)                     # tiny K, stays f32
    w2b = jnp.asarray(w2, jnp.bfloat16)
    w3b = jnp.asarray(w3, jnp.bfloat16)

    # PyTorch flattens pooled features channel-major (index c*E + e), so the
    # wf1 rows belonging to element e are wf1[e::E].  Pad 1000 -> 1024 lanes.
    wf1_np = np.asarray(wf1, np.float32)
    wf1e = np.zeros((E, C3, F1P), np.float32)
    for e in range(E):
        wf1e[e, :, :F1] = wf1_np[e::E, :]
    wf1e = jnp.asarray(wf1e, jnp.bfloat16)

    bf1p = jnp.zeros((1, F1P), jnp.float32).at[:, :F1].set(bf1)
    wf2p = jnp.zeros((F1P, F2P), jnp.float32).at[:F1, :F2].set(wf2).astype(jnp.bfloat16)
    bf2p = jnp.zeros((1, F2P), jnp.float32).at[:, :F2].set(bf2)
    wop = jnp.zeros((F2P, OP), jnp.float32).at[:F2, :OUT].set(wo).astype(jnp.bfloat16)
    bop = jnp.zeros((1, OP), jnp.float32).at[:, :OUT].set(bo)

    # Static pooling matrices: P[e, b, b*H + a] = 1/n_e for atom a in segment e
    # (block-diagonal over the TB samples of one tile), exact f32 averaging.
    pool = np.zeros((E, tb, tb * H), np.float32)
    start = 0
    for e, n_at in enumerate(n_atoms_elements):
        for b in range(tb):
            pool[e, b, b * H + start: b * H + start + n_at] = 1.0 / n_at
        start += n_at
    pool = jnp.asarray(pool, jnp.float32)

    return (w1f, jnp.asarray(b1), w2b, jnp.asarray(b2), w3b, jnp.asarray(b3),
            pool, wf1e, bf1p, wf2p, bf2p, wop, bop)


# ---------------------------------------------------------------------------
# Forward
# ---------------------------------------------------------------------------
def distance_discriminator_forward(x, prepped, n_atoms_elements, tb):
    """x: (B, 1, H, n_neighbors) float32, NCHW like the PyTorch module."""
    B, C_in, H, W = x.shape
    E = len(n_atoms_elements)
    assert C_in == 1
    assert H == sum(n_atoms_elements)
    assert all(n > 0 for n in n_atoms_elements)

    (w1f, b1, w2b, b2, w3b, b3, pool, wf1e, bf1p, wf2p, bf2p, wop, bop) = prepped

    grid_b = pl.cdiv(B, tb)
    b_pad = grid_b * tb

    # (B,1,H,W) -> (B*H, W); pad batch to a multiple of TB (padded rows are
    # zeros -> harmless, sliced off below).
    x2 = x.reshape(B * H, W)
    if b_pad != B:
        x2 = jnp.pad(x2, ((0, (b_pad - B) * H), (0, 0)))

    def resident(shape):  # full-array block, constant index -> VMEM-resident
        n = len(shape)
        return pl.BlockSpec(shape, lambda i, _n=n: (0,) * _n)

    feat, logit = pl.pallas_call(
        make_fused_kernel(E),
        out_shape=(jax.ShapeDtypeStruct((b_pad, F2P), jnp.float32),
                   jax.ShapeDtypeStruct((b_pad, OP), jnp.float32)),
        grid=(grid_b,),
        in_specs=[
            pl.BlockSpec((tb * H, W), lambda i: (i, 0)),    # per-tile atom rows
            resident(w1f.shape), resident(b1.shape),
            resident(w2b.shape), resident(b2.shape),
            resident(w3b.shape), resident(b3.shape),
            resident(pool.shape),
            resident(wf1e.shape), resident(bf1p.shape),
            resident(wf2p.shape), resident(bf2p.shape),
            resident(wop.shape), resident(bop.shape),
        ],
        out_specs=(pl.BlockSpec((tb, F2P), lambda i: (i, 0)),
                   pl.BlockSpec((tb, OP), lambda i: (i, 0))),
        compiler_params=pltpu.CompilerParams(
            dimension_semantics=("parallel",),        # shards over v7x's 2 TCs
            vmem_limit_bytes=32 * 1024 * 1024),       # safe on v5e/v6e/v7x
    )(x2, w1f, b1, w2b, b2, w3b, b3, pool, wf1e, bf1p, wf2p, bf2p, wop, bop)

    return feat[:B, :F2], logit[:B, :OUT]


# ---------------------------------------------------------------------------
# Synthetic parameters + pure-JAX reference
# ---------------------------------------------------------------------------
def init_params(key, n_neighbors, n_elements):
    """Deterministic synthetic parameters, stored in matmul (in, out) layout."""
    ks = jax.random.split(key, 12)
    s = 0.05
    w1 = jax.random.normal(ks[0], (n_neighbors, C1), jnp.float32) * s
    b1 = jax.random.normal(ks[1], (1, C1), jnp.float32) * s
    w2 = jax.random.normal(ks[2], (C1, C2), jnp.float32) * s
    b2 = jax.random.normal(ks[3], (1, C2), jnp.float32) * s
    w3 = jax.random.normal(ks[4], (C2, C3), jnp.float32) * s
    b3 = jax.random.normal(ks[5], (1, C3), jnp.float32) * s
    wf1 = jax.random.normal(ks[6], (C3 * n_elements, F1), jnp.float32) * s
    bf1 = jax.random.normal(ks[7], (1, F1), jnp.float32) * s
    wf2 = jax.random.normal(ks[8], (F1, F2), jnp.float32) * s
    bf2 = jax.random.normal(ks[9], (1, F2), jnp.float32) * s
    wo = jax.random.normal(ks[10], (F2, OUT), jnp.float32) * s
    bo = jax.random.normal(ks[11], (1, OUT), jnp.float32) * s
    return (w1, b1, w2, b2, w3, b3, wf1, bf1, wf2, bf2, wo, bo)


def reference_forward(x, params, n_atoms_elements):
    """Pure-JAX f32 reference reproducing the PyTorch semantics."""
    (w1, b1, w2, b2, w3, b3, wf1, bf1, wf2, bf2, wo, bo) = params
    B, _, H, W = x.shape
    E = len(n_atoms_elements)
    h = x.reshape(B * H, W)
    h = _lrelu(h @ w1 + b1)
    h = _lrelu(h @ w2 + b2)
    h = _lrelu(h @ w3 + b3)                    # (B*H, 256)
    h = h.reshape(B, H, C3)
    pooled = []
    start = 0
    for n_at in n_atoms_elements:
        pooled.append(jnp.mean(h[:, start:start + n_at, :], axis=1))  # (B, 256)
        start += n_at
    z = jnp.stack(pooled, axis=1)                       # (B, E, 256)
    z = z.transpose(0, 2, 1).reshape(B, C3 * E)         # PyTorch order c*E + e
    f = _lrelu(z @ wf1 + bf1)
    f = _lrelu(f @ wf2 + bf2)
    return f, f @ wo + bo


if __name__ == "__main__":
    # Small shapes consistent with the module's forward:
    #   n_neighbors = 8, n_atoms_elements = [3, 5]  (2 element types, 8 atoms)
    #   x: (B=2, C=1, H=8 atoms, W=8 neighbors)
    n_neighbors = 8
    n_atoms_elements = [3, 5]
    B = 2
    H = sum(n_atoms_elements)

    key = jax.random.PRNGKey(0)
    kx, kp = jax.random.split(key)
    x = jax.random.normal(kx, (B, 1, H, n_neighbors), jnp.float32)
    params = init_params(kp, n_neighbors, len(n_atoms_elements))

    tb = pick_tile_batch(B)
    prepped = prepare_params(params, n_atoms_elements, n_neighbors, tb)

    feature, logits = distance_discriminator_forward(x, prepped,
                                                     n_atoms_elements, tb)
    feature = jax.block_until_ready(feature)
    logits = jax.block_until_ready(logits)

    ref_feat, ref_logits = reference_forward(x, params, n_atoms_elements)

    assert feature.shape == (B, F2)
    assert logits.shape == (B, OUT)
    # Wide matmuls run with bf16 operands (f32 accumulate); compare against the
    # f32 reference with a bf16-appropriate tolerance.
    assert jnp.allclose(feature, ref_feat, atol=2e-2, rtol=2e-2)
    assert jnp.allclose(logits, ref_logits, atol=2e-2, rtol=2e-2)

    print("KERNEL_OK")
</pallas_src>

<mosaic_0001>
module attributes {stable_mosaic.version = 11 : i64} {
  func.func @kernel(%arg0: i32, %arg1: memref<64x8xf32, #tpu.memory_space<vmem>>, %arg2: memref<8x512xf32, #tpu.memory_space<vmem>>, %arg3: memref<1x512xf32, #tpu.memory_space<vmem>>, %arg4: memref<512x512xbf16, #tpu.memory_space<vmem>>, %arg5: memref<1x512xf32, #tpu.memory_space<vmem>>, %arg6: memref<512x256xbf16, #tpu.memory_space<vmem>>, %arg7: memref<1x256xf32, #tpu.memory_space<vmem>>, %arg8: memref<2x8x64xf32, #tpu.memory_space<vmem>>, %arg9: memref<2x256x1024xbf16, #tpu.memory_space<vmem>>, %arg10: memref<1x1024xf32, #tpu.memory_space<vmem>>, %arg11: memref<1024x256xbf16, #tpu.memory_space<vmem>>, %arg12: memref<1x256xf32, #tpu.memory_space<vmem>>, %arg13: memref<256x128xbf16, #tpu.memory_space<vmem>>, %arg14: memref<1x128xf32, #tpu.memory_space<vmem>>, %arg15: memref<8x256xf32, #tpu.memory_space<vmem>>, %arg16: memref<8x128xf32, #tpu.memory_space<vmem>>) attributes {dimension_semantics = [#tpu.dimension_semantics<parallel>], iteration_bounds = array<i64: 1>, scalar_prefetch = 0 : i64, scratch_operands = 0 : i64, tpu.core_type = #tpu.core_type<tc>, window_params = [{transform_indices = @transform_0, window_bounds = array<i64: 64, 8>}, {pipeline_mode = #tpu.pipeline_mode<synchronous>, transform_indices = @transform_1, window_bounds = array<i64: 8, 512>}, {pipeline_mode = #tpu.pipeline_mode<synchronous>, transform_indices = @transform_2, window_bounds = array<i64: 1, 512>}, {pipeline_mode = #tpu.pipeline_mode<synchronous>, transform_indices = @transform_3, window_bounds = array<i64: 512, 512>}, {pipeline_mode = #tpu.pipeline_mode<synchronous>, transform_indices = @transform_4, window_bounds = array<i64: 1, 512>}, {pipeline_mode = #tpu.pipeline_mode<synchronous>, transform_indices = @transform_5, window_bounds = array<i64: 512, 256>}, {pipeline_mode = #tpu.pipeline_mode<synchronous>, transform_indices = @transform_6, window_bounds = array<i64: 1, 256>}, {pipeline_mode = #tpu.pipeline_mode<synchronous>, transform_indices = @transform_7, window_bounds = array<i64: 2, 8, 64>}, {pipeline_mode = #tpu.pipeline_mode<synchronous>, transform_indices = @transform_8, window_bounds = array<i64: 2, 256, 1024>}, {pipeline_mode = #tpu.pipeline_mode<synchronous>, transform_indices = @transform_9, window_bounds = array<i64: 1, 1024>}, {pipeline_mode = #tpu.pipeline_mode<synchronous>, transform_indices = @transform_10, window_bounds = array<i64: 1024, 256>}, {pipeline_mode = #tpu.pipeline_mode<synchronous>, transform_indices = @transform_11, window_bounds = array<i64: 1, 256>}, {pipeline_mode = #tpu.pipeline_mode<synchronous>, transform_indices = @transform_12, window_bounds = array<i64: 256, 128>}, {pipeline_mode = #tpu.pipeline_mode<synchronous>, transform_indices = @transform_13, window_bounds = array<i64: 1, 128>}, {transform_indices = @transform_14, window_bounds = array<i64: 8, 256>}, {transform_indices = @transform_15, window_bounds = array<i64: 8, 128>}]} {
    %c0 = arith.constant 0 : index
    %c0_0 = arith.constant 0 : index
    %0 = vector.load %arg1[%c0, %c0_0] : memref<64x8xf32, #tpu.memory_space<vmem>>, vector<64x8xf32>
    %c0_1 = arith.constant 0 : index
    %c0_2 = arith.constant 0 : index
    %1 = vector.load %arg2[%c0_1, %c0_2] : memref<8x512xf32, #tpu.memory_space<vmem>>, vector<8x512xf32>
    %cst = arith.constant dense<0.000000e+00> : vector<64x512xf32>
    %2 = tpu.matmul %0, %1, %cst {dimension_numbers = #tpu.dot_dimension_numbers<[1], [0], [0], [1], [0, 0, 1, 1], [], []>} : vector<64x8xf32>, vector<8x512xf32>, vector<64x512xf32> -> vector<64x512xf32>
    %c0_3 = arith.constant 0 : index
    %c0_4 = arith.constant 0 : index
    %3 = vector.load %arg3[%c0_3, %c0_4] : memref<1x512xf32, #tpu.memory_space<vmem>>, vector<1x512xf32>
    %4 = vector.broadcast %3 : vector<1x512xf32> to vector<64x512xf32>
    %5 = arith.addf %2, %4 : vector<64x512xf32>
    %cst_5 = arith.constant 0.000000e+00 : f32
    %6 = vector.broadcast %cst_5 : f32 to vector<64x512xf32>
    %7 = arith.cmpf ogt, %5, %6 : vector<64x512xf32>
    %cst_6 = arith.constant 2.000000e-01 : f32
    %8 = vector.broadcast %cst_6 : f32 to vector<64x512xf32>
    %9 = arith.mulf %8, %5 : vector<64x512xf32>
    %10 = arith.select %7, %5, %9 : vector<64x512xi1>, vector<64x512xf32>
    %11 = arith.truncf %10 : vector<64x512xf32> to vector<64x512xbf16>
    %c0_7 = arith.constant 0 : index
    %c0_8 = arith.constant 0 : index
    %12 = vector.load %arg4[%c0_7, %c0_8] : memref<512x512xbf16, #tpu.memory_space<vmem>>, vector<512x512xbf16>
    %cst_9 = arith.constant dense<0.000000e+00> : vector<64x512xf32>
    %13 = tpu.matmul %11, %12, %cst_9 {dimension_numbers = #tpu.dot_dimension_numbers<[1], [0], [0], [1], [0, 0, 1, 1], [], []>} : vector<64x512xbf16>, vector<512x512xbf16>, vector<64x512xf32> -> vector<64x512xf32>
    %c0_10 = arith.constant 0 : index
    %c0_11 = arith.constant 0 : index
    %14 = vector.load %arg5[%c0_10, %c0_11] : memref<1x512xf32, #tpu.memory_space<vmem>>, vector<1x512xf32>
    %15 = vector.broadcast %14 : vector<1x512xf32> to vector<64x512xf32>
    %16 = arith.addf %13, %15 : vector<64x512xf32>
    %cst_12 = arith.constant 0.000000e+00 : f32
    %17 = vector.broadcast %cst_12 : f32 to vector<64x512xf32>
    %18 = arith.cmpf ogt, %16, %17 : vector<64x512xf32>
    %cst_13 = arith.constant 2.000000e-01 : f32
    %19 = vector.broadcast %cst_13 : f32 to vector<64x512xf32>
    %20 = arith.mulf %19, %16 : vector<64x512xf32>
    %21 = arith.select %18, %16, %20 : vector<64x512xi1>, vector<64x512xf32>
    %22 = arith.truncf %21 : vector<64x512xf32> to vector<64x512xbf16>
    %c0_14 = arith.constant 0 : index
    %c0_15 = arith.constant 0 : index
    %23 = vector.load %arg6[%c0_14, %c0_15] : memref<512x256xbf16, #tpu.memory_space<vmem>>, vector<512x256xbf16>
    %cst_16 = arith.constant dense<0.000000e+00> : vector<64x256xf32>
    %24 = tpu.matmul %22, %23, %cst_16 {dimension_numbers = #tpu.dot_dimension_numbers<[1], [0], [0], [1], [0, 0, 1, 1], [], []>} : vector<64x512xbf16>, vector<512x256xbf16>, vector<64x256xf32> -> vector<64x256xf32>
    %c0_17 = arith.constant 0 : index
    %c0_18 = arith.constant 0 : index
    %25 = vector.load %arg7[%c0_17, %c0_18] : memref<1x256xf32, #tpu.memory_space<vmem>>, vector<1x256xf32>
    %26 = vector.broadcast %25 : vector<1x256xf32> to vector<64x256xf32>
    %27 = arith.addf %24, %26 : vector<64x256xf32>
    %cst_19 = arith.constant 0.000000e+00 : f32
    %28 = vector.broadcast %cst_19 : f32 to vector<64x256xf32>
    %29 = arith.cmpf ogt, %27, %28 : vector<64x256xf32>
    %cst_20 = arith.constant 2.000000e-01 : f32
    %30 = vector.broadcast %cst_20 : f32 to vector<64x256xf32>
    %31 = arith.mulf %30, %27 : vector<64x256xf32>
    %32 = arith.select %29, %27, %31 : vector<64x256xi1>, vector<64x256xf32>
    %c0_21 = arith.constant 0 : index
    %c0_22 = arith.constant 0 : index
    %33 = vector.load %arg10[%c0_21, %c0_22] : memref<1x1024xf32, #tpu.memory_space<vmem>>, vector<1x1024xf32>
    %c0_23 = arith.constant 0 : index
    %c0_24 = arith.constant 0 : index
    %c0_25 = arith.constant 0 : index
    %34 = vector.load %arg8[%c0_23, %c0_24, %c0_25] : memref<2x8x64xf32, #tpu.memory_space<vmem>>, vector<1x8x64xf32>
    %35 = vector.shape_cast %34 : vector<1x8x64xf32> to vector<8x64xf32>
    %cst_26 = arith.constant dense<0.000000e+00> : vector<8x256xf32>
    %36 = tpu.matmul %35, %32, %cst_26 {dimension_numbers = #tpu.dot_dimension_numbers<[1], [0], [0], [1], [0, 0, 1, 1], [], []>} : vector<8x64xf32>, vector<64x256xf32>, vector<8x256xf32> -> vector<8x256xf32>
    %37 = arith.truncf %36 : vector<8x256xf32> to vector<8x256xbf16>
    %c0_27 = arith.constant 0 : index
    %c0_28 = arith.constant 0 : index
    %c0_29 = arith.constant 0 : index
    %38 = vector.load %arg9[%c0_27, %c0_28, %c0_29] : memref<2x256x1024xbf16, #tpu.memory_space<vmem>>, vector<1x256x1024xbf16>
    %39 = vector.shape_cast %38 : vector<1x256x1024xbf16> to vector<256x1024xbf16>
    %cst_30 = arith.constant dense<0.000000e+00> : vector<8x1024xf32>
    %40 = tpu.matmul %37, %39, %cst_30 {dimension_numbers = #tpu.dot_dimension_numbers<[1], [0], [0], [1], [0, 0, 1, 1], [], []>} : vector<8x256xbf16>, vector<256x1024xbf16>, vector<8x1024xf32> -> vector<8x1024xf32>
    %41 = vector.broadcast %33 : vector<1x1024xf32> to vector<8x1024xf32>
    %42 = arith.addf %41, %40 : vector<8x1024xf32>
    %c1 = arith.constant 1 : index
    %c0_31 = arith.constant 0 : index
    %c0_32 = arith.constant 0 : index
    %43 = vector.load %arg8[%c1, %c0_31, %c0_32] : memref<2x8x64xf32, #tpu.memory_space<vmem>>, vector<1x8x64xf32>
    %44 = vector.shape_cast %43 : vector<1x8x64xf32> to vector<8x64xf32>
    %cst_33 = arith.constant dense<0.000000e+00> : vector<8x256xf32>
    %45 = tpu.matmul %44, %32, %cst_33 {dimension_numbers = #tpu.dot_dimension_numbers<[1], [0], [0], [1], [0, 0, 1, 1], [], []>} : vector<8x64xf32>, vector<64x256xf32>, vector<8x256xf32> -> vector<8x256xf32>
    %46 = arith.truncf %45 : vector<8x256xf32> to vector<8x256xbf16>
    %c1_34 = arith.constant 1 : index
    %c0_35 = arith.constant 0 : index
    %c0_36 = arith.constant 0 : index
    %47 = vector.load %arg9[%c1_34, %c0_35, %c0_36] : memref<2x256x1024xbf16, #tpu.memory_space<vmem>>, vector<1x256x1024xbf16>
    %48 = vector.shape_cast %47 : vector<1x256x1024xbf16> to vector<256x1024xbf16>
    %cst_37 = arith.constant dense<0.000000e+00> : vector<8x1024xf32>
    %49 = tpu.matmul %46, %48, %cst_37 {dimension_numbers = #tpu.dot_dimension_numbers<[1], [0], [0], [1], [0, 0, 1, 1], [], []>} : vector<8x256xbf16>, vector<256x1024xbf16>, vector<8x1024xf32> -> vector<8x1024xf32>
    %50 = arith.addf %42, %49 : vector<8x1024xf32>
    %cst_38 = arith.constant 0.000000e+00 : f32
    %51 = vector.broadcast %cst_38 : f32 to vector<8x1024xf32>
    %52 = arith.cmpf ogt, %50, %51 : vector<8x1024xf32>
    %cst_39 = arith.constant 2.000000e-01 : f32
    %53 = vector.broadcast %cst_39 : f32 to vector<8x1024xf32>
    %54 = arith.mulf %53, %50 : vector<8x1024xf32>
    %55 = arith.select %52, %50, %54 : vector<8x1024xi1>, vector<8x1024xf32>
    %56 = arith.truncf %55 : vector<8x1024xf32> to vector<8x1024xbf16>
    %c0_40 = arith.constant 0 : index
    %c0_41 = arith.constant 0 : index
    %57 = vector.load %arg11[%c0_40, %c0_41] : memref<1024x256xbf16, #tpu.memory_space<vmem>>, vector<1024x256xbf16>
    %cst_42 = arith.constant dense<0.000000e+00> : vector<8x256xf32>
    %58 = tpu.matmul %56, %57, %cst_42 {dimension_numbers = #tpu.dot_dimension_numbers<[1], [0], [0], [1], [0, 0, 1, 1], [], []>} : vector<8x1024xbf16>, vector<1024x256xbf16>, vector<8x256xf32> -> vector<8x256xf32>
    %c0_43 = arith.constant 0 : index
    %c0_44 = arith.constant 0 : index
    %59 = vector.load %arg12[%c0_43, %c0_44] : memref<1x256xf32, #tpu.memory_space<vmem>>, vector<1x256xf32>
    %60 = vector.broadcast %59 : vector<1x256xf32> to vector<8x256xf32>
    %61 = arith.addf %58, %60 : vector<8x256xf32>
    %cst_45 = arith.constant 0.000000e+00 : f32
    %62 = vector.broadcast %cst_45 : f32 to vector<8x256xf32>
    %63 = arith.cmpf ogt, %61, %62 : vector<8x256xf32>
    %cst_46 = arith.constant 2.000000e-01 : f32
    %64 = vector.broadcast %cst_46 : f32 to vector<8x256xf32>
    %65 = arith.mulf %64, %61 : vector<8x256xf32>
    %66 = arith.select %63, %61, %65 : vector<8x256xi1>, vector<8x256xf32>
    %c0_47 = arith.constant 0 : index
    %c0_48 = arith.constant 0 : index
    %67 = vector.load %arg15[%c0_47, %c0_48] : memref<8x256xf32, #tpu.memory_space<vmem>>, vector<8x256xf32>
    tpu.vector_store %arg15[%c0_47, %c0_48], %66 {strides = array<i32>} : memref<8x256xf32, #tpu.memory_space<vmem>>, vector<8x256xf32>,
    %68 = arith.truncf %66 : vector<8x256xf32> to vector<8x256xbf16>
    %c0_49 = arith.constant 0 : index
    %c0_50 = arith.constant 0 : index
    %69 = vector.load %arg13[%c0_49, %c0_50] : memref<256x128xbf16, #tpu.memory_space<vmem>>, vector<256x128xbf16>
    %cst_51 = arith.constant dense<0.000000e+00> : vector<8x128xf32>
    %70 = tpu.matmul %68, %69, %cst_51 {dimension_numbers = #tpu.dot_dimension_numbers<[1], [0], [0], [1], [0, 0, 1, 1], [], []>} : vector<8x256xbf16>, vector<256x128xbf16>, vector<8x128xf32> -> vector<8x128xf32>
    %c0_52 = arith.constant 0 : index
    %c0_53 = arith.constant 0 : index
    %71 = vector.load %arg14[%c0_52, %c0_53] : memref<1x128xf32, #tpu.memory_space<vmem>>, vector<1x128xf32>
    %72 = vector.broadcast %71 : vector<1x128xf32> to vector<8x128xf32>
    %73 = arith.addf %70, %72 : vector<8x128xf32>
    %c0_54 = arith.constant 0 : index
    %c0_55 = arith.constant 0 : index
    %74 = vector.load %arg16[%c0_54, %c0_55] : memref<8x128xf32, #tpu.memory_space<vmem>>, vector<8x128xf32>
    tpu.vector_store %arg16[%c0_54, %c0_55], %73 {strides = array<i32>} : memref<8x128xf32, #tpu.memory_space<vmem>>, vector<8x128xf32>,
    return
  }
  func.func @transform_0(%arg0: i32) -> (i32, i32) {
    %c0_i32 = arith.constant 0 : i32
    %c0_i32_0 = arith.constant 0 : i32
    return %arg0, %c0_i32 : i32, i32
  }
  func.func @transform_1(%arg0: i32) -> (i32, i32) {
    %c0_i32 = arith.constant 0 : i32
    %c0_i32_0 = arith.constant 0 : i32
    %c0_i32_1 = arith.constant 0 : i32
    return %c0_i32, %c0_i32_0 : i32, i32
  }
  func.func @transform_2(%arg0: i32) -> (i32, i32) {
    %c0_i32 = arith.constant 0 : i32
    %c0_i32_0 = arith.constant 0 : i32
    %c0_i32_1 = arith.constant 0 : i32
    return %c0_i32, %c0_i32_0 : i32, i32
  }
  func.func @transform_3(%arg0: i32) -> (i32, i32) {
    %c0_i32 = arith.constant 0 : i32
    %c0_i32_0 = arith.constant 0 : i32
    %c0_i32_1 = arith.constant 0 : i32
    return %c0_i32, %c0_i32_0 : i32, i32
  }
  func.func @transform_4(%arg0: i32) -> (i32, i32) {
    %c0_i32 = arith.constant 0 : i32
    %c0_i32_0 = arith.constant 0 : i32
    %c0_i32_1 = arith.constant 0 : i32
    return %c0_i32, %c0_i32_0 : i32, i32
  }
  func.func @transform_5(%arg0: i32) -> (i32, i32) {
    %c0_i32 = arith.constant 0 : i32
    %c0_i32_0 = arith.constant 0 : i32
    %c0_i32_1 = arith.constant 0 : i32
    return %c0_i32, %c0_i32_0 : i32, i32
  }
  func.func @transform_6(%arg0: i32) -> (i32, i32) {
    %c0_i32 = arith.constant 0 : i32
    %c0_i32_0 = arith.constant 0 : i32
    %c0_i32_1 = arith.constant 0 : i32
    return %c0_i32, %c0_i32_0 : i32, i32
  }
  func.func @transform_7(%arg0: i32) -> (i32, i32, i32) {
    %c0_i32 = arith.constant 0 : i32
    %c0_i32_0 = arith.constant 0 : i32
    %c0_i32_1 = arith.constant 0 : i32
    %c0_i32_2 = arith.constant 0 : i32
    return %c0_i32, %c0_i32_0, %c0_i32_1 : i32, i32, i32
  }
  func.func @transform_8(%arg0: i32) -> (i32, i32, i32) {
    %c0_i32 = arith.constant 0 : i32
    %c0_i32_0 = arith.constant 0 : i32
    %c0_i32_1 = arith.constant 0 : i32
    %c0_i32_2 = arith.constant 0 : i32
    return %c0_i32, %c0_i32_0, %c0_i32_1 : i32, i32, i32
  }
  func.func @transform_9(%arg0: i32) -> (i32, i32) {
    %c0_i32 = arith.constant 0 : i32
    %c0_i32_0 = arith.constant 0 : i32
    %c0_i32_1 = arith.constant 0 : i32
    return %c0_i32, %c0_i32_0 : i32, i32
  }
  func.func @transform_10(%arg0: i32) -> (i32, i32) {
    %c0_i32 = arith.constant 0 : i32
    %c0_i32_0 = arith.constant 0 : i32
    %c0_i32_1 = arith.constant 0 : i32
    return %c0_i32, %c0_i32_0 : i32, i32
  }
  func.func @transform_11(%arg0: i32) -> (i32, i32) {
    %c0_i32 = arith.constant 0 : i32
    %c0_i32_0 = arith.constant 0 : i32
    %c0_i32_1 = arith.constant 0 : i32
    return %c0_i32, %c0_i32_0 : i32, i32
  }
  func.func @transform_12(%arg0: i32) -> (i32, i32) {
    %c0_i32 = arith.constant 0 : i32
    %c0_i32_0 = arith.constant 0 : i32
    %c0_i32_1 = arith.constant 0 : i32
    return %c0_i32, %c0_i32_0 : i32, i32
  }
  func.func @transform_13(%arg0: i32) -> (i32, i32) {
    %c0_i32 = arith.constant 0 : i32
    %c0_i32_0 = arith.constant 0 : i32
    %c0_i32_1 = arith.constant 0 : i32
    return %c0_i32, %c0_i32_0 : i32, i32
  }
  func.func @transform_14(%arg0: i32) -> (i32, i32) {
    %c0_i32 = arith.constant 0 : i32
    %c0_i32_0 = arith.constant 0 : i32
    return %arg0, %c0_i32 : i32, i32
  }
  func.func @transform_15(%arg0: i32) -> (i32, i32) {
    %c0_i32 = arith.constant 0 : i32
    %c0_i32_0 = arith.constant 0 : i32
    return %arg0, %c0_i32 : i32, i32
  }
}

</mosaic_0001>

<bundles_post_ra>
// kernel: tpu_custom_call.1
= control target key start
LH: loop header
LB: loop body
LE: loop exit
PB: predicated region body
PF: predicated region fallthrough
CT: control target
= control target key end

     0   :  { %21 = vsyncpa [#allocation3], 0  ;;  %s9845_s0 = inlined_call_operand.vmem [shape: f32[64,8], index: 0, kind: input, shape index: {}]   ;;  %s9846_s1 = inlined_call_operand.vmem [shape: f32[8,512], index: 1, kind: input, shape index: {}]   ;;  %s9847_s2 = inlined_call_operand.vmem [shape: f32[1,512], index: 2, kind: input, shape index: {}]   ;;  %s9848_s3 = inlined_call_operand.hbm [shape: bf16[512,512], index: 3, kind: input, shape index: {}]   ;;  %s9849_s4 = inlined_call_operand.vmem [shape: f32[1,512], index: 4, kind: input, shape index: {}]   ;;  %s9850_s5 = inlined_call_operand.hbm [shape: bf16[512,256], index: 5, kind: input, shape index: {}]   ;;  %s9851_s6 = inlined_call_operand.vmem [shape: f32[1,256], index: 6, kind: input, shape index: {}]   ;;  %s9852_s7 = inlined_call_operand.vmem [shape: f32[2,8,64], index: 7, kind: input, shape index: {}]   ;;  %s9853_s8 = inlined_call_operand.hbm [shape: bf16[2,256,1024], index: 8, kind: input, shape index: {}]   ;;  %s9854_s9 = inlined_call_operand.vmem [shape: f32[1,1024], index: 9, kind: input, shape index: {}]   ;;  %s9855_s10 = inlined_call_operand.hbm [shape: bf16[1024,256], index: 10, kind: input, shape index: {}]   ;;  %s9856_s11 = inlined_call_operand.vmem [shape: f32[1,256], index: 11, kind: input, shape index: {}]   ;;  %s9857_s12 = inlined_call_operand.hbm [shape: bf16[256,128], index: 12, kind: input, shape index: {}]   ;;  %s9858_s13 = inlined_call_operand.vmem [shape: f32[1,128], index: 13, kind: input, shape index: {}]   ;;  %s9859_s14 = inlined_call_operand.hbm [shape: f32[8,256], index: 14, kind: output, shape index: {0}]   ;;  %s9860_s15 = inlined_call_operand.hbm [shape: f32[8,128], index: 15, kind: output, shape index: {1}]  }
   0x1   :  { %22 = vsyncpa [#allocation6], 0 }
   0x2   :  { %23 = vsyncpa [#allocation9], 0 }
   0x3   :  { %24 = vsyncpa [#allocation4], 0  ;;  %s51_s20 = sshll.u32 %s9850_s5, 4  ;;  %s52_s20 = int_to_ptr.hbm [resolvable:$true] %s51_s20 }
   0x4   :  { %25 = vsyncpa [#allocation13], 0  ;;  %s8967_s21 = smov [#allocation5]   ;;  %s83_s25 = sshll.u32 %s9855_s10, 4  ;;  %s84_s25 = int_to_ptr.hbm [resolvable:$true] %s83_s25 }
   0x5   :  { %s53_s22 = sshll.u32 %s8967_s21, 4  ;;  %s8968_s26 = smov 128   ;;  %s54_s22 = int_to_ptr.vmem [resolvable:$true] %s53_s22 }
   0x6   :  { %s8969_s27 = smov 8   ;;  %s8970_s28 = smov [#allocation8]  }
   0x7   :  { %59 = dma.hbm_to_vmem [thread:$0]  %s52_s20, 8192, %s54_s22, [#allocation6], %s8968_s26, %s8968_s26, %s8969_s27  }
   0x8   :  { %s85_s29 = sshll.u32 %s8970_s28, 4  ;;  %s36_s17 = sshll.u32 %s9848_s3, 4  ;;  %s86_s29 = int_to_ptr.vmem [resolvable:$true] %s85_s29  ;;  %s37_s17 = int_to_ptr.hbm [resolvable:$true] %s36_s17 }
   0x9   :  { %91 = dma.hbm_to_vmem [thread:$0]  %s84_s25, 16384, %s86_s29, [#allocation9], %s8968_s26, %s8968_s26, %s8969_s27  }
   0xa   :  { %s8971_s5 = smov [#allocation2]   ;;  %s68_s10 = sshll.u32 %s9853_s8, 4  ;;  %s69_s10 = int_to_ptr.hbm [resolvable:$true] %s68_s10 }
   0xb   :  { %s38_s18 = sshll.u32 %s8971_s5, 4  ;;  %s8972_s23 = smov 256   ;;  %s39_s18 = int_to_ptr.vmem [resolvable:$true] %s38_s18 }
   0xc   :  { %s8973_s24 = smov 16   ;;  %s8974_s20 = smov [#allocation7]  }
   0xd   :  { %44 = dma.hbm_to_vmem [thread:$0]  %s37_s17, 16384, %s39_s18, [#allocation3], %s8972_s23, %s8972_s23, %s8973_s24  }
   0xe   :  { %s70_s22 = sshll.u32 %s8974_s20, 4  ;;  %s8975_s28 = smov 512   ;;  %s71_s22 = int_to_ptr.vmem [resolvable:$true] %s70_s22 }
   0xf   :  { %s8976_s30 = smov 32   ;;  %s98_s25 = sshll.u32 %s9857_s12, 4  ;;  %s99_s25 = int_to_ptr.hbm [resolvable:$true] %s98_s25 }
  0x10   :  { %76 = dma.hbm_to_vmem [thread:$0]  %s69_s10, 32768, %s71_s22, [#allocation6], %s8975_s28, %s8975_s28, %s8976_s30  }
  0x11   :  { %s8977_s26 = smov [#allocation10]   ;;  %s8978_s29 = smov 64  }
  0x12   :  { %s100_s27 = sshll.u32 %s8977_s26, 4  ;;  %s8979_s8 = smov 4   ;;  %s101_s27 = int_to_ptr.vmem [resolvable:$true] %s100_s27 }
  0x13   :  { %106 = dma.hbm_to_vmem [thread:$0]  %s99_s25, 2048, %s101_s27, [#allocation9], %s8978_s29, %s8978_s29, %s8979_s8  }
  0x14   :  { %8957 = dma.done.wait [#allocation3], 16384  }
  0x15   :  { %8958 = vsyncadd [#allocation3], 4294950912 }
  0x16   :  { %8959 = dma.done.wait [#allocation6], 40960  }
  0x17   :  { %8960 = vsyncadd [#allocation6], 4294926336 }
  0x18   :  { %8961 = dma.done.wait [#allocation9], 18432  }
  0x19   :  { %8962 = vsyncadd [#allocation9], 4294948864  ;;  %v137_v0 = vld [vmem:[%s9846_s1] sm:$0xff]  ;;  %v138_v1 = vld [vmem:[%s9846_s1 + $0x8] sm:$0xff]  ;;  %vm151_vm0 = vcmask 64512   ;;  %s5747_s25 = sshll.u32 %s9859_s14, 4  ;;  %s5748_s25 = int_to_ptr.hbm [resolvable:$true] %s5747_s25 }
  0x1a   :  { %v139_v2 = vld [vmem:[%s9846_s1 + $0x10] sm:$0xff]  ;;  %191 = vmatpush.msra.mxu0 %v137_v0  ;;  %232 = vmatpush.msra.mxu1 %v138_v1  ;;  %v140_v3 = vld [vmem:[%s9846_s1 + $0x18] sm:$0xff]  ;;  %v129_v4 = vld [vmem:[%s9845_s0] sm:$0xff]  ;;  %s8981_s29 = smov [#allocation12]   ;;  %s5758_s18 = sshll.u32 %s9860_s15, 4  ;;  %s5759_s18 = int_to_ptr.hbm [resolvable:$true] %s5758_s18 }
  0x1b   :  { %273 = vmatpush.msra.mxu2 %v139_v2  ;;  %314 = vmatpush.msra.mxu3 %v140_v3  ;;  %v130_v5 = vld [vmem:[%s9845_s0 + $0x8] sm:$0xff]  ;;  %v131_v6 = vld [vmem:[%s9845_s0 + $0x10] sm:$0xff]  ;;  %v132_v7 = vld [vmem:[%s9845_s0 + $0x18] sm:$0xff]  ;;  %s5756_s8 = sshll.u32 %s8981_s29, 4  ;;  %s5757_s8 = int_to_ptr.vmem [resolvable:$true] %s5756_s8 }
  0x1c   :  { %5775 = vmatmul.msk.f32.vlgmr.msra.gmra.mxu0 %vm151_vm0, %v129_v4  ;;  %5783 = vmatmul.msk.f32.vlgmr.msra.gmra.mxu1 %vm151_vm0, %v129_v4  ;;  %v5921_v8 = vld [vmem:[#allocation2 + $0xe0] sm:$0xf]  ;;  %v8210_v9 = vld [vmem:[#allocation2 + $0xec] sm:$0xf0]  ;;  %v134_v49 = vld [vmem:[%s9845_s0 + $0x28] sm:$0xff] }
  0x1d   :  { %5791 = vmatmul.msk.f32.vlgmr.msra.gmra.mxu2 %vm151_vm0, %v129_v4  ;;  %5799 = vmatmul.msk.f32.vlgmr.msra.gmra.mxu3 %vm151_vm0, %v129_v4  ;;  %v6049_v10 = vld [vmem:[#allocation2 + $0x1e0] sm:$0xf]  ;;  %v5922_v11 = vor.u32 %v8210_v9, %v5921_v8  ;;  %v8242_v12 = vld [vmem:[#allocation2 + $0x1ec] sm:$0xf0]  ;;  %v136_v53 = vld [vmem:[%s9845_s0 + $0x38] sm:$0xff] }
  0x1e   :  { %v5905_v13 = vld [vmem:[#allocation2 + $0xc0] sm:$0xf]  ;;  %v8206_v14 = vld [vmem:[#allocation2 + $0xcc] sm:$0xf0]  ;;  %v6050_v15 = vor.u32 %v8242_v12, %v6049_v10 }
  0x1f   :  { %v6033_v16 = vld [vmem:[#allocation2 + $0x1c0] sm:$0xf]  ;;  %v8238_v17 = vld [vmem:[#allocation2 + $0x1cc] sm:$0xf0]  ;;  %1230 = vmatpush.bf16.msrb.mxu0 %v5922_v11  ;;  %v5906_v27 = vor.u32 %v8206_v14, %v5905_v13 }
  0x20   :  { %v6177_v18 = vld [vmem:[#allocation2 + $0x2e0] sm:$0xf]  ;;  %v8274_v19 = vld [vmem:[#allocation2 + $0x2ec] sm:$0xf0]  ;;  %1259 = vmatpush.bf16.msrb.mxu1 %v6050_v15  ;;  %v6034_v28 = vor.u32 %v8238_v17, %v6033_v16 }
  0x21   :  { %v6305_v20 = vld [vmem:[#allocation2 + $0x3e0] sm:$0xf]  ;;  %v8306_v21 = vld [vmem:[#allocation2 + $0x3ec] sm:$0xf0]  ;;  %v6178_v23 = vor.u32 %v8274_v19, %v6177_v18 }
  0x22   :  { %v133_v22 = vld [vmem:[%s9845_s0 + $0x20] sm:$0xff]  ;;  %v6306_v24 = vor.u32 %v8306_v21, %v6305_v20  ;;  %v8202_v26 = vld [vmem:[#allocation2 + $0xac] sm:$0xf0] }
  0x23   :  { %v5889_v25 = vld [vmem:[#allocation2 + $0xa0] sm:$0xf]  ;;  %v8270_v31 = vld [vmem:[#allocation2 + $0x2cc] sm:$0xf0]  ;;  %1288 = vmatpush.bf16.msrb.mxu2 %v6178_v23  ;;  %1231 = vmatpush.bf16.msrb.mxu0 %v5906_v27 }
  0x24   :  { %5776 = vmatmul.msk.f32.gmra.mxu0 %vm151_vm0, %v130_v5  ;;  %5784 = vmatmul.msk.f32.gmra.mxu1 %vm151_vm0, %v130_v5  ;;  %v6017_v29 = vld [vmem:[#allocation2 + $0x1a0] sm:$0xf]  ;;  %v8234_v32 = vld [vmem:[#allocation2 + $0x1ac] sm:$0xf0]  ;;  %v5890_v40 = vor.u32 %v8202_v26, %v5889_v25 }
  0x25   :  { %5792 = vmatmul.msk.f32.gmra.mxu2 %vm151_vm0, %v130_v5  ;;  %5800 = vmatmul.msk.f32.gmra.mxu3 %vm151_vm0, %v130_v5  ;;  %v6161_v30 = vld [vmem:[#allocation2 + $0x2c0] sm:$0xf]  ;;  %v8302_v35 = vld [vmem:[#allocation2 + $0x3cc] sm:$0xf0]  ;;  %v6018_v41 = vor.u32 %v8234_v32, %v6017_v29 }
  0x26   :  { %1317 = vmatpush.bf16.msrb.mxu3 %v6306_v24  ;;  %v6162_v33 = vor.u32 %v8270_v31, %v6161_v30  ;;  %v6289_v34 = vld [vmem:[#allocation2 + $0x3c0] sm:$0xf]  ;;  %v8266_v38 = vld [vmem:[#allocation2 + $0x2ac] sm:$0xf0]  ;;  %1260 = vmatpush.bf16.msrb.mxu1 %v6034_v28 }
  0x27   :  { %v6290_v36 = vor.u32 %v8302_v35, %v6289_v34  ;;  %v6145_v37 = vld [vmem:[#allocation2 + $0x2a0] sm:$0xf]  ;;  %v8298_v43 = vld [vmem:[#allocation2 + $0x3ac] sm:$0xf0]  ;;  %1232 = vmatpush.bf16.msrb.mxu0 %v5890_v40 }
  0x28   :  { %v6273_v39 = vld [vmem:[#allocation2 + $0x3a0] sm:$0xf]  ;;  %1289 = vmatpush.bf16.msrb.mxu2 %v6162_v33  ;;  %v8198_v44 = vld [vmem:[#allocation2 + $0x8c] sm:$0xf0]  ;;  %v6146_v47 = vor.u32 %v8266_v38, %v6145_v37 }
  0x29   :  { %v5873_v42 = vld [vmem:[#allocation2 + $0x80] sm:$0xf]  ;;  %v8230_v46 = vld [vmem:[#allocation2 + $0x18c] sm:$0xf0]  ;;  %v6274_v48 = vor.u32 %v8298_v43, %v6273_v39 }
  0x2a   :  { %1318 = vmatpush.bf16.msrb.mxu3 %v6290_v36  ;;  %v6001_v45 = vld [vmem:[#allocation2 + $0x180] sm:$0xf]  ;;  %1261 = vmatpush.bf16.msrb.mxu1 %v6018_v41  ;;  %v5874_v50 = vor.u32 %v8198_v44, %v5873_v42  ;;  %v135_v52 = vld [vmem:[%s9845_s0 + $0x30] sm:$0xff] }
  0x2b   :  { %v6002_v51 = vor.u32 %v8230_v46, %v6001_v45  ;;  %v5857_v54 = vld [vmem:[#allocation2 + $0x60] sm:$0xf]  ;;  %v8194_v55 = vld [vmem:[#allocation2 + $0x6c] sm:$0xf0] }
  0x2c   :  { %5777 = vmatmul.msk.f32.gmra.mxu0 %vm151_vm0, %v131_v6  ;;  %5785 = vmatmul.msk.f32.gmra.mxu1 %vm151_vm0, %v131_v6  ;;  %v5985_v56 = vld [vmem:[#allocation2 + $0x160] sm:$0xf]  ;;  %v5858_v57 = vor.u32 %v8194_v55, %v5857_v54  ;;  %v8226_v58 = vld [vmem:[#allocation2 + $0x16c] sm:$0xf0] }
  0x2d   :  { %5793 = vmatmul.msk.f32.gmra.mxu2 %vm151_vm0, %v131_v6  ;;  %5801 = vmatmul.msk.f32.gmra.mxu3 %vm151_vm0, %v131_v6  ;;  %v5986_v59 = vor.u32 %v8226_v58, %v5985_v56  ;;  %v6129_v60 = vld [vmem:[#allocation2 + $0x280] sm:$0xf]  ;;  %v8262_v61 = vld [vmem:[#allocation2 + $0x28c] sm:$0xf0] }
  0x2e   :  { %1290 = vmatpush.bf16.msrb.mxu2 %v6146_v47  ;;  %1319 = vmatpush.bf16.msrb.mxu3 %v6274_v48  ;;  %v6257_v62 = vld [vmem:[#allocation2 + $0x380] sm:$0xf]  ;;  %v6130_v63 = vor.u32 %v8262_v61, %v6129_v60  ;;  %v8294_v0 = vld [vmem:[#allocation2 + $0x38c] sm:$0xf0] }
  0x2f   :  { %1233 = vmatpush.bf16.msrb.mxu0 %v5874_v50  ;;  %1262 = vmatpush.bf16.msrb.mxu1 %v6002_v51  ;;  %v6258_v1 = vor.u32 %v8294_v0, %v6257_v62  ;;  %v5841_v2 = vld [vmem:[#allocation2 + $0x40] sm:$0xf]  ;;  %v8190_v3 = vld [vmem:[#allocation2 + $0x4c] sm:$0xf0] }
  0x30   :  { %v5969_v4 = vld [vmem:[#allocation2 + $0x140] sm:$0xf]  ;;  %v5842_v5 = vor.u32 %v8190_v3, %v5841_v2  ;;  %v8222_v6 = vld [vmem:[#allocation2 + $0x14c] sm:$0xf0] }
  0x31   :  { %v6113_v8 = vld [vmem:[#allocation2 + $0x260] sm:$0xf]  ;;  %v8258_v9 = vld [vmem:[#allocation2 + $0x26c] sm:$0xf0] }
  0x32   :  { %1291 = vmatpush.bf16.msrb.mxu2 %v6130_v63  ;;  %1320 = vmatpush.bf16.msrb.mxu3 %v6258_v1  ;;  %v6114_v10 = vor.u32 %v8258_v9, %v6113_v8  ;;  %v6241_v11 = vld [vmem:[#allocation2 + $0x360] sm:$0xf]  ;;  %v8290_v12 = vld [vmem:[#allocation2 + $0x36c] sm:$0xf0] }
  0x33   :  { %1234 = vmatpush.bf16.msrb.mxu0 %v5858_v57  ;;  %1263 = vmatpush.bf16.msrb.mxu1 %v5986_v59  ;;  %v6242_v13 = vor.u32 %v8290_v12, %v6241_v11  ;;  %v5825_v14 = vld [vmem:[#allocation2 + $0x20] sm:$0xf]  ;;  %v8186_v15 = vld [vmem:[#allocation2 + $0x2c] sm:$0xf0]  ;;  %v5923_v11 = vld [vmem:[#allocation2 + $0xf0] sm:$0xf0] }
  0x34   :  { %5778 = vmatmul.msk.f32.gmra.mxu0 %vm151_vm0, %v132_v7  ;;  %5786 = vmatmul.msk.f32.gmra.mxu1 %vm151_vm0, %v132_v7  ;;  %v5953_v16 = vld [vmem:[#allocation2 + $0x120] sm:$0xf]  ;;  %v5826_v17 = vor.u32 %v8186_v15, %v5825_v14  ;;  %v8218_v18 = vld [vmem:[#allocation2 + $0x12c] sm:$0xf0]  ;;  %v8240_v12 = vld [vmem:[#allocation2 + $0x1e4] sm:$0xf] }
  0x35   :  { %5794 = vmatmul.msk.f32.gmra.mxu2 %vm151_vm0, %v132_v7  ;;  %5802 = vmatmul.msk.f32.gmra.mxu3 %vm151_vm0, %v132_v7  ;;  %v5970_v7 = vor.u32 %v8222_v6, %v5969_v4  ;;  %v5954_v19 = vor.u32 %v8218_v18, %v5953_v16  ;;  %v6097_v20 = vld [vmem:[#allocation2 + $0x240] sm:$0xf]  ;;  %v8254_v21 = vld [vmem:[#allocation2 + $0x24c] sm:$0xf0] }
  0x36   :  { %1292 = vmatpush.bf16.msrb.mxu2 %v6114_v10  ;;  %1321 = vmatpush.bf16.msrb.mxu3 %v6242_v13  ;;  %v6098_v23 = vor.u32 %v8254_v21, %v6097_v20  ;;  %v8286_v24 = vld [vmem:[#allocation2 + $0x34c] sm:$0xf0]  ;;  %v5809_v26 = vld [vmem:[#allocation2] sm:$0xf]  ;;  %v8208_v10 = vld [vmem:[#allocation2 + $0xe4] sm:$0xf] }
  0x37   :  { %1235 = vmatpush.bf16.msrb.mxu0 %v5842_v5  ;;  %1264 = vmatpush.bf16.msrb.mxu1 %v5970_v7  ;;  %v8182_v27 = vld [vmem:[#allocation2 + $0xc] sm:$0xf0]  ;;  %v5937_v28 = vld [vmem:[#allocation2 + $0x100] sm:$0xf]  ;;  %v5926_v18 = vor.u32 %v8208_v10, %v5923_v11  ;;  %v6291_v10 = vld [vmem:[#allocation2 + $0x3d0] sm:$0xf0] }
  0x38   :  { %v5810_v29 = vor.u32 %v8182_v27, %v5809_v26  ;;  %v8214_v30 = vld [vmem:[#allocation2 + $0x10c] sm:$0xf0]  ;;  %v6081_v32 = vld [vmem:[#allocation2 + $0x220] sm:$0xf]  ;;  %v8196_v11 = vld [vmem:[#allocation2 + $0x84] sm:$0xf] }
  0x39   :  { %v5938_v31 = vor.u32 %v8214_v30, %v5937_v28  ;;  %v8250_v33 = vld [vmem:[#allocation2 + $0x22c] sm:$0xf0]  ;;  %v6209_v34 = vld [vmem:[#allocation2 + $0x320] sm:$0xf]  ;;  %v5907_v30 = vld [vmem:[#allocation2 + $0xd0] sm:$0xf0] }
  0x3a   :  { %1293 = vmatpush.bf16.msrb.mxu2 %v6098_v23  ;;  %v6082_v35 = vor.u32 %v8250_v33, %v6081_v32  ;;  %v8282_v36 = vld [vmem:[#allocation2 + $0x32c] sm:$0xf0]  ;;  %v6065_v38 = vld [vmem:[#allocation2 + $0x200] sm:$0xf] }
  0x3b   :  { %1236 = vmatpush.bf16.msrb.mxu0 %v5826_v17  ;;  %1265 = vmatpush.bf16.msrb.mxu1 %v5954_v19  ;;  %v6210_v37 = vor.u32 %v8282_v36, %v6209_v34  ;;  %v8246_v39 = vld [vmem:[#allocation2 + $0x20c] sm:$0xf0]  ;;  %v6193_v40 = vld [vmem:[#allocation2 + $0x300] sm:$0xf]  ;;  %v6051_v19 = vld [vmem:[#allocation2 + $0x1f0] sm:$0xf0] }
  0x3c   :  { %5779 = vmatmul.msk.f32.gmra.mxu0 %vm151_vm0, %v133_v22  ;;  %5787 = vmatmul.msk.f32.gmra.mxu1 %vm151_vm0, %v133_v22  ;;  %v6066_v41 = vor.u32 %v8246_v39, %v6065_v38  ;;  %v8278_v42 = vld [vmem:[#allocation2 + $0x30c] sm:$0xf0]  ;;  %v141_v44 = vld [vmem:[%s9847_s2] sm:$0xf]  ;;  %v6054_v21 = vor.u32 %v8240_v12, %v6051_v19  ;;  %v6035_v34 = vld [vmem:[#allocation2 + $0x1d0] sm:$0xf0] }
  0x3d   :  { %5795 = vmatmul.msk.f32.gmra.mxu2 %vm151_vm0, %v133_v22  ;;  %5803 = vmatmul.msk.f32.gmra.mxu3 %vm151_vm0, %v133_v22  ;;  %v6225_v22 = vld [vmem:[#allocation2 + $0x340] sm:$0xf]  ;;  %v6194_v43 = vor.u32 %v8278_v42, %v6193_v40  ;;  %v9148_v45 = vperm.slane %v141_v44, 1  ;;  %v9150_v48 = vperm.slane %v141_v44, 0  ;;  %v9156_v55 = vperm.slane %v141_v44, 3 }
  0x3e   :  { %v6226_v25 = vor.u32 %v8286_v24, %v6225_v22  ;;  %1294 = vmatpush.bf16.msrb.mxu2 %v6082_v35  ;;  %v8272_v35 = vld [vmem:[#allocation2 + $0x2e4] sm:$0xf]  ;;  %v6179_v36 = vld [vmem:[#allocation2 + $0x2f0] sm:$0xf0] }
  0x3f   :  { %1237 = vmatpush.bf16.msrb.mxu0 %v5810_v29  ;;  %1266 = vmatpush.bf16.msrb.mxu1 %v5938_v31  ;;  %v8204_v29 = vld [vmem:[#allocation2 + $0xc4] sm:$0xf]  ;;  %v6182_v40 = vor.u32 %v8272_v35, %v6179_v36  ;;  %v6307_v42 = vld [vmem:[#allocation2 + $0x3f0] sm:$0xf0] }
  0x40   :  { %1322 = vmatpush.bf16.msrb.mxu3 %v6226_v25  ;;  %v8236_v31 = vld [vmem:[#allocation2 + $0x1c4] sm:$0xf]  ;;  %v5910_v38 = vor.u32 %v8204_v29, %v5907_v30  ;;  %v5875_v12 = vld [vmem:[#allocation2 + $0x90] sm:$0xf0] }
  0x41   :  { %v6038_v39 = vor.u32 %v8236_v31, %v6035_v34  ;;  %v8264_v19 = vld [vmem:[#allocation2 + $0x2a4] sm:$0xf]  ;;  %v5859_v34 = vld [vmem:[#allocation2 + $0x70] sm:$0xf0] }
  0x42   :  { %1295 = vmatpush.bf16.msrb.mxu2 %v6066_v41  ;;  %v8304_v41 = vld [vmem:[#allocation2 + $0x3e4] sm:$0xf] }
  0x43   :  { %1346 = vmatpush.bf16.msra.mxu0 %v5926_v18  ;;  %1375 = vmatpush.bf16.msra.mxu1 %v6054_v21  ;;  %v6003_v18 = vld [vmem:[#allocation2 + $0x190] sm:$0xf0]  ;;  %v8192_v31 = vld [vmem:[#allocation2 + $0x64] sm:$0xf] }
  0x44   :  { %5780 = vmatmul.msk.f32.gmra.mxu0 %vm151_vm0, %v134_v49  ;;  %5788 = vmatmul.msk.f32.gmra.mxu1 %vm151_vm0, %v134_v49  ;;  %v8224_v35 = vld [vmem:[#allocation2 + $0x164] sm:$0xf] }
  0x45   :  { %5796 = vmatmul.msk.f32.gmra.mxu2 %vm151_vm0, %v134_v49  ;;  %5804 = vmatmul.msk.f32.gmra.mxu3 %vm151_vm0, %v134_v49 }
  0x46   :  { %1323 = vmatpush.bf16.msrb.mxu3 %v6210_v37  ;;  %1404 = vmatpush.bf16.msra.mxu2 %v6182_v40 }
  0x47   :  { %1347 = vmatpush.bf16.msra.mxu0 %v5910_v38  ;;  %1376 = vmatpush.bf16.msra.mxu1 %v6038_v39 }
  0x4a   :  { %1324 = vmatpush.bf16.msrb.mxu3 %v6194_v43 }
  0x4c   :  { %5781 = vmatmul.msk.f32.gmra.mxu0 %vm151_vm0, %v135_v52  ;;  %5789 = vmatmul.msk.f32.gmra.mxu1 %vm151_vm0, %v135_v52 }
  0x4d   :  { %5797 = vmatmul.msk.f32.gmra.mxu2 %vm151_vm0, %v135_v52  ;;  %5805 = vmatmul.msk.f32.gmra.mxu3 %vm151_vm0, %v135_v52  ;;  %v9154_v52 = vperm.slane %v141_v44, 2 }
  0x54   :  { %5782 = vmatmul.msk.f32.gmra.mxu0 %vm151_vm0, %v136_v53  ;;  %5790 = vmatmul.msk.f32.gmra.mxu1 %vm151_vm0, %v136_v53 }
  0x55   :  { %5798 = vmatmul.msk.f32.gmra.mxu2 %vm151_vm0, %v136_v53  ;;  %5806 = vmatmul.msk.f32.gmra.mxu3 %vm151_vm0, %v136_v53 }
  0x99   :  { %v193_v46 = vpop.f32.mrf.mxu0  ;;  %v234_v47 = vpop.f32.mrf.mxu1 }
  0x9a   :  { %v235_v49 = vadd.f32 %v234_v47, %v9148_v45  ;;  %v194_v50 = vadd.f32 %v193_v46, %v9150_v48  ;;  %v6310_v46 = vor.u32 %v8304_v41, %v6307_v42  ;;  %v8200_v47 = vld [vmem:[#allocation2 + $0xa4] sm:$0xf]  ;;  %v5862_v41 = vor.u32 %v8192_v31, %v5859_v34  ;;  %v5987_v42 = vld [vmem:[#allocation2 + $0x170] sm:$0xf0] }
  0x9b   :  { %v8284_v31 = vld [vmem:[#allocation2 + $0x344] sm:$0xf]  ;;  %v6227_v34 = vld [vmem:[#allocation2 + $0x350] sm:$0xf0] }
  0x9c   :  { %v373_v51 = vmul.f32 0.2, %v235_v49  ;;  %vm341_vm1 = vcmp.gt.f32.partialorder %v235_v49, 0.0  ;;  %v372_v58 = vmul.f32 0.2, %v194_v50  ;;  %vm340_vm2 = vcmp.gt.f32.partialorder %v194_v50, 0.0  ;;  %1433 = vmatpush.bf16.msra.mxu3 %v6310_v46 }
  0x9d   :  { %v5990_v46 = vor.u32 %v8224_v35, %v5987_v42 }
  0x9e   :  { %v405_v61 = vsel %vm341_vm1, %v235_v49, %v373_v51  ;;  %v404_v2 = vsel %vm340_vm2, %v194_v50, %v372_v58  ;;  %v5891_v49 = vld [vmem:[#allocation2 + $0xb0] sm:$0xf0]  ;;  %v8232_v50 = vld [vmem:[#allocation2 + $0x1a4] sm:$0xf] }
  0x9f   :  { %v5894_v58 = vor.u32 %v8200_v47, %v5891_v49  ;;  %v8260_v47 = vld [vmem:[#allocation2 + $0x284] sm:$0xf]  ;;  %v6131_v49 = vld [vmem:[#allocation2 + $0x290] sm:$0xf0] }
  0xa0   :  { %v275_v53 = vpop.f32.mrf.mxu2  ;;  %v316_v54 = vpop.f32.mrf.mxu3 }
  0xa1   :  { %v196_v56 = vpop.f32.mrf.mxu0  ;;  %v237_v57 = vpop.f32.mrf.mxu1  ;;  %v276_v62 = vadd.f32 %v275_v53, %v9154_v52  ;;  %v317_v1 = vadd.f32 %v316_v54, %v9156_v55  ;;  %1348 = vmatpush.bf16.msra.mxu0 %v5894_v58 }
  0xa2   :  { %v197_v59 = vadd.f32 %v196_v56, %v9150_v48  ;;  %v238_v60 = vadd.f32 %v237_v57, %v9148_v45 }
  0xa3   :  { %vm342_vm5 = vcmp.gt.f32.partialorder %v276_v62, 0.0  ;;  %v374_v5 = vmul.f32 0.2, %v276_v62  ;;  %v375_v13 = vmul.f32 0.2, %v317_v1  ;;  %vm343_vm6 = vcmp.gt.f32.partialorder %v317_v1, 0.0 }
  0xa4   :  { %vm344_vm3 = vcmp.gt.f32.partialorder %v197_v59, 0.0  ;;  %v376_v63 = vmul.f32 0.2, %v197_v59  ;;  %vm345_vm4 = vcmp.gt.f32.partialorder %v238_v60, 0.0  ;;  %v377_v0 = vmul.f32 0.2, %v238_v60 }
  0xa5   :  { %v406_v24 = vsel %vm342_vm5, %v276_v62, %v374_v5  ;;  %v407_v25 = vsel %vm343_vm6, %v317_v1, %v375_v13 }
  0xa6   :  { %v408_v3 = vsel %vm344_vm3, %v197_v59, %v376_v63  ;;  %v409_v4 = vsel %vm345_vm4, %v238_v60, %v377_v0  ;;  %v6019_v59 = vld [vmem:[#allocation2 + $0x1b0] sm:$0xf0]  ;;  %v8268_v63 = vld [vmem:[#allocation2 + $0x2c4] sm:$0xf] }
  0xa7   :  { %v9162_v6 = vpack.c.bf16 %v408_v3, %v404_v2  ;;  %v9164_v7 = vpack.c.bf16 %v409_v4, %v405_v61  ;;  %v6022_v62 = vor.u32 %v8232_v50, %v6019_v59  ;;  %v6163_v0 = vld [vmem:[#allocation2 + $0x2d0] sm:$0xf0]  ;;  %v8300_v3 = vld [vmem:[#allocation2 + $0x3c4] sm:$0xf] }
  0xa8   :  { %v278_v8 = vpop.f32.mrf.mxu2  ;;  %v319_v9 = vpop.f32.mrf.mxu3  ;;  %v8292_v50 = vld [vmem:[#allocation2 + $0x384] sm:$0xf] }
  0xa9   :  { %v279_v14 = vadd.f32 %v278_v8, %v9154_v52  ;;  %v320_v15 = vadd.f32 %v319_v9, %v9156_v55  ;;  %v199_v16 = vpop.f32.mrf.mxu0  ;;  %v240_v17 = vpop.f32.mrf.mxu1  ;;  %1238 = vmatmul.bf16.vlgmr.msrb.gmra.mxu0 %v9162_v6  ;;  %1267 = vmatmul.bf16.vlgmr.msrb.gmra.mxu1 %v9164_v7  ;;  %v6166_v9 = vor.u32 %v8268_v63, %v6163_v0  ;;  %v8188_v63 = vld [vmem:[#allocation2 + $0x44] sm:$0xf]  ;;  %v5843_v0 = vld [vmem:[#allocation2 + $0x50] sm:$0xf0] }
  0xaa   :  { %v241_v20 = vadd.f32 %v240_v17, %v9148_v45  ;;  %v200_v28 = vadd.f32 %v199_v16, %v9150_v48  ;;  %1377 = vmatpush.bf16.msra.mxu1 %v6022_v62  ;;  %v5878_v16 = vor.u32 %v8196_v11, %v5875_v12  ;;  %v8228_v17 = vld [vmem:[#allocation2 + $0x184] sm:$0xf]  ;;  %v6259_v62 = vld [vmem:[#allocation2 + $0x390] sm:$0xf0] }
  0xab   :  { %vm346_vm7 = vcmp.gt.f32.partialorder %v279_v14, 0.0  ;;  %v378_v22 = vmul.f32 0.2, %v279_v14  ;;  %vm347_vm8 = vcmp.gt.f32.partialorder %v320_v15, 0.0  ;;  %v379_v23 = vmul.f32 0.2, %v320_v15  ;;  %1405 = vmatpush.bf16.msra.mxu2 %v6166_v9 }
  0xac   :  { %vm349_vm9 = vcmp.gt.f32.partialorder %v241_v20, 0.0  ;;  %v381_v37 = vmul.f32 0.2, %v241_v20  ;;  %v380_v51 = vmul.f32 0.2, %v200_v28  ;;  %vm348_vm10 = vcmp.gt.f32.partialorder %v200_v28, 0.0  ;;  %1349 = vmatpush.bf16.msra.mxu0 %v5878_v16 }
  0xad   :  { %v410_v26 = vsel %vm346_vm7, %v279_v14, %v378_v22  ;;  %v411_v27 = vsel %vm347_vm8, %v320_v15, %v379_v23  ;;  %v6294_v15 = vor.u32 %v8300_v3, %v6291_v10  ;;  %v6006_v22 = vor.u32 %v8228_v17, %v6003_v18  ;;  %v6147_v23 = vld [vmem:[#allocation2 + $0x2b0] sm:$0xf0]  ;;  %v8220_v3 = vld [vmem:[#allocation2 + $0x144] sm:$0xf] }
  0xae   :  { %v9173_v32 = vpack.c.bf16 %v410_v26, %v406_v24  ;;  %v9175_v33 = vpack.c.bf16 %v411_v27, %v407_v25  ;;  %v413_v1 = vsel %vm349_vm9, %v241_v20, %v381_v37  ;;  %v412_v8 = vsel %vm348_vm10, %v200_v28, %v380_v51  ;;  %v8296_v24 = vld [vmem:[#allocation2 + $0x3a4] sm:$0xf]  ;;  %v6275_v25 = vld [vmem:[#allocation2 + $0x3b0] sm:$0xf0] }
  0xaf   :  { %1434 = vmatpush.bf16.msra.mxu3 %v6294_v15  ;;  %v6150_v29 = vor.u32 %v8264_v19, %v6147_v23  ;;  %v6278_v30 = vor.u32 %v8296_v24, %v6275_v25  ;;  %1378 = vmatpush.bf16.msra.mxu1 %v6006_v22  ;;  %v5846_v9 = vor.u32 %v8188_v63, %v5843_v0  ;;  %v8288_v11 = vld [vmem:[#allocation2 + $0x364] sm:$0xf]  ;;  %v6243_v12 = vld [vmem:[#allocation2 + $0x370] sm:$0xf0] }
  0xb0   :  { %v281_v43 = vpop.f32.mrf.mxu2  ;;  %v322_v44 = vpop.f32.mrf.mxu3  ;;  %1296 = vmatmul.bf16.vlgmr.msrb.gmra.mxu2 %v9173_v32  ;;  %1325 = vmatmul.bf16.vlgmr.msrb.gmra.mxu3 %v9175_v33  ;;  %v8184_v16 = vld [vmem:[#allocation2 + $0x24] sm:$0xf]  ;;  %v5827_v17 = vld [vmem:[#allocation2 + $0x30] sm:$0xf0]  ;;  %v6246_v23 = vor.u32 %v8288_v11, %v6243_v12 }
  0xb1   :  { %v282_v53 = vadd.f32 %v281_v43, %v9154_v52  ;;  %v9181_v54 = vadd.f32 %v322_v44, %v9156_v55  ;;  %v202_v56 = vpop.f32.mrf.mxu0  ;;  %v243_v57 = vpop.f32.mrf.mxu1  ;;  %1406 = vmatpush.bf16.msra.mxu2 %v6150_v29  ;;  %1350 = vmatpush.bf16.msra.mxu0 %v5862_v41  ;;  %v8216_v18 = vld [vmem:[#allocation2 + $0x124] sm:$0xf]  ;;  %v5955_v24 = vld [vmem:[#allocation2 + $0x130] sm:$0xf0] }
  0xb2   :  { %v203_v60 = vadd.f32 %v202_v56, %v9150_v48  ;;  %v244_v61 = vadd.f32 %v243_v57, %v9148_v45  ;;  %v8252_v25 = vld [vmem:[#allocation2 + $0x244] sm:$0xf]  ;;  %v6067_v11 = vld [vmem:[#allocation2 + $0x210] sm:$0xf0] }
  0xb3   :  { %vm350_vm11 = vcmp.gt.f32.partialorder %v282_v53, 0.0  ;;  %v382_v2 = vmul.f32 0.2, %v282_v53  ;;  %vm351_vm12 = vcmp.gt.f32.partialorder %v9181_v54, 0.0  ;;  %v383_v36 = vmul.f32 0.2, %v9181_v54  ;;  %1435 = vmatpush.bf16.msra.mxu3 %v6278_v30  ;;  %1379 = vmatpush.bf16.msra.mxu1 %v5990_v46 }
  0xb4   :  { %vm352_vm13 = vcmp.gt.f32.partialorder %v203_v60, 0.0  ;;  %v384_v4 = vmul.f32 0.2, %v203_v60  ;;  %vm353_vm14 = vcmp.gt.f32.partialorder %v244_v61, 0.0  ;;  %v385_v5 = vmul.f32 0.2, %v244_v61 }
  0xb5   :  { %v414_v26 = vsel %vm350_vm11, %v282_v53, %v382_v2  ;;  %v415_v58 = vsel %vm351_vm12, %v9181_v54, %v383_v36  ;;  %v6115_v54 = vld [vmem:[#allocation2 + $0x270] sm:$0xf0]  ;;  %1351 = vmatpush.bf16.msra.mxu0 %v5846_v9  ;;  %v5830_v30 = vor.u32 %v8184_v16, %v5827_v17  ;;  %v5958_v36 = vor.u32 %v8216_v18, %v5955_v24 }
  0xb6   :  { %v416_v13 = vsel %vm352_vm13, %v203_v60, %v384_v4  ;;  %v417_v14 = vsel %vm353_vm14, %v244_v61, %v385_v5  ;;  %v6134_v61 = vor.u32 %v8260_v47, %v6131_v49  ;;  %v5971_v4 = vld [vmem:[#allocation2 + $0x150] sm:$0xf0]  ;;  %v8256_v5 = vld [vmem:[#allocation2 + $0x264] sm:$0xf] }
  0xb7   :  { %v9188_v20 = vpack.c.bf16 %v416_v13, %v412_v8  ;;  %v9190_v21 = vpack.c.bf16 %v417_v14, %v413_v1  ;;  %v6262_v8 = vor.u32 %v8292_v50, %v6259_v62  ;;  %v5974_v10 = vor.u32 %v8220_v3, %v5971_v4  ;;  %v5811_v46 = vld [vmem:[#allocation2 + $0x10] sm:$0xf0]  ;;  %v8212_v47 = vld [vmem:[#allocation2 + $0x104] sm:$0xf] }
  0xb8   :  { %v284_v27 = vpop.f32.mrf.mxu2  ;;  %v325_v28 = vpop.f32.mrf.mxu3  ;;  %1407 = vmatpush.bf16.msra.mxu2 %v6134_v61  ;;  %v6118_v15 = vor.u32 %v8256_v5, %v6115_v54  ;;  %v5939_v49 = vld [vmem:[#allocation2 + $0x110] sm:$0xf0]  ;;  %v8244_v54 = vld [vmem:[#allocation2 + $0x204] sm:$0xf] }
  0xb9   :  { %v285_v37 = vadd.f32 %v284_v27, %v9154_v52  ;;  %v326_v38 = vadd.f32 %v325_v28, %v9156_v55  ;;  %v205_v39 = vpop.f32.mrf.mxu0  ;;  %v246_v40 = vpop.f32.mrf.mxu1  ;;  %1243 = vmatmul.bf16.gmra.mxu0 %v9188_v20  ;;  %1272 = vmatmul.bf16.gmra.mxu1 %v9190_v21  ;;  %v6211_v62 = vld [vmem:[#allocation2 + $0x330] sm:$0xf0] }
  0xba   :  { %v9199_v43 = vadd.f32 %v205_v39, %v9150_v48  ;;  %v247_v44 = vadd.f32 %v246_v40, %v9148_v45  ;;  %1436 = vmatpush.bf16.msra.mxu3 %v6262_v8  ;;  %1380 = vmatpush.bf16.msra.mxu1 %v5974_v10  ;;  %v6195_v16 = vld [vmem:[#allocation2 + $0x310] sm:$0xf0] }
  0xbb   :  { %vm354_vm15 = vcmp.gt.f32.partialorder %v285_v37, 0.0  ;;  %v386_v51 = vmul.f32 0.2, %v285_v37  ;;  %vm355_vm0 = vcmp.gt.f32.partialorder %v326_v38, 0.0  ;;  %v387_v53 = vmul.f32 0.2, %v326_v38  ;;  %1352 = vmatpush.bf16.msra.mxu0 %v5830_v30 }
  0xbc   :  { %vm356_vm1 = vcmp.gt.f32.partialorder %v9199_v43, 0.0  ;;  %v388_v56 = vmul.f32 0.2, %v9199_v43  ;;  %vm357_vm2 = vcmp.gt.f32.partialorder %v247_v44, 0.0  ;;  %v389_v57 = vmul.f32 0.2, %v247_v44  ;;  %1408 = vmatpush.bf16.msra.mxu2 %v6118_v15 }
  0xbd   :  { %v418_v59 = vsel %vm354_vm15, %v285_v37, %v386_v51  ;;  %v419_v60 = vsel %vm355_vm0, %v326_v38, %v387_v53  ;;  %v8180_v38 = vld [vmem:[#allocation2 + $0x4] sm:$0xf] }
  0xbe   :  { %v9207_v1 = vpack.c.bf16 %v418_v59, %v414_v26  ;;  %v9209_v2 = vpack.c.bf16 %v419_v60, %v415_v58  ;;  %v6099_v26 = vld [vmem:[#allocation2 + $0x250] sm:$0xf0]  ;;  %v421_v27 = vsel %vm357_vm2, %v247_v44, %v389_v57  ;;  %v420_v41 = vsel %vm356_vm1, %v9199_v43, %v388_v56  ;;  %1437 = vmatpush.bf16.msra.mxu3 %v6246_v23  ;;  %v8248_v58 = vld [vmem:[#allocation2 + $0x224] sm:$0xf] }
  0xbf   :  { %v6102_v37 = vor.u32 %v8252_v25, %v6099_v26  ;;  %v6230_v44 = vor.u32 %v8284_v31, %v6227_v34  ;;  %v5814_v53 = vor.u32 %v8180_v38, %v5811_v46  ;;  %v5942_v57 = vor.u32 %v8212_v47, %v5939_v49  ;;  %v6083_v59 = vld [vmem:[#allocation2 + $0x230] sm:$0xf0]  ;;  %1381 = vmatpush.bf16.msra.mxu1 %v5958_v36  ;;  %v8280_v56 = vld [vmem:[#allocation2 + $0x324] sm:$0xf] }
  0xc0   :  { %v287_v13 = vpop.f32.mrf.mxu2  ;;  %v328_v14 = vpop.f32.mrf.mxu3  ;;  %1301 = vmatmul.bf16.gmra.mxu2 %v9207_v1  ;;  %1330 = vmatmul.bf16.gmra.mxu3 %v9209_v2  ;;  %v6086_v43 = vor.u32 %v8248_v58, %v6083_v59  ;;  %v8276_v15 = vld [vmem:[#allocation2 + $0x304] sm:$0xf] }
  0xc1   :  { %v208_v19 = vpop.f32.mrf.mxu0  ;;  %v249_v22 = vpop.f32.mrf.mxu1  ;;  %v288_v35 = vadd.f32 %v287_v13, %v9154_v52  ;;  %v329_v42 = vadd.f32 %v328_v14, %v9156_v55  ;;  %1409 = vmatpush.bf16.msra.mxu2 %v6102_v37  ;;  %1353 = vmatpush.bf16.msra.mxu0 %v5814_v53  ;;  %v6214_v13 = vor.u32 %v8280_v56, %v6211_v62 }
  0xc2   :  { %v209_v28 = vadd.f32 %v208_v19, %v9150_v48  ;;  %v250_v29 = vadd.f32 %v249_v22, %v9148_v45  ;;  %1438 = vmatpush.bf16.msra.mxu3 %v6230_v44  ;;  %v6070_v14 = vor.u32 %v8244_v54, %v6067_v11  ;;  %v5913_v54 = vld [vmem:[#allocation2 + $0xc8] sm:$0xf]  ;;  %v8207_v11 = vld [vmem:[#allocation2 + $0xd4] sm:$0xf0] }
  0xc3   :  { %vm358_vm5 = vcmp.gt.f32.partialorder %v288_v35, 0.0  ;;  %v390_v63 = vmul.f32 0.2, %v288_v35  ;;  %v391_v4 = vmul.f32 0.2, %v329_v42  ;;  %vm359_vm6 = vcmp.gt.f32.partialorder %v329_v42, 0.0  ;;  %1382 = vmatpush.bf16.msra.mxu1 %v5942_v57 }
  0xc4   :  { %vm360_vm3 = vcmp.gt.f32.partialorder %v209_v28, 0.0  ;;  %v392_v39 = vmul.f32 0.2, %v209_v28  ;;  %vm361_vm4 = vcmp.gt.f32.partialorder %v250_v29, 0.0  ;;  %v393_v40 = vmul.f32 0.2, %v250_v29 }
  0xc5   :  { %1410 = vmatpush.bf16.msra.mxu2 %v6086_v43  ;;  %v422_v19 = vsel %vm358_vm5, %v288_v35, %v390_v63  ;;  %v423_v22 = vsel %vm359_vm6, %v329_v42, %v391_v4 }
  0xc6   :  { %v424_v50 = vsel %vm360_vm3, %v209_v28, %v392_v39  ;;  %v425_v51 = vsel %vm361_vm4, %v250_v29, %v393_v40  ;;  %1439 = vmatpush.bf16.msra.mxu3 %v6214_v13  ;;  %v6198_v28 = vor.u32 %v8276_v15, %v6195_v16  ;;  %v6041_v13 = vld [vmem:[#allocation2 + $0x1c8] sm:$0xf]  ;;  %v5914_v15 = vor.u32 %v8207_v11, %v5913_v54 }
  0xc7   :  { %v9221_v60 = vpack.c.bf16 %v424_v50, %v420_v41  ;;  %v9223_v61 = vpack.c.bf16 %v425_v51, %v421_v27  ;;  %v5849_v54 = vld [vmem:[#allocation2 + $0x48] sm:$0xf] }
  0xc8   :  { %v290_v0 = vpop.f32.mrf.mxu2  ;;  %v331_v3 = vpop.f32.mrf.mxu3 }
  0xc9   :  { %v291_v5 = vadd.f32 %v290_v0, %v9154_v52  ;;  %v332_v8 = vadd.f32 %v331_v3, %v9156_v55  ;;  %v211_v9 = vpop.f32.mrf.mxu0  ;;  %v252_v10 = vpop.f32.mrf.mxu1  ;;  %1248 = vmatmul.bf16.gmra.mxu0 %v9221_v60  ;;  %1277 = vmatmul.bf16.gmra.mxu1 %v9223_v61 }
  0xca   :  { %v253_v12 = vadd.f32 %v252_v10, %v9148_v45  ;;  %v212_v27 = vadd.f32 %v211_v9, %v9150_v48  ;;  %1411 = vmatpush.bf16.msra.mxu2 %v6070_v14  ;;  %1440 = vmatpush.bf16.msra.mxu3 %v6198_v28  ;;  %v8243_v10 = vld [vmem:[#allocation2 + $0x1f4] sm:$0xf0] }
  0xcb   :  { %vm362_vm7 = vcmp.gt.f32.partialorder %v291_v5, 0.0  ;;  %v394_v17 = vmul.f32 0.2, %v291_v5  ;;  %vm363_vm8 = vcmp.gt.f32.partialorder %v332_v8, 0.0  ;;  %v395_v18 = vmul.f32 0.2, %v332_v8 }
  0xcc   :  { %v397_v29 = vmul.f32 0.2, %v253_v12  ;;  %vm365_vm9 = vcmp.gt.f32.partialorder %v253_v12, 0.0  ;;  %v396_v36 = vmul.f32 0.2, %v212_v27  ;;  %vm364_vm10 = vcmp.gt.f32.partialorder %v212_v27, 0.0 }
  0xcd   :  { %v426_v23 = vsel %vm362_vm7, %v291_v5, %v394_v17  ;;  %v427_v24 = vsel %vm363_vm8, %v332_v8, %v395_v18  ;;  %v6057_v8 = vld [vmem:[#allocation2 + $0x1e8] sm:$0xf]  ;;  %v8239_v14 = vld [vmem:[#allocation2 + $0x1d4] sm:$0xf0] }
  0xce   :  { %v9231_v25 = vpack.c.bf16 %v426_v23, %v422_v19  ;;  %v9233_v26 = vpack.c.bf16 %v427_v24, %v423_v22  ;;  %v429_v39 = vsel %vm365_vm9, %v253_v12, %v397_v29  ;;  %v428_v46 = vsel %vm364_vm10, %v212_v27, %v396_v36  ;;  %v6185_v17 = vld [vmem:[#allocation2 + $0x2e8] sm:$0xf]  ;;  %v8275_v18 = vld [vmem:[#allocation2 + $0x2f4] sm:$0xf0] }
  0xcf   :  { %v6058_v12 = vor.u32 %v8243_v10, %v6057_v8  ;;  %v6042_v16 = vor.u32 %v8239_v14, %v6041_v13  ;;  %v6313_v19 = vld [vmem:[#allocation2 + $0x3e8] sm:$0xf]  ;;  %v6186_v22 = vor.u32 %v8275_v18, %v6185_v17  ;;  %v8307_v23 = vld [vmem:[#allocation2 + $0x3f4] sm:$0xf0] }
  0xd0   :  { %v293_v30 = vpop.f32.mrf.mxu2  ;;  %v334_v31 = vpop.f32.mrf.mxu3  ;;  %1306 = vmatmul.bf16.gmra.mxu2 %v9231_v25  ;;  %1335 = vmatmul.bf16.gmra.mxu3 %v9233_v26  ;;  %v6314_v24 = vor.u32 %v8307_v23, %v6313_v19  ;;  %v5897_v27 = vld [vmem:[#allocation2 + $0xa8] sm:$0xf]  ;;  %v8203_v28 = vld [vmem:[#allocation2 + $0xb4] sm:$0xf0] }
  0xd1   :  { %v214_v34 = vpop.f32.mrf.mxu0  ;;  %v255_v35 = vpop.f32.mrf.mxu1  ;;  %v294_v42 = vadd.f32 %v293_v30, %v9154_v52  ;;  %v335_v44 = vadd.f32 %v334_v31, %v9156_v55  ;;  %1491 = vmatpush.bf16.msrb.mxu1 %v6058_v12  ;;  %v6025_v29 = vld [vmem:[#allocation2 + $0x1a8] sm:$0xf]  ;;  %1520 = vmatpush.bf16.msrb.mxu2 %v6186_v22  ;;  %v5898_v30 = vor.u32 %v8203_v28, %v5897_v27  ;;  %v8235_v31 = vld [vmem:[#allocation2 + $0x1b4] sm:$0xf0] }
  0xd2   :  { %v215_v37 = vadd.f32 %v214_v34, %v9150_v48  ;;  %v256_v38 = vadd.f32 %v255_v35, %v9148_v45  ;;  %v6169_v34 = vld [vmem:[#allocation2 + $0x2c8] sm:$0xf]  ;;  %v8271_v35 = vld [vmem:[#allocation2 + $0x2d4] sm:$0xf0]  ;;  %1549 = vmatpush.bf16.msrb.mxu3 %v6314_v24  ;;  %v6026_v36 = vor.u32 %v8235_v31, %v6025_v29 }
  0xd3   :  { %v398_v53 = vmul.f32 0.2, %v294_v42  ;;  %v399_v57 = vmul.f32 0.2, %v335_v44  ;;  %vm366_vm13 = vcmp.gt.f32.partialorder %v294_v42, 0.0  ;;  %vm367_vm14 = vcmp.gt.f32.partialorder %v335_v44, 0.0 }
  0xd4   :  { %vm368_vm11 = vcmp.gt.f32.partialorder %v215_v37, 0.0  ;;  %v400_v40 = vmul.f32 0.2, %v215_v37  ;;  %vm369_vm12 = vcmp.gt.f32.partialorder %v256_v38, 0.0  ;;  %v401_v41 = vmul.f32 0.2, %v256_v38 }
  0xd5   :  { %v430_v62 = vsel %vm366_vm13, %v294_v42, %v398_v53  ;;  %v431_v63 = vsel %vm367_vm14, %v335_v44, %v399_v57  ;;  %1492 = vmatpush.bf16.msrb.mxu1 %v6042_v16  ;;  %v8199_v42 = vld [vmem:[#allocation2 + $0x94] sm:$0xf0]  ;;  %v6009_v44 = vld [vmem:[#allocation2 + $0x188] sm:$0xf] }
  0xd6   :  { %v432_v47 = vsel %vm368_vm11, %v215_v37, %v400_v40  ;;  %v433_v49 = vsel %vm369_vm12, %v256_v38, %v401_v41  ;;  %v6170_v37 = vor.u32 %v8271_v35, %v6169_v34  ;;  %v6297_v38 = vld [vmem:[#allocation2 + $0x3c8] sm:$0xf]  ;;  %v8299_v53 = vld [vmem:[#allocation2 + $0x3b4] sm:$0xf0] }
  0xd7   :  { %v9242_v50 = vpack.c.bf16 %v432_v47, %v428_v46  ;;  %v9244_v51 = vpack.c.bf16 %v433_v49, %v429_v39  ;;  %v8303_v39 = vld [vmem:[#allocation2 + $0x3d4] sm:$0xf0]  ;;  %v5881_v40 = vld [vmem:[#allocation2 + $0x88] sm:$0xf] }
  0xd8   :  { %v296_v48 = vpop.f32.mrf.mxu2  ;;  %v337_v45 = vpop.f32.mrf.mxu3  ;;  %v6298_v41 = vor.u32 %v8303_v39, %v6297_v38  ;;  %v8231_v46 = vld [vmem:[#allocation2 + $0x194] sm:$0xf0]  ;;  %v5882_v47 = vor.u32 %v8199_v42, %v5881_v40  ;;  %v6153_v49 = vld [vmem:[#allocation2 + $0x2a8] sm:$0xf]  ;;  %1521 = vmatpush.bf16.msrb.mxu2 %v6170_v37 }
  0xd9   :  { %v297_v58 = vadd.f32 %v296_v48, %v9154_v52  ;;  %v338_v59 = vadd.f32 %v337_v45, %v9156_v55  ;;  %1253 = vmatmul.bf16.gmra.mxu0 %v9242_v50  ;;  %1282 = vmatmul.bf16.gmra.mxu1 %v9244_v51  ;;  %v5929_v52 = vld [vmem:[#allocation2 + $0xe8] sm:$0xf]  ;;  %v8211_v55 = vld [vmem:[#allocation2 + $0xf4] sm:$0xf0]  ;;  %v6010_v57 = vor.u32 %v8231_v46, %v6009_v44 }
  0xda   :  { %v5930_v9 = vor.u32 %v8211_v55, %v5929_v52  ;;  %v8267_v48 = vld [vmem:[#allocation2 + $0x2b4] sm:$0xf0]  ;;  %v6281_v45 = vld [vmem:[#allocation2 + $0x3a8] sm:$0xf]  ;;  %1493 = vmatpush.bf16.msrb.mxu1 %v6026_v36  ;;  %1550 = vmatpush.bf16.msrb.mxu3 %v6298_v41 }
  0xdb   :  { %vm370_vm15 = vcmp.gt.f32.partialorder %v297_v58, 0.0  ;;  %v402_v43 = vmul.f32 0.2, %v297_v58  ;;  %vm371_vm0 = vcmp.gt.f32.partialorder %v338_v59, 0.0  ;;  %v403_v56 = vmul.f32 0.2, %v338_v59 }
  0xdc   :  { %1462 = vmatpush.bf16.msrb.mxu0 %v5930_v9  ;;  %v8263_v52 = vld [vmem:[#allocation2 + $0x294] sm:$0xf0]  ;;  %v6265_v9 = vld [vmem:[#allocation2 + $0x388] sm:$0xf] }
  0xdd   :  { %v434_v0 = vsel %vm370_vm15, %v297_v58, %v402_v43  ;;  %v435_v3 = vsel %vm371_vm0, %v338_v59, %v403_v56  ;;  %v6154_v58 = vor.u32 %v8267_v48, %v6153_v49  ;;  %v6282_v59 = vor.u32 %v8299_v53, %v6281_v45  ;;  %v5865_v43 = vld [vmem:[#allocation2 + $0x68] sm:$0xf]  ;;  %v8195_v56 = vld [vmem:[#allocation2 + $0x74] sm:$0xf0] }
  0xde   :  { %v9250_v4 = vpack.c.bf16 %v434_v0, %v430_v62  ;;  %v9252_v5 = vpack.c.bf16 %v435_v3, %v431_v63  ;;  %v5993_v62 = vld [vmem:[#allocation2 + $0x168] sm:$0xf]  ;;  %v5866_v63 = vor.u32 %v8195_v56, %v5865_v43  ;;  %v8227_v0 = vld [vmem:[#allocation2 + $0x174] sm:$0xf0]  ;;  %1494 = vmatpush.bf16.msrb.mxu1 %v6010_v57 }
  0xdf   :  { %v6137_v3 = vld [vmem:[#allocation2 + $0x288] sm:$0xf]  ;;  %1522 = vmatpush.bf16.msrb.mxu2 %v6154_v58  ;;  %v5994_v55 = vor.u32 %v8227_v0, %v5993_v62  ;;  %v8295_v10 = vld [vmem:[#allocation2 + $0x394] sm:$0xf0]  ;;  %1551 = vmatpush.bf16.msrb.mxu3 %v6282_v59 }
  0xe0   :  { %1311 = vmatmul.bf16.gmra.mxu2 %v9250_v4  ;;  %1340 = vmatmul.bf16.gmra.mxu3 %v9252_v5  ;;  %v6138_v8 = vor.u32 %v8263_v52, %v6137_v3  ;;  %v6266_v11 = vor.u32 %v8295_v10, %v6265_v9  ;;  %v8191_v12 = vld [vmem:[#allocation2 + $0x54] sm:$0xf0]  ;;  %v5977_v13 = vld [vmem:[#allocation2 + $0x148] sm:$0xf]  ;;  %v9275_v52 = vld [vmem:[%s9849_s4] sm:$0xf] }
  0xe1   :  { %1463 = vmatpush.bf16.msrb.mxu0 %v5914_v15  ;;  %v8223_v14 = vld [vmem:[#allocation2 + $0x154] sm:$0xf0]  ;;  %v5850_v15 = vor.u32 %v8191_v12, %v5849_v54  ;;  %v6121_v17 = vld [vmem:[#allocation2 + $0x268] sm:$0xf]  ;;  %v8209_v54 = vld [vmem:[#allocation2 + $0xec] sm:$0xf] }
  0xe2   :  { %1495 = vmatpush.bf16.msrb.mxu1 %v5994_v55  ;;  %v5978_v16 = vor.u32 %v8223_v14, %v5977_v13  ;;  %v8259_v18 = vld [vmem:[#allocation2 + $0x274] sm:$0xf0]  ;;  %v6249_v19 = vld [vmem:[#allocation2 + $0x368] sm:$0xf]  ;;  %v9278_v55 = vperm.slane %v9275_v52, 0 }
  0xe3   :  { %1523 = vmatpush.bf16.msrb.mxu2 %v6138_v8  ;;  %1552 = vmatpush.bf16.msrb.mxu3 %v6266_v11  ;;  %v6122_v22 = vor.u32 %v8259_v18, %v6121_v17  ;;  %v8291_v23 = vld [vmem:[#allocation2 + $0x374] sm:$0xf0]  ;;  %v5833_v27 = vld [vmem:[#allocation2 + $0x28] sm:$0xf]  ;;  %v5931_v11 = vld [vmem:[#allocation2 + $0xf8] sm:$0xf0] }
  0xe4   :  { %v6250_v24 = vor.u32 %v8291_v23, %v6249_v19  ;;  %v8187_v28 = vld [vmem:[#allocation2 + $0x34] sm:$0xf0]  ;;  %v5961_v29 = vld [vmem:[#allocation2 + $0x128] sm:$0xf]  ;;  %v8241_v12 = vld [vmem:[#allocation2 + $0x1ec] sm:$0xf]  ;;  %v5934_v14 = vor.u32 %v8209_v54, %v5931_v11 }
  0xe5   :  { %1464 = vmatpush.bf16.msrb.mxu0 %v5898_v30  ;;  %v5834_v30 = vor.u32 %v8187_v28, %v5833_v27  ;;  %v8219_v31 = vld [vmem:[#allocation2 + $0x134] sm:$0xf0]  ;;  %v6105_v34 = vld [vmem:[#allocation2 + $0x248] sm:$0xf]  ;;  %v8205_v17 = vld [vmem:[#allocation2 + $0xcc] sm:$0xf] }
  0xe6   :  { %v8255_v35 = vld [vmem:[#allocation2 + $0x254] sm:$0xf0]  ;;  %1496 = vmatpush.bf16.msrb.mxu1 %v5978_v16  ;;  %v5962_v36 = vor.u32 %v8219_v31, %v5961_v29  ;;  %v6233_v38 = vld [vmem:[#allocation2 + $0x348] sm:$0xf]  ;;  %v5915_v18 = vld [vmem:[#allocation2 + $0xd8] sm:$0xf0] }
  0xe7   :  { %1524 = vmatpush.bf16.msrb.mxu2 %v6122_v22  ;;  %v6106_v37 = vor.u32 %v8255_v35, %v6105_v34  ;;  %v8287_v39 = vld [vmem:[#allocation2 + $0x354] sm:$0xf0]  ;;  %1553 = vmatpush.bf16.msrb.mxu3 %v6250_v24  ;;  %v5817_v41 = vld [vmem:[#allocation2 + $0x8] sm:$0xf]  ;;  %v8237_v19 = vld [vmem:[#allocation2 + $0x1cc] sm:$0xf]  ;;  %v5918_v22 = vor.u32 %v8205_v17, %v5915_v18 }
  0xe8   :  { %v6234_v40 = vor.u32 %v8287_v39, %v6233_v38  ;;  %v8183_v42 = vld [vmem:[#allocation2 + $0x14] sm:$0xf0]  ;;  %v5945_v44 = vld [vmem:[#allocation2 + $0x108] sm:$0xf]  ;;  %v6043_v23 = vld [vmem:[#allocation2 + $0x1d8] sm:$0xf0] }
  0xe9   :  { %1354 = vmatmul.bf16.vlgmr.msra.gmra.mxu0 %v9162_v6  ;;  %1383 = vmatmul.bf16.vlgmr.msra.gmra.mxu1 %v9164_v7  ;;  %v5818_v46 = vor.u32 %v8183_v42, %v5817_v41  ;;  %v6089_v48 = vld [vmem:[#allocation2 + $0x228] sm:$0xf]  ;;  %v8251_v45 = vld [vmem:[#allocation2 + $0x234] sm:$0xf0]  ;;  %v6046_v28 = vor.u32 %v8237_v19, %v6043_v23  ;;  %v8273_v29 = vld [vmem:[#allocation2 + $0x2ec] sm:$0xf] }
  0xea   :  { %1465 = vmatpush.bf16.msrb.mxu0 %v5882_v47  ;;  %v8215_v47 = vld [vmem:[#allocation2 + $0x114] sm:$0xf0]  ;;  %1497 = vmatpush.bf16.msrb.mxu1 %v5962_v36  ;;  %v6217_v53 = vld [vmem:[#allocation2 + $0x328] sm:$0xf]  ;;  %v6090_v57 = vor.u32 %v8251_v45, %v6089_v48  ;;  %v8305_v31 = vld [vmem:[#allocation2 + $0x3ec] sm:$0xf] }
  0xeb   :  { %1525 = vmatpush.bf16.msrb.mxu2 %v6106_v37  ;;  %v5946_v49 = vor.u32 %v8215_v47, %v5945_v44  ;;  %1554 = vmatpush.bf16.msrb.mxu3 %v6234_v40  ;;  %v8283_v58 = vld [vmem:[#allocation2 + $0x334] sm:$0xf0]  ;;  %v6073_v43 = vld [vmem:[#allocation2 + $0x208] sm:$0xf]  ;;  %v6315_v36 = vld [vmem:[#allocation2 + $0x3f8] sm:$0xf0] }
  0xec   :  { %v6218_v59 = vor.u32 %v8283_v58, %v6217_v53  ;;  %v8247_v56 = vld [vmem:[#allocation2 + $0x214] sm:$0xf0]  ;;  %v6201_v62 = vld [vmem:[#allocation2 + $0x308] sm:$0xf]  ;;  %v6318_v37 = vor.u32 %v8305_v31, %v6315_v36  ;;  %v8201_v38 = vld [vmem:[#allocation2 + $0xac] sm:$0xf] }
  0xed   :  { %v8279_v0 = vld [vmem:[#allocation2 + $0x314] sm:$0xf0]  ;;  %v5899_v39 = vld [vmem:[#allocation2 + $0xb8] sm:$0xf0]  ;;  %v8233_v40 = vld [vmem:[#allocation2 + $0x1ac] sm:$0xf] }
  0xee   :  { %1466 = vmatpush.bf16.msrb.mxu0 %v5866_v63  ;;  %1498 = vmatpush.bf16.msrb.mxu1 %v5946_v49  ;;  %v6074_v63 = vor.u32 %v8247_v56, %v6073_v43  ;;  %v6202_v3 = vor.u32 %v8279_v0, %v6201_v62  ;;  %v5902_v42 = vor.u32 %v8201_v38, %v5899_v39  ;;  %v6027_v44 = vld [vmem:[#allocation2 + $0x1b8] sm:$0xf0]  ;;  %v8269_v47 = vld [vmem:[#allocation2 + $0x2cc] sm:$0xf] }
  0xef   :  { %1526 = vmatpush.bf16.msrb.mxu2 %v6090_v57  ;;  %1555 = vmatpush.bf16.msrb.mxu3 %v6218_v59  ;;  %v6171_v49 = vld [vmem:[#allocation2 + $0x2d8] sm:$0xf0]  ;;  %v8301_v48 = vld [vmem:[#allocation2 + $0x3cc] sm:$0xf] }
  0xf0   :  { %1412 = vmatmul.bf16.vlgmr.msra.gmra.mxu2 %v9173_v32  ;;  %1441 = vmatmul.bf16.vlgmr.msra.gmra.mxu3 %v9175_v33  ;;  %v6174_v57 = vor.u32 %v8269_v47, %v6171_v49  ;;  %v6299_v58 = vld [vmem:[#allocation2 + $0x3d8] sm:$0xf0]  ;;  %v8197_v56 = vld [vmem:[#allocation2 + $0x8c] sm:$0xf] }
  0xf1   :  { %v6302_v43 = vor.u32 %v8301_v48, %v6299_v58  ;;  %v5883_v62 = vld [vmem:[#allocation2 + $0x98] sm:$0xf0]  ;;  %v8265_v11 = vld [vmem:[#allocation2 + $0x2ac] sm:$0xf] }
  0xf2   :  { %1467 = vmatpush.bf16.msrb.mxu0 %v5850_v15  ;;  %v6059_v15 = vld [vmem:[#allocation2 + $0x1f8] sm:$0xf0]  ;;  %v5886_v0 = vor.u32 %v8197_v56, %v5883_v62  ;;  %v8193_v18 = vld [vmem:[#allocation2 + $0x6c] sm:$0xf] }
  0xf3   :  { %1527 = vmatpush.bf16.msrb.mxu2 %v6074_v63  ;;  %1556 = vmatpush.bf16.msrb.mxu3 %v6202_v3  ;;  %v6062_v16 = vor.u32 %v8241_v12, %v6059_v15  ;;  %v8229_v63 = vld [vmem:[#allocation2 + $0x18c] sm:$0xf]  ;;  %v6011_v3 = vld [vmem:[#allocation2 + $0x198] sm:$0xf0] }
  0xf4   :  { %v6014_v54 = vor.u32 %v8229_v63, %v6011_v3  ;;  %v6155_v12 = vld [vmem:[#allocation2 + $0x2b8] sm:$0xf0]  ;;  %v8225_v23 = vld [vmem:[#allocation2 + $0x16c] sm:$0xf] }
  0xf5   :  { %1607 = vmatpush.bf16.msra.mxu1 %v6062_v16  ;;  %v6283_v16 = vld [vmem:[#allocation2 + $0x3b8] sm:$0xf0]  ;;  %v8293_v31 = vld [vmem:[#allocation2 + $0x38c] sm:$0xf] }
  0xf6   :  { %1468 = vmatpush.bf16.msrb.mxu0 %v5834_v30  ;;  %v6187_v30 = vld [vmem:[#allocation2 + $0x2f8] sm:$0xf0]  ;;  %v8257_v58 = vld [vmem:[#allocation2 + $0x26c] sm:$0xf] }
  0xf7   :  { %v6190_v35 = vor.u32 %v8273_v29, %v6187_v30  ;;  %1665 = vmatpush.bf16.msra.mxu3 %v6318_v37  ;;  %v8261_v29 = vld [vmem:[#allocation2 + $0x28c] sm:$0xf]  ;;  %v6139_v30 = vld [vmem:[#allocation2 + $0x298] sm:$0xf0] }
  0xf8   :  { %v6142_v36 = vor.u32 %v8261_v29, %v6139_v30  ;;  %v6267_v37 = vld [vmem:[#allocation2 + $0x398] sm:$0xf0]  ;;  %v8185_v3 = vld [vmem:[#allocation2 + $0x2c] sm:$0xf] }
  0xf9   :  { %1359 = vmatmul.bf16.gmra.mxu0 %v9188_v20  ;;  %1388 = vmatmul.bf16.gmra.mxu1 %v9190_v21  ;;  %v6270_v39 = vor.u32 %v8293_v31, %v6267_v37  ;;  %v5979_v49 = vld [vmem:[#allocation2 + $0x158] sm:$0xf0]  ;;  %v8181_v30 = vld [vmem:[#allocation2 + $0xc] sm:$0xf] }
  0xfa   :  { %1469 = vmatpush.bf16.msrb.mxu0 %v5818_v46  ;;  %1608 = vmatpush.bf16.msra.mxu1 %v6046_v28  ;;  %v6030_v46 = vor.u32 %v8233_v40, %v6027_v44  ;;  %v8189_v40 = vld [vmem:[#allocation2 + $0x4c] sm:$0xf]  ;;  %v6251_v62 = vld [vmem:[#allocation2 + $0x378] sm:$0xf0] }
  0xfb   :  { %1636 = vmatpush.bf16.msra.mxu2 %v6190_v35  ;;  %1666 = vmatpush.bf16.msra.mxu3 %v6302_v43  ;;  %v8221_v44 = vld [vmem:[#allocation2 + $0x14c] sm:$0xf]  ;;  %v5819_v31 = vld [vmem:[#allocation2 + $0x18] sm:$0xf0] }
  0xfc   :  { %v8289_v43 = vld [vmem:[#allocation2 + $0x36c] sm:$0xf] }
  0xfe   :  { %1578 = vmatpush.bf16.msra.mxu0 %v5934_v14  ;;  %1609 = vmatpush.bf16.msra.mxu1 %v6030_v46  ;;  %v8297_v14 = vld [vmem:[#allocation2 + $0x3ac] sm:$0xf] }
  0xff   :  { %1637 = vmatpush.bf16.msra.mxu2 %v6174_v57  ;;  %v6286_v17 = vor.u32 %v8297_v14, %v6283_v16  ;;  %v5982_v57 = vor.u32 %v8221_v44, %v5979_v49  ;;  %v8253_v16 = vld [vmem:[#allocation2 + $0x24c] sm:$0xf]  ;;  %v6091_v44 = vld [vmem:[#allocation2 + $0x238] sm:$0xf0] }
 0x100   :  { %1417 = vmatmul.bf16.gmra.mxu2 %v9207_v1  ;;  %1446 = vmatmul.bf16.gmra.mxu3 %v9209_v2  ;;  %v6219_v49 = vld [vmem:[#allocation2 + $0x338] sm:$0xf0] }
 0x101   :  { %1667 = vmatpush.bf16.msra.mxu3 %v6286_v17  ;;  %v6107_v17 = vld [vmem:[#allocation2 + $0x258] sm:$0xf0] }
 0x102   :  { %1579 = vmatpush.bf16.msra.mxu0 %v5918_v22  ;;  %v5867_v22 = vld [vmem:[#allocation2 + $0x78] sm:$0xf0]  ;;  %1610 = vmatpush.bf16.msra.mxu1 %v6014_v54 }
 0x103   :  { %v5835_v54 = vld [vmem:[#allocation2 + $0x38] sm:$0xf0] }
 0x105   :  { %1668 = vmatpush.bf16.msra.mxu3 %v6270_v39  ;;  %v5822_v39 = vor.u32 %v8181_v30, %v5819_v31 }
 0x106   :  { %1580 = vmatpush.bf16.msra.mxu0 %v5902_v42  ;;  %v5851_v42 = vld [vmem:[#allocation2 + $0x58] sm:$0xf0] }
 0x107   :  { %v5854_v47 = vor.u32 %v8189_v40, %v5851_v42  ;;  %v8249_v42 = vld [vmem:[#allocation2 + $0x22c] sm:$0xf] }
 0x109   :  { %1364 = vmatmul.bf16.gmra.mxu0 %v9221_v60  ;;  %1393 = vmatmul.bf16.gmra.mxu1 %v9223_v61 }
 0x10a   :  { %1581 = vmatpush.bf16.msra.mxu0 %v5886_v0  ;;  %v6254_v0 = vor.u32 %v8289_v43, %v6251_v62 }
 0x10c   :  { %1669 = vmatpush.bf16.msra.mxu3 %v6254_v0 }
 0x110   :  { %1422 = vmatmul.bf16.gmra.mxu2 %v9231_v25  ;;  %1451 = vmatmul.bf16.gmra.mxu3 %v9233_v26 }
 0x119   :  { %1369 = vmatmul.bf16.gmra.mxu0 %v9242_v50  ;;  %1398 = vmatmul.bf16.gmra.mxu1 %v9244_v51 }
 0x120   :  { %1427 = vmatmul.bf16.gmra.mxu2 %v9250_v4  ;;  %1456 = vmatmul.bf16.gmra.mxu3 %v9252_v5 }
 0x126   :  { %v1239_v8 = vpop.f32.mrf.mxu0  ;;  %v1268_v9 = vpop.f32.mrf.mxu1 }
 0x127   :  { %v1240_v10 = vadd.f32 %v1239_v8, %v9278_v55 }
 0x129   :  { %v1269_v13 = vadd.f32 %v1268_v9, %v1240_v10  ;;  %1470 = vmatmul.bf16.vlgmr.msrb.gmra.mxu0 %v9162_v6  ;;  %1499 = vmatmul.bf16.vlgmr.msrb.gmra.mxu1 %v9164_v7 }
 0x12e   :  { %v1241_v24 = vpop.f32.mrf.mxu0  ;;  %v1270_v27 = vpop.f32.mrf.mxu1 }
 0x12f   :  { %v1242_v34 = vadd.f32 %v1241_v24, %v9278_v55  ;;  %v5995_v24 = vld [vmem:[#allocation2 + $0x178] sm:$0xf0] }
 0x130   :  { %1528 = vmatmul.bf16.vlgmr.msrb.gmra.mxu2 %v9173_v32  ;;  %1557 = vmatmul.bf16.vlgmr.msrb.gmra.mxu3 %v9175_v33  ;;  %v5998_v28 = vor.u32 %v8225_v23, %v5995_v24 }
 0x131   :  { %v1271_v41 = vadd.f32 %v1270_v27, %v1242_v34  ;;  %v5870_v27 = vor.u32 %v8193_v18, %v5867_v22  ;;  %v8285_v18 = vld [vmem:[#allocation2 + $0x34c] sm:$0xf] }
 0x132   :  { %1611 = vmatpush.bf16.msra.mxu1 %v5998_v28 }
 0x133   :  { %v1297_v45 = vpop.f32.mrf.mxu2  ;;  %v1326_v53 = vpop.f32.mrf.mxu3  ;;  %1582 = vmatpush.bf16.msra.mxu0 %v5870_v27  ;;  %v6110_v27 = vor.u32 %v8253_v16, %v6107_v17 }
 0x134   :  { %v1298_v59 = vadd.f32 %v1297_v45, %v1269_v13  ;;  %v6158_v13 = vor.u32 %v8265_v11, %v6155_v12  ;;  %v8217_v11 = vld [vmem:[#allocation2 + $0x12c] sm:$0xf]  ;;  %v5963_v12 = vld [vmem:[#allocation2 + $0x138] sm:$0xf0] }
 0x136   :  { %v1327_v8 = vadd.f32 %v1326_v53, %v1298_v59  ;;  %v1244_v9 = vpop.f32.mrf.mxu0  ;;  %v1273_v10 = vpop.f32.mrf.mxu1  ;;  %1638 = vmatpush.bf16.msra.mxu2 %v6158_v13  ;;  %v6123_v59 = vld [vmem:[#allocation2 + $0x278] sm:$0xf0]  ;;  %1612 = vmatpush.bf16.msra.mxu1 %v5982_v57  ;;  %v5966_v13 = vor.u32 %v8217_v11, %v5963_v12 }
 0x137   :  { %v1245_v15 = vadd.f32 %v1244_v9, %v9278_v55  ;;  %v6126_v56 = vor.u32 %v8257_v58, %v6123_v59  ;;  %1583 = vmatpush.bf16.msra.mxu0 %v5854_v47  ;;  %v6094_v47 = vor.u32 %v8249_v42, %v6091_v44  ;;  %v6075_v57 = vld [vmem:[#allocation2 + $0x218] sm:$0xf0]  ;;  %v8277_v58 = vld [vmem:[#allocation2 + $0x30c] sm:$0xf] }
 0x138   :  { %vm1694_vm1 = vcmp.gt.f32.partialorder %v1327_v8, 0.0  ;;  %v1726_v46 = vmul.f32 0.2, %v1327_v8 }
 0x139   :  { %v9287_v19 = vadd.f32 %v1273_v10, %v1245_v15  ;;  %1475 = vmatmul.bf16.gmra.mxu0 %v9188_v20  ;;  %1504 = vmatmul.bf16.gmra.mxu1 %v9190_v21  ;;  %v5838_v15 = vor.u32 %v8185_v3, %v5835_v54 }
 0x13a   :  { %1639 = vmatpush.bf16.msra.mxu2 %v6142_v36  ;;  %v1758_v9 = vsel %vm1694_vm1, %v1327_v8, %v1726_v46  ;;  %v6235_v8 = vld [vmem:[#allocation2 + $0x358] sm:$0xf0]  ;;  %1613 = vmatpush.bf16.msra.mxu1 %v5966_v13 }
 0x13b   :  { %v1299_v34 = vpop.f32.mrf.mxu2  ;;  %v1328_v35 = vpop.f32.mrf.mxu3  ;;  %v6238_v29 = vor.u32 %v8285_v18, %v6235_v8  ;;  %1584 = vmatpush.bf16.msra.mxu0 %v5838_v15 }
 0x13c   :  { %v1300_v38 = vadd.f32 %v1299_v34, %v1271_v41  ;;  %v8213_v34 = vld [vmem:[#allocation2 + $0x10c] sm:$0xf] }
 0x13d   :  { %1670 = vmatpush.bf16.msra.mxu3 %v6238_v29 }
 0x13e   :  { %v1329_v48 = vadd.f32 %v1328_v35, %v1300_v38  ;;  %v1246_v45 = vpop.f32.mrf.mxu0  ;;  %v1275_v53 = vpop.f32.mrf.mxu1  ;;  %1640 = vmatpush.bf16.msra.mxu2 %v6126_v56  ;;  %v5947_v35 = vld [vmem:[#allocation2 + $0x118] sm:$0xf0] }
 0x13f   :  { %v1247_v41 = vadd.f32 %v1246_v45, %v9278_v55  ;;  %v5950_v40 = vor.u32 %v8213_v34, %v5947_v35  ;;  %1585 = vmatpush.bf16.msra.mxu0 %v5822_v39  ;;  %v6203_v56 = vld [vmem:[#allocation2 + $0x318] sm:$0xf0] }
 0x140   :  { %vm1698_vm2 = vcmp.gt.f32.partialorder %v1329_v48, 0.0  ;;  %v1730_v63 = vmul.f32 0.2, %v1329_v48  ;;  %1533 = vmatmul.bf16.gmra.mxu2 %v9207_v1  ;;  %1562 = vmatmul.bf16.gmra.mxu3 %v9209_v2 }
 0x141   :  { %v1276_v10 = vadd.f32 %v1275_v53, %v1247_v41  ;;  %1614 = vmatpush.bf16.msra.mxu1 %v5950_v40  ;;  %v8245_v53 = vld [vmem:[#allocation2 + $0x20c] sm:$0xf] }
 0x142   :  { %v1762_v14 = vsel %vm1698_vm2, %v1329_v48, %v1730_v63  ;;  %1641 = vmatpush.bf16.msra.mxu2 %v6110_v27  ;;  %v6078_v41 = vor.u32 %v8245_v53, %v6075_v57  ;;  %v6206_v63 = vor.u32 %v8277_v58, %v6203_v56  ;;  %v8323_v57 = vld [vmem:[#allocation5 + $0x74] sm:$0xf0]  ;;  %v6441_v58 = vld [vmem:[#allocation5 + $0xf0] sm:$0xf] }
 0x143   :  { %v9295_v22 = vpack.c.bf16 %v1762_v14, %v1758_v9  ;;  %v1302_v23 = vpop.f32.mrf.mxu2  ;;  %v1331_v24 = vpop.f32.mrf.mxu3 }
 0x144   :  { %v1303_v28 = vadd.f32 %v1302_v23, %v9287_v19  ;;  %v8281_v19 = vld [vmem:[#allocation2 + $0x32c] sm:$0xf] }
 0x145   :  { %v6222_v48 = vor.u32 %v8281_v19, %v6219_v49 }
 0x146   :  { %v1332_v36 = vadd.f32 %v1331_v24, %v1303_v28  ;;  %v1249_v37 = vpop.f32.mrf.mxu0  ;;  %v1278_v38 = vpop.f32.mrf.mxu1  ;;  %1642 = vmatpush.bf16.msra.mxu2 %v6094_v47 }
 0x147   :  { %v1250_v46 = vadd.f32 %v1249_v37, %v9278_v55  ;;  %1671 = vmatpush.bf16.msra.mxu3 %v6222_v48 }
 0x148   :  { %v1734_v0 = vmul.f32 0.2, %v1332_v36  ;;  %vm1702_vm3 = vcmp.gt.f32.partialorder %v1332_v36, 0.0 }
 0x149   :  { %v1279_v45 = vadd.f32 %v1278_v38, %v1250_v46  ;;  %1480 = vmatmul.bf16.gmra.mxu0 %v9221_v60  ;;  %1509 = vmatmul.bf16.gmra.mxu1 %v9223_v61 }
 0x14a   :  { %1643 = vmatpush.bf16.msra.mxu2 %v6078_v41  ;;  %v1766_v15 = vsel %vm1702_vm3, %v1332_v36, %v1734_v0  ;;  %v6369_v0 = vld [vmem:[#allocation5 + $0x60] sm:$0xf] }
 0x14b   :  { %v1304_v59 = vpop.f32.mrf.mxu2  ;;  %v1333_v43 = vpop.f32.mrf.mxu3  ;;  %1672 = vmatpush.bf16.msra.mxu3 %v6206_v63 }
 0x14c   :  { %v1305_v62 = vadd.f32 %v1304_v59, %v1276_v10  ;;  %v8339_v59 = vld [vmem:[#allocation5 + $0xf4] sm:$0xf0] }
 0x14d   :  { %v6442_v41 = vor.u32 %v8339_v59, %v6441_v58  ;;  %v8313_v58 = vld [vmem:[#allocation5 + $0x24] sm:$0xf0]  ;;  %v6401_v59 = vld [vmem:[#allocation5 + $0xa0] sm:$0xf] }
 0x14e   :  { %v1334_v3 = vadd.f32 %v1333_v43, %v1305_v62  ;;  %v1251_v9 = vpop.f32.mrf.mxu0  ;;  %v1280_v54 = vpop.f32.mrf.mxu1 }
 0x14f   :  { %v1252_v11 = vadd.f32 %v1251_v9, %v9278_v55  ;;  %2225 = vmatpush.bf16.msrb.mxu1 %v6442_v41  ;;  %v6433_v9 = vld [vmem:[#allocation5 + $0xe0] sm:$0xf] }
 0x150   :  { %vm1706_vm4 = vcmp.gt.f32.partialorder %v1334_v3, 0.0  ;;  %v1738_v12 = vmul.f32 0.2, %v1334_v3  ;;  %1538 = vmatmul.bf16.gmra.mxu2 %v9231_v25  ;;  %1567 = vmatmul.bf16.gmra.mxu3 %v9233_v26 }
 0x151   :  { %v1281_v14 = vadd.f32 %v1280_v54, %v1252_v11  ;;  %v8337_v11 = vld [vmem:[#allocation5 + $0xe4] sm:$0xf0] }
 0x152   :  { %v1770_v13 = vsel %vm1706_vm4, %v1334_v3, %v1738_v12  ;;  %v8321_v3 = vld [vmem:[#allocation5 + $0x64] sm:$0xf0] }
 0x153   :  { %v1307_v10 = vpop.f32.mrf.mxu2  ;;  %v1336_v16 = vpop.f32.mrf.mxu3  ;;  %v9304_v17 = vpack.c.bf16 %v1770_v13, %v1766_v15  ;;  %v6370_v54 = vor.u32 %v8321_v3, %v6369_v0  ;;  %v6434_v15 = vor.u32 %v8337_v11, %v6433_v9  ;;  %v6393_v0 = vld [vmem:[#allocation5 + $0x90] sm:$0xf]  ;;  %v8327_v3 = vld [vmem:[#allocation5 + $0x94] sm:$0xf0] }
 0x154   :  { %v1308_v18 = vadd.f32 %v1307_v10, %v1279_v45  ;;  %v6361_v10 = vld [vmem:[#allocation5 + $0x50] sm:$0xf] }
 0x155   :  { %2226 = vmatpush.bf16.msrb.mxu1 %v6434_v15  ;;  %v8355_v15 = vld [vmem:[#allocation5 + $0x174] sm:$0xf0] }
 0x156   :  { %v1337_v23 = vadd.f32 %v1336_v16, %v1308_v18  ;;  %v1254_v24 = vpop.f32.mrf.mxu0  ;;  %v1283_v27 = vpop.f32.mrf.mxu1  ;;  %v8319_v16 = vld [vmem:[#allocation5 + $0x54] sm:$0xf0]  ;;  %v6425_v18 = vld [vmem:[#allocation5 + $0xd0] sm:$0xf] }
 0x157   :  { %v1255_v8 = vadd.f32 %v1254_v24, %v9278_v55  ;;  %v6362_v24 = vor.u32 %v8319_v16, %v6361_v10  ;;  %v6321_v10 = vld [vmem:[#allocation5] sm:$0xf]  ;;  %v8309_v16 = vld [vmem:[#allocation5 + $0x4] sm:$0xf0] }
 0x158   :  { %v1742_v34 = vmul.f32 0.2, %v1337_v23  ;;  %vm1710_vm5 = vcmp.gt.f32.partialorder %v1337_v23, 0.0 }
 0x159   :  { %v1284_v28 = vadd.f32 %v1283_v27, %v1255_v8  ;;  %1485 = vmatmul.bf16.gmra.mxu0 %v9242_v50  ;;  %1514 = vmatmul.bf16.gmra.mxu1 %v9244_v51 }
 0x15a   :  { %v1774_v42 = vsel %vm1710_vm5, %v1337_v23, %v1742_v34  ;;  %v8335_v23 = vld [vmem:[#allocation5 + $0xd4] sm:$0xf0]  ;;  %v6353_v34 = vld [vmem:[#allocation5 + $0x40] sm:$0xf] }
 0x15b   :  { %v1309_v29 = vpop.f32.mrf.mxu2  ;;  %v1338_v30 = vpop.f32.mrf.mxu3  ;;  %v6426_v27 = vor.u32 %v8335_v23, %v6425_v18  ;;  %v8325_v18 = vld [vmem:[#allocation5 + $0x84] sm:$0xf0] }
 0x15c   :  { %v1310_v31 = vadd.f32 %v1309_v29, %v1281_v14 }
 0x15d   :  { %2227 = vmatpush.bf16.msrb.mxu1 %v6426_v27 }
 0x15e   :  { %v1339_v35 = vadd.f32 %v1338_v30, %v1310_v31  ;;  %v1256_v36 = vpop.f32.mrf.mxu0  ;;  %v1285_v37 = vpop.f32.mrf.mxu1 }
 0x15f   :  { %v1257_v38 = vadd.f32 %v1256_v36, %v9278_v55  ;;  %v6377_v55 = vld [vmem:[#allocation5 + $0x70] sm:$0xf] }
 0x160   :  { %vm1714_vm6 = vcmp.gt.f32.partialorder %v1339_v35, 0.0  ;;  %v1746_v39 = vmul.f32 0.2, %v1339_v35  ;;  %1543 = vmatmul.bf16.gmra.mxu2 %v9250_v4  ;;  %1572 = vmatmul.bf16.gmra.mxu3 %v9252_v5  ;;  %v6378_v43 = vor.u32 %v8323_v57, %v6377_v55  ;;  %v6337_v57 = vld [vmem:[#allocation5 + $0x20] sm:$0xf] }
 0x161   :  { %v1286_v40 = vadd.f32 %v1285_v37, %v1257_v38 }
 0x162   :  { %v1778_v44 = vsel %vm1714_vm6, %v1339_v35, %v1746_v39  ;;  %2196 = vmatpush.bf16.msrb.mxu0 %v6378_v43  ;;  %v6417_v35 = vld [vmem:[#allocation5 + $0xc0] sm:$0xf]  ;;  %v8329_v43 = vld [vmem:[#allocation5 + $0xa4] sm:$0xf0] }
 0x163   :  { %v1312_v46 = vpop.f32.mrf.mxu2  ;;  %v1341_v47 = vpop.f32.mrf.mxu3  ;;  %v9312_v19 = vpack.c.bf16 %v1778_v44, %v1774_v42  ;;  %v8315_v42 = vld [vmem:[#allocation5 + $0x34] sm:$0xf0]  ;;  %v6409_v44 = vld [vmem:[#allocation5 + $0xb0] sm:$0xf] }
 0x164   :  { %v1313_v49 = vadd.f32 %v1312_v46, %v1284_v28  ;;  %v8331_v46 = vld [vmem:[#allocation5 + $0xb4] sm:$0xf0] }
 0x166   :  { %v1342_v48 = vadd.f32 %v1341_v47, %v1313_v49  ;;  %v9314_v45 = vpop.f32.mrf.mxu0  ;;  %v9316_v53 = vpop.f32.mrf.mxu1  ;;  %2197 = vmatpush.bf16.msrb.mxu0 %v6370_v54  ;;  %v6410_v49 = vor.u32 %v8331_v46, %v6409_v44  ;;  %v6394_v54 = vor.u32 %v8327_v3, %v6393_v0  ;;  %v6481_v44 = vld [vmem:[#allocation5 + $0x140] sm:$0xf]  ;;  %v8349_v46 = vld [vmem:[#allocation5 + $0x144] sm:$0xf0] }
 0x168   :  { %v1750_v12 = vmul.f32 0.2, %v1342_v48  ;;  %vm1718_vm7 = vcmp.gt.f32.partialorder %v1342_v48, 0.0 }
 0x169   :  { %1586 = vmatmul.bf16.vlgmr.msra.gmra.mxu0 %v9162_v6  ;;  %1615 = vmatmul.bf16.vlgmr.msra.gmra.mxu1 %v9164_v7 }
 0x16a   :  { %v1782_v8 = vsel %vm1718_vm7, %v1342_v48, %v1750_v12  ;;  %2198 = vmatpush.bf16.msrb.mxu0 %v6362_v24  ;;  %v6322_v24 = vor.u32 %v8309_v16, %v6321_v10 }
 0x16b   :  { %v1314_v56 = vpop.f32.mrf.mxu2  ;;  %v1343_v62 = vpop.f32.mrf.mxu3 }
 0x16c   :  { %v1315_v63 = vadd.f32 %v1314_v56, %v1286_v40  ;;  %v6345_v40 = vld [vmem:[#allocation5 + $0x30] sm:$0xf]  ;;  %v6402_v56 = vor.u32 %v8329_v43, %v6401_v59  ;;  %v8347_v59 = vld [vmem:[#allocation5 + $0x134] sm:$0xf0] }
 0x16d   :  { %v6346_v47 = vor.u32 %v8315_v42, %v6345_v40 }
 0x16e   :  { %v1344_v14 = vadd.f32 %v1343_v62, %v1315_v63  ;;  %v9320_v6 = vpop.f32.mrf.mxu0  ;;  %v9322_v7 = vpop.f32.mrf.mxu1  ;;  %v6329_v62 = vld [vmem:[#allocation5 + $0x10] sm:$0xf]  ;;  %v8311_v63 = vld [vmem:[#allocation5 + $0x14] sm:$0xf0] }
 0x16f   :  { %v6330_v9 = vor.u32 %v8311_v63, %v6329_v62  ;;  %v6465_v62 = vld [vmem:[#allocation5 + $0x120] sm:$0xf] }
 0x170   :  { %vm1722_vm8 = vcmp.gt.f32.partialorder %v1344_v14, 0.0  ;;  %v1754_v13 = vmul.f32 0.2, %v1344_v14  ;;  %1644 = vmatmul.bf16.vlgmr.msra.gmra.mxu2 %v9173_v32  ;;  %1673 = vmatmul.bf16.vlgmr.msra.gmra.mxu3 %v9175_v33  ;;  %v8317_v32 = vld [vmem:[#allocation5 + $0x44] sm:$0xf0] }
 0x171   :  { %v8333_v33 = vld [vmem:[#allocation5 + $0xc4] sm:$0xf0]  ;;  %v6354_v38 = vor.u32 %v8317_v32, %v6353_v34 }
 0x172   :  { %v1786_v28 = vsel %vm1722_vm8, %v1344_v14, %v1754_v13  ;;  %v6418_v39 = vor.u32 %v8333_v33, %v6417_v35  ;;  %v6505_v14 = vld [vmem:[#allocation5 + $0x170] sm:$0xf] }
 0x173   :  { %v9326_v29 = vpop.f32.mrf.mxu2  ;;  %v9328_v30 = vpop.f32.mrf.mxu3  ;;  %v9330_v31 = vpack.c.bf16 %v1786_v28, %v1782_v8  ;;  %2199 = vmatpush.bf16.msrb.mxu0 %v6354_v38  ;;  %v6506_v13 = vor.u32 %v8355_v15, %v6505_v14  ;;  %v6497_v8 = vld [vmem:[#allocation5 + $0x160] sm:$0xf]  ;;  %v8353_v28 = vld [vmem:[#allocation5 + $0x164] sm:$0xf0]  ;;  %v6489_v33 = vld [vmem:[#allocation5 + $0x150] sm:$0xf] }
 0x174   :  { %2228 = vmatpush.bf16.msrb.mxu1 %v6418_v39  ;;  %v6498_v34 = vor.u32 %v8353_v28, %v6497_v8  ;;  %v8351_v38 = vld [vmem:[#allocation5 + $0x154] sm:$0xf0] }
 0x175   :  { %2254 = vmatpush.bf16.msrb.mxu2 %v6506_v13  ;;  %v6490_v39 = vor.u32 %v8351_v38, %v6489_v33  ;;  %v8343_v14 = vld [vmem:[#allocation5 + $0x114] sm:$0xf0]  ;;  %v8322_v38 = vld [vmem:[#allocation5 + $0x74] sm:$0xf] }
 0x176   :  { %v9332_v36 = vpop.f32.mrf.mxu0  ;;  %v9334_v37 = vpop.f32.mrf.mxu1 }
 0x177   :  { %2200 = vmatpush.bf16.msrb.mxu0 %v6346_v47 }
 0x178   :  { %2229 = vmatpush.bf16.msrb.mxu1 %v6410_v49 }
 0x179   :  { %1591 = vmatmul.bf16.gmra.mxu0 %v9188_v20  ;;  %1620 = vmatmul.bf16.gmra.mxu1 %v9190_v21  ;;  %v6338_v21 = vor.u32 %v8313_v58, %v6337_v57  ;;  %v6473_v58 = vld [vmem:[#allocation5 + $0x130] sm:$0xf] }
 0x17a   :  { %2255 = vmatpush.bf16.msrb.mxu2 %v6498_v34 }
 0x17b   :  { %v9338_v48 = vpop.f32.mrf.mxu2  ;;  %v9340_v55 = vpop.f32.mrf.mxu3  ;;  %2201 = vmatpush.bf16.msrb.mxu0 %v6338_v21  ;;  %v6474_v21 = vor.u32 %v8347_v59, %v6473_v58  ;;  %v8320_v59 = vld [vmem:[#allocation5 + $0x64] sm:$0xf] }
 0x17c   :  { %2230 = vmatpush.bf16.msrb.mxu1 %v6402_v56 }
 0x17e   :  { %v9342_v41 = vpop.f32.mrf.mxu0  ;;  %v9344_v20 = vpop.f32.mrf.mxu1  ;;  %2256 = vmatpush.bf16.msrb.mxu2 %v6490_v39  ;;  %v6379_v39 = vld [vmem:[#allocation5 + $0x78] sm:$0xf0] }
 0x17f   :  { %2202 = vmatpush.bf16.msrb.mxu0 %v6330_v9 }
 0x180   :  { %1649 = vmatmul.bf16.gmra.mxu2 %v9207_v1  ;;  %1678 = vmatmul.bf16.gmra.mxu3 %v9209_v2  ;;  %v6385_v1 = vld [vmem:[#allocation5 + $0x80] sm:$0xf] }
 0x181   :  { %2231 = vmatpush.bf16.msrb.mxu1 %v6394_v54  ;;  %v6386_v27 = vor.u32 %v8325_v18, %v6385_v1  ;;  %v6457_v54 = vld [vmem:[#allocation5 + $0x110] sm:$0xf] }
 0x182   :  { %v6458_v13 = vor.u32 %v8343_v14, %v6457_v54  ;;  %v6363_v14 = vld [vmem:[#allocation5 + $0x58] sm:$0xf0] }
 0x183   :  { %v9348_v11 = vpop.f32.mrf.mxu2  ;;  %v9350_v12 = vpop.f32.mrf.mxu3  ;;  %2203 = vmatpush.bf16.msrb.mxu0 %v6322_v24 }
 0x185   :  { %2232 = vmatpush.bf16.msrb.mxu1 %v6386_v27 }
 0x186   :  { %v9352_v2 = vpop.f32.mrf.mxu0  ;;  %v9354_v23 = vpop.f32.mrf.mxu1 }
 0x189   :  { %1596 = vmatmul.bf16.gmra.mxu0 %v9221_v60  ;;  %1625 = vmatmul.bf16.gmra.mxu1 %v9223_v61  ;;  %v9367_v60 = vperm.slane %v9275_v52, 1  ;;  %v6482_v61 = vor.u32 %v8349_v46, %v6481_v44  ;;  %v8338_v44 = vld [vmem:[#allocation5 + $0xf4] sm:$0xf] }
 0x18b   :  { %v9358_v32 = vpop.f32.mrf.mxu2  ;;  %v9360_v35 = vpop.f32.mrf.mxu3  ;;  %v1358_v47 = vadd.f32 %v9320_v6, %v9367_v60  ;;  %2257 = vmatpush.bf16.msrb.mxu2 %v6482_v61  ;;  %v1356_v43 = vadd.f32 %v9314_v45, %v9367_v60  ;;  %v8345_v6 = vld [vmem:[#allocation5 + $0x124] sm:$0xf0]  ;;  %v1361_v24 = vadd.f32 %v9332_v36, %v9367_v60  ;;  %v6443_v36 = vld [vmem:[#allocation5 + $0xf8] sm:$0xf0]  ;;  %v6382_v61 = vor.u32 %v8322_v38, %v6379_v39 }
 0x18c   :  { %v6466_v3 = vor.u32 %v8345_v6, %v6465_v62  ;;  %v6435_v62 = vld [vmem:[#allocation5 + $0xe8] sm:$0xf0] }
 0x18d   :  { %v1387_v56 = vadd.f32 %v9322_v7, %v1358_v47  ;;  %v1385_v63 = vadd.f32 %v9316_v53, %v1356_v43  ;;  %v1390_v33 = vadd.f32 %v9334_v37, %v1361_v24  ;;  %v9418_v47 = vperm.slane %v9275_v52, 2  ;;  %2312 = vmatpush.bf16.msra.mxu0 %v6382_v61  ;;  %v6371_v43 = vld [vmem:[#allocation5 + $0x68] sm:$0xf0]  ;;  %v8330_v61 = vld [vmem:[#allocation5 + $0xb4] sm:$0xf] }
 0x18e   :  { %v9362_v40 = vpop.f32.mrf.mxu0  ;;  %v9364_v42 = vpop.f32.mrf.mxu1  ;;  %v1366_v52 = vadd.f32 %v9352_v2, %v9367_v60  ;;  %v6355_v24 = vld [vmem:[#allocation5 + $0x48] sm:$0xf0] }
 0x18f   :  { %2258 = vmatpush.bf16.msrb.mxu2 %v6474_v21  ;;  %v1416_v0 = vadd.f32 %v9338_v48, %v1387_v56  ;;  %v1414_v45 = vadd.f32 %v9326_v29, %v1385_v63  ;;  %v1419_v46 = vadd.f32 %v9348_v11, %v1390_v33  ;;  %v8336_v21 = vld [vmem:[#allocation5 + $0xe4] sm:$0xf]  ;;  %v6374_v56 = vor.u32 %v8320_v59, %v6371_v43 }
 0x190   :  { %1654 = vmatmul.bf16.gmra.mxu2 %v9231_v25  ;;  %1683 = vmatmul.bf16.gmra.mxu3 %v9233_v26  ;;  %v1368_v54 = vadd.f32 %v9362_v40, %v9367_v60 }
 0x191   :  { %v1445_v15 = vadd.f32 %v9340_v55, %v1416_v0  ;;  %v1443_v53 = vadd.f32 %v9328_v30, %v1414_v45  ;;  %v1363_v55 = vadd.f32 %v9342_v41, %v9367_v60  ;;  %v1448_v11 = vadd.f32 %v9350_v12, %v1419_v46  ;;  %2313 = vmatpush.bf16.msra.mxu0 %v6374_v56  ;;  %v8314_v46 = vld [vmem:[#allocation5 + $0x34] sm:$0xf] }
 0x192   :  { %v6438_v0 = vor.u32 %v8336_v21, %v6435_v62  ;;  %v1397_v40 = vadd.f32 %v9364_v42, %v1368_v54 }
 0x193   :  { %v9373_v49 = vpop.f32.mrf.mxu2  ;;  %v9375_v57 = vpop.f32.mrf.mxu3  ;;  %2259 = vmatpush.bf16.msrb.mxu2 %v6466_v3  ;;  %v1731_v29 = vmul.f32 0.2, %v1445_v15  ;;  %vm1699_vm9 = vcmp.gt.f32.partialorder %v1445_v15, 0.0  ;;  %v1727_v1 = vmul.f32 0.2, %v1443_v53  ;;  %vm1695_vm10 = vcmp.gt.f32.partialorder %v1443_v53, 0.0 }
 0x194   :  { %v1735_v12 = vmul.f32 0.2, %v1448_v11  ;;  %vm1703_vm12 = vcmp.gt.f32.partialorder %v1448_v11, 0.0 }
 0x195   :  { %v1763_v27 = vsel %vm1699_vm9, %v1445_v15, %v1731_v29  ;;  %v1759_v8 = vsel %vm1695_vm10, %v1443_v53, %v1727_v1  ;;  %v8334_v15 = vld [vmem:[#allocation5 + $0xd4] sm:$0xf] }
 0x196   :  { %v9380_v25 = vpop.f32.mrf.mxu0  ;;  %v9382_v26 = vpop.f32.mrf.mxu1  ;;  %v9410_v34 = vpack.c.bf16 %v1763_v27, %v1759_v8  ;;  %v8332_v27 = vld [vmem:[#allocation5 + $0xc4] sm:$0xf] }
 0x197   :  { %2260 = vmatpush.bf16.msrb.mxu2 %v6458_v13  ;;  %v6427_v13 = vld [vmem:[#allocation5 + $0xd8] sm:$0xf0] }
 0x199   :  { %1601 = vmatmul.bf16.gmra.mxu0 %v9242_v50  ;;  %1630 = vmatmul.bf16.gmra.mxu1 %v9244_v51  ;;  %v6449_v50 = vld [vmem:[#allocation5 + $0x100] sm:$0xf]  ;;  %v8341_v51 = vld [vmem:[#allocation5 + $0x104] sm:$0xf0] }
 0x19a   :  { %v6450_v16 = vor.u32 %v8341_v51, %v6449_v50  ;;  %v6430_v50 = vor.u32 %v8334_v15, %v6427_v13  ;;  %v1395_v51 = vadd.f32 %v9354_v23, %v1366_v52 }
 0x19b   :  { %v9389_v9 = vpop.f32.mrf.mxu2  ;;  %v9391_v7 = vpop.f32.mrf.mxu3 }
 0x19c   :  { %2261 = vmatpush.bf16.msrb.mxu2 %v6450_v16  ;;  %v1424_v8 = vadd.f32 %v9373_v49, %v1395_v51  ;;  %v6347_v49 = vld [vmem:[#allocation5 + $0x38] sm:$0xf0] }
 0x19d   :  { %v6350_v43 = vor.u32 %v8314_v46, %v6347_v49  ;;  %v6331_v51 = vld [vmem:[#allocation5 + $0x18] sm:$0xf0]  ;;  %v8308_v46 = vld [vmem:[#allocation5 + $0x4] sm:$0xf]  ;;  %v6323_v49 = vld [vmem:[#allocation5 + $0x8] sm:$0xf0] }
 0x19e   :  { %v9395_v48 = vpop.f32.mrf.mxu0  ;;  %v9397_v10 = vpop.f32.mrf.mxu1  ;;  %v9441_v42 = vadd.f32 %v9375_v57, %v1424_v8  ;;  %v8312_v57 = vld [vmem:[#allocation5 + $0x24] sm:$0xf] }
 0x19f   :  { %v1373_v13 = vadd.f32 %v9395_v48, %v9367_v60 }
 0x1a0   :  { %1659 = vmatmul.bf16.gmra.mxu2 %v9250_v4  ;;  %1688 = vmatmul.bf16.gmra.mxu3 %v9252_v5  ;;  %v1392_v4 = vadd.f32 %v9344_v20, %v1363_v55  ;;  %v6446_v20 = vor.u32 %v8338_v44, %v6443_v36  ;;  %v8316_v55 = vld [vmem:[#allocation5 + $0x44] sm:$0xf]  ;;  %v1426_v44 = vadd.f32 %v9389_v9, %v1397_v40  ;;  %vm1711_vm13 = vcmp.gt.f32.partialorder %v9441_v42, 0.0 }
 0x1a1   :  { %v1402_v48 = vadd.f32 %v9397_v10, %v1373_v13  ;;  %v6326_v10 = vor.u32 %v8308_v46, %v6323_v49  ;;  %v8346_v46 = vld [vmem:[#allocation5 + $0x134] sm:$0xf] }
 0x1a2   :  { %v1421_v41 = vadd.f32 %v9358_v32, %v1392_v4  ;;  %2341 = vmatpush.bf16.msra.mxu1 %v6446_v20  ;;  %v6358_v4 = vor.u32 %v8316_v55, %v6355_v24  ;;  %v6411_v20 = vld [vmem:[#allocation5 + $0xb8] sm:$0xf0]  ;;  %v1455_v9 = vadd.f32 %v9391_v7, %v1426_v44  ;;  %v1743_v7 = vmul.f32 0.2, %v9441_v42 }
 0x1a3   :  { %v9403_v30 = vpop.f32.mrf.mxu2  ;;  %v9405_v18 = vpop.f32.mrf.mxu3  ;;  %v6414_v21 = vor.u32 %v8330_v61, %v6411_v20  ;;  %v6507_v44 = vld [vmem:[#allocation5 + $0x178] sm:$0xf0]  ;;  %v8324_v61 = vld [vmem:[#allocation5 + $0x84] sm:$0xf]  ;;  %v6387_v20 = vld [vmem:[#allocation5 + $0x88] sm:$0xf0] }
 0x1a4   :  { %v1450_v32 = vadd.f32 %v9360_v35, %v1421_v41  ;;  %v8318_v35 = vld [vmem:[#allocation5 + $0x54] sm:$0xf]  ;;  %v1747_v15 = vmul.f32 0.2, %v1455_v9  ;;  %vm1715_vm15 = vcmp.gt.f32.partialorder %v1455_v9, 0.0 }
 0x1a5   :  { %v6366_v53 = vor.u32 %v8318_v35, %v6363_v14 }
 0x1a6   :  { %v1471_v5 = vpop.f32.mrf.mxu0  ;;  %v1500_v28 = vpop.f32.mrf.mxu1  ;;  %vm1707_vm11 = vcmp.gt.f32.partialorder %v1450_v32, 0.0  ;;  %v1739_v3 = vmul.f32 0.2, %v1450_v32  ;;  %2342 = vmatpush.bf16.msra.mxu1 %v6438_v0  ;;  %v8328_v0 = vld [vmem:[#allocation5 + $0xa4] sm:$0xf] }
 0x1a7   :  { %v1472_v45 = vadd.f32 %v1471_v5, %v9418_v47  ;;  %2314 = vmatpush.bf16.msra.mxu0 %v6366_v53  ;;  %v6419_v5 = vld [vmem:[#allocation5 + $0xc8] sm:$0xf0] }
 0x1a8   :  { %v1771_v1 = vsel %vm1707_vm11, %v1450_v32, %v1739_v3  ;;  %v6422_v39 = vor.u32 %v8332_v27, %v6419_v5  ;;  %v6403_v3 = vld [vmem:[#allocation5 + $0xa8] sm:$0xf0]  ;;  %v1371_v27 = vadd.f32 %v9380_v25, %v9367_v60  ;;  %v6569_v5 = vld [vmem:[#allocation5 + $0x1f0] sm:$0xf]  ;;  %v1775_v60 = vsel %vm1711_vm13, %v9441_v42, %v1743_v7  ;;  %v8369_v42 = vld [vmem:[#allocation5 + $0x1e4] sm:$0xf0] }
 0x1a9   :  { %2204 = vmatmul.bf16.vlgmr.msrb.gmra.mxu0 %v9295_v22  ;;  %2233 = vmatmul.bf16.vlgmr.msrb.gmra.mxu1 %v9410_v34  ;;  %v1501_v16 = vadd.f32 %v1500_v28, %v1472_v45  ;;  %v1767_v28 = vsel %vm1703_vm12, %v1448_v11, %v1735_v12  ;;  %v6406_v14 = vor.u32 %v8328_v0, %v6403_v3  ;;  %v6499_v0 = vld [vmem:[#allocation5 + $0x168] sm:$0xf0]  ;;  %v8367_v7 = vld [vmem:[#allocation5 + $0x1d4] sm:$0xf0] }
 0x1aa   :  { %2343 = vmatpush.bf16.msra.mxu1 %v6430_v50  ;;  %v9438_v36 = vpack.c.bf16 %v1771_v1, %v1767_v28  ;;  %v8310_v50 = vld [vmem:[#allocation5 + $0x14] sm:$0xf]  ;;  %v1779_v28 = vsel %vm1715_vm15, %v1455_v9, %v1747_v15  ;;  %v6390_v9 = vor.u32 %v8324_v61, %v6387_v20 }
 0x1ab   :  { %v9420_v58 = vpop.f32.mrf.mxu2  ;;  %v9422_v37 = vpop.f32.mrf.mxu3  ;;  %2315 = vmatpush.bf16.msra.mxu0 %v6358_v4  ;;  %v6334_v55 = vor.u32 %v8310_v50, %v6331_v51  ;;  %v8350_v15 = vld [vmem:[#allocation5 + $0x154] sm:$0xf] }
 0x1ae   :  { %v1473_v6 = vpop.f32.mrf.mxu0  ;;  %v1502_v63 = vpop.f32.mrf.mxu1  ;;  %2344 = vmatpush.bf16.msra.mxu1 %v6422_v39 }
 0x1af   :  { %v1474_v33 = vadd.f32 %v1473_v6, %v9418_v47  ;;  %2316 = vmatpush.bf16.msra.mxu0 %v6350_v43  ;;  %v6339_v6 = vld [vmem:[#allocation5 + $0x28] sm:$0xf0] }
 0x1b0   :  { %v6342_v52 = vor.u32 %v8312_v57, %v6339_v6  ;;  %v8352_v57 = vld [vmem:[#allocation5 + $0x164] sm:$0xf] }
 0x1b1   :  { %v1503_v32 = vadd.f32 %v1502_v63, %v1474_v33  ;;  %v8371_v33 = vld [vmem:[#allocation5 + $0x1f4] sm:$0xf0] }
 0x1b2   :  { %2345 = vmatpush.bf16.msra.mxu1 %v6414_v21  ;;  %v6570_v39 = vor.u32 %v8371_v33, %v6569_v5 }
 0x1b3   :  { %v1529_v2 = vpop.f32.mrf.mxu2  ;;  %v1558_v29 = vpop.f32.mrf.mxu3  ;;  %2317 = vmatpush.bf16.msra.mxu0 %v6342_v52  ;;  %v6502_v52 = vor.u32 %v8352_v57, %v6499_v0  ;;  %v6467_v57 = vld [vmem:[#allocation5 + $0x128] sm:$0xf0] }
 0x1b4   :  { %v1530_v41 = vadd.f32 %v1529_v2, %v1501_v16  ;;  %v8326_v2 = vld [vmem:[#allocation5 + $0x94] sm:$0xf]  ;;  %2283 = vmatpush.bf16.msrb.mxu3 %v6570_v39  ;;  %v6537_v39 = vld [vmem:[#allocation5 + $0x1b0] sm:$0xf] }
 0x1b6   :  { %v1476_v23 = vpop.f32.mrf.mxu0  ;;  %v1505_v38 = vpop.f32.mrf.mxu1  ;;  %v1559_v59 = vadd.f32 %v1558_v29, %v1530_v41  ;;  %2346 = vmatpush.bf16.msra.mxu1 %v6406_v14  ;;  %v6395_v29 = vld [vmem:[#allocation5 + $0x98] sm:$0xf0]  ;;  %v8354_v41 = vld [vmem:[#allocation5 + $0x174] sm:$0xf]  ;;  %v6553_v14 = vld [vmem:[#allocation5 + $0x1d0] sm:$0xf] }
 0x1b7   :  { %v1477_v12 = vadd.f32 %v1476_v23, %v9418_v47  ;;  %v6398_v24 = vor.u32 %v8326_v2, %v6395_v29  ;;  %2318 = vmatpush.bf16.msra.mxu0 %v6334_v55  ;;  %v6510_v25 = vor.u32 %v8354_v41, %v6507_v44  ;;  %v8348_v55 = vld [vmem:[#allocation5 + $0x144] sm:$0xf]  ;;  %v8363_v44 = vld [vmem:[#allocation5 + $0x1b4] sm:$0xf0] }
 0x1b8   :  { %v1728_v45 = vmul.f32 0.2, %v1559_v59  ;;  %vm1696_vm14 = vcmp.gt.f32.partialorder %v1559_v59, 0.0 }
 0x1b9   :  { %2209 = vmatmul.bf16.gmra.mxu0 %v9304_v17  ;;  %2238 = vmatmul.bf16.gmra.mxu1 %v9438_v36  ;;  %v1506_v23 = vadd.f32 %v1505_v38, %v1477_v12  ;;  %v1431_v38 = vadd.f32 %v9420_v58, %v1402_v48  ;;  %v6554_v12 = vor.u32 %v8367_v7, %v6553_v14  ;;  %v6459_v7 = vld [vmem:[#allocation5 + $0x118] sm:$0xf0] }
 0x1ba   :  { %v1760_v16 = vsel %vm1696_vm14, %v1559_v59, %v1728_v45  ;;  %2347 = vmatpush.bf16.msra.mxu1 %v6398_v24  ;;  %2370 = vmatpush.bf16.msra.mxu2 %v6510_v25  ;;  %v6538_v25 = vor.u32 %v8363_v44, %v6537_v39 }
 0x1bb   :  { %v1531_v56 = vpop.f32.mrf.mxu2  ;;  %v1560_v62 = vpop.f32.mrf.mxu3  ;;  %2319 = vmatpush.bf16.msra.mxu0 %v6326_v10  ;;  %v1460_v3 = vadd.f32 %v9422_v37, %v1431_v38  ;;  %v6475_v10 = vld [vmem:[#allocation5 + $0x138] sm:$0xf0] }
 0x1bc   :  { %v1532_v11 = vadd.f32 %v1531_v56, %v1503_v32  ;;  %v1400_v56 = vadd.f32 %v9382_v26, %v1371_v27  ;;  %v6478_v61 = vor.u32 %v8346_v46, %v6475_v10 }
 0x1bd   :  { %v1755_v51 = vmul.f32 0.2, %v1460_v3  ;;  %vm1723_vm3 = vcmp.gt.f32.partialorder %v1460_v3, 0.0 }
 0x1be   :  { %v1561_v35 = vadd.f32 %v1560_v62, %v1532_v11  ;;  %v1478_v63 = vpop.f32.mrf.mxu0  ;;  %v9447_v54 = vpop.f32.mrf.mxu1  ;;  %v9466_v62 = vpack.c.bf16 %v1779_v28, %v1775_v60  ;;  %v6561_v11 = vld [vmem:[#allocation5 + $0x1e0] sm:$0xf]  ;;  %2348 = vmatpush.bf16.msra.mxu1 %v6390_v9  ;;  %v1429_v58 = vadd.f32 %v9403_v30, %v1400_v56  ;;  %2371 = vmatpush.bf16.msra.mxu2 %v6502_v52  ;;  %v6491_v30 = vld [vmem:[#allocation5 + $0x158] sm:$0xf0] }
 0x1bf   :  { %v1479_v32 = vadd.f32 %v1478_v63, %v9418_v47  ;;  %v6562_v6 = vor.u32 %v8369_v42, %v6561_v11  ;;  %v6494_v50 = vor.u32 %v8350_v15, %v6491_v30  ;;  %v1787_v60 = vsel %vm1723_vm3, %v1460_v3, %v1755_v51  ;;  %v6529_v56 = vld [vmem:[#allocation5 + $0x1a0] sm:$0xf]  ;;  %v8361_v11 = vld [vmem:[#allocation5 + $0x1a4] sm:$0xf0] }
 0x1c0   :  { %vm1700_vm0 = vcmp.gt.f32.partialorder %v1561_v35, 0.0  ;;  %v1732_v53 = vmul.f32 0.2, %v1561_v35  ;;  %v6530_v42 = vor.u32 %v8361_v11, %v6529_v56  ;;  %v8357_v51 = vld [vmem:[#allocation5 + $0x184] sm:$0xf0] }
 0x1c1   :  { %v1508_v26 = vadd.f32 %v9447_v54, %v1479_v32  ;;  %2284 = vmatpush.bf16.msrb.mxu3 %v6562_v6 }
 0x1c2   :  { %v1764_v1 = vsel %vm1700_vm0, %v1561_v35, %v1732_v53  ;;  %v1458_v53 = vadd.f32 %v9405_v18, %v1429_v58  ;;  %2372 = vmatpush.bf16.msra.mxu2 %v6494_v50  ;;  %v6513_v50 = vld [vmem:[#allocation5 + $0x180] sm:$0xf] }
 0x1c3   :  { %v9456_v40 = vpack.c.bf16 %v1764_v1, %v1760_v16  ;;  %v1534_v8 = vpop.f32.mrf.mxu2  ;;  %v1563_v4 = vpop.f32.mrf.mxu3  ;;  %v6545_v16 = vld [vmem:[#allocation5 + $0x1c0] sm:$0xf]  ;;  %v8365_v1 = vld [vmem:[#allocation5 + $0x1c4] sm:$0xf0] }
 0x1c4   :  { %v1535_v59 = vadd.f32 %v1534_v8, %v1506_v23  ;;  %v6546_v48 = vor.u32 %v8365_v1, %v6545_v16  ;;  %v6483_v8 = vld [vmem:[#allocation5 + $0x148] sm:$0xf0]  ;;  %vm1719_vm4 = vcmp.gt.f32.partialorder %v1458_v53, 0.0 }
 0x1c5   :  { %2262 = vmatmul.bf16.vlgmr.msrb.gmra.mxu2 %v9456_v40  ;;  %2285 = vmatpush.bf16.msrb.mxu3 %v6554_v12  ;;  %v6486_v18 = vor.u32 %v8348_v55, %v6483_v8  ;;  %v6451_v16 = vld [vmem:[#allocation5 + $0x108] sm:$0xf0] }
 0x1c6   :  { %v1481_v43 = vpop.f32.mrf.mxu0  ;;  %v1510_v21 = vpop.f32.mrf.mxu1  ;;  %v1564_v45 = vadd.f32 %v1563_v4, %v1535_v59  ;;  %v1751_v4 = vmul.f32 0.2, %v1458_v53 }
 0x1c7   :  { %v1482_v24 = vadd.f32 %v1481_v43, %v9418_v47  ;;  %2373 = vmatpush.bf16.msra.mxu2 %v6486_v18 }
 0x1c8   :  { %vm1704_vm1 = vcmp.gt.f32.partialorder %v1564_v45, 0.0  ;;  %v1736_v2 = vmul.f32 0.2, %v1564_v45  ;;  %v1783_v43 = vsel %vm1719_vm4, %v1458_v53, %v1751_v4 }
 0x1c9   :  { %2214 = vmatmul.bf16.gmra.mxu0 %v9312_v19  ;;  %2243 = vmatmul.bf16.gmra.mxu1 %v9466_v62  ;;  %v1511_v49 = vadd.f32 %v1510_v21, %v1482_v24  ;;  %v9481_v9 = vpack.c.bf16 %v1787_v60, %v1783_v43  ;;  %v8344_v21 = vld [vmem:[#allocation5 + $0x124] sm:$0xf] }
 0x1ca   :  { %v1768_v5 = vsel %vm1704_vm1, %v1564_v45, %v1736_v2  ;;  %2286 = vmatpush.bf16.msrb.mxu3 %v6546_v48  ;;  %v6470_v6 = vor.u32 %v8344_v21, %v6467_v57  ;;  %v8359_v45 = vld [vmem:[#allocation5 + $0x194] sm:$0xf0]  ;;  %v8340_v2 = vld [vmem:[#allocation5 + $0x104] sm:$0xf] }
 0x1cb   :  { %v1536_v35 = vpop.f32.mrf.mxu2  ;;  %v1565_v63 = vpop.f32.mrf.mxu3  ;;  %2374 = vmatpush.bf16.msra.mxu2 %v6478_v61  ;;  %v6454_v1 = vor.u32 %v8340_v2, %v6451_v16  ;;  %v8368_v16 = vld [vmem:[#allocation5 + $0x1e4] sm:$0xf] }
 0x1cc   :  { %v1537_v13 = vadd.f32 %v1536_v35, %v1508_v26  ;;  %v6521_v26 = vld [vmem:[#allocation5 + $0x190] sm:$0xf]  ;;  %v8342_v35 = vld [vmem:[#allocation5 + $0x114] sm:$0xf] }
 0x1cd   :  { %v6522_v14 = vor.u32 %v8359_v45, %v6521_v26  ;;  %v6462_v15 = vor.u32 %v8342_v35, %v6459_v7 }
 0x1ce   :  { %v1566_v37 = vadd.f32 %v1565_v63, %v1537_v13  ;;  %v1483_v29 = vpop.f32.mrf.mxu0  ;;  %v1512_v54 = vpop.f32.mrf.mxu1  ;;  %2287 = vmatpush.bf16.msrb.mxu3 %v6538_v25 }
 0x1cf   :  { %v1484_v20 = vadd.f32 %v1483_v29, %v9418_v47  ;;  %2375 = vmatpush.bf16.msra.mxu2 %v6470_v6 }
 0x1d0   :  { %vm1708_vm2 = vcmp.gt.f32.partialorder %v1566_v37, 0.0  ;;  %v1740_v27 = vmul.f32 0.2, %v1566_v37 }
 0x1d1   :  { %v1513_v0 = vadd.f32 %v1512_v54, %v1484_v20  ;;  %v6514_v54 = vor.u32 %v8357_v51, %v6513_v50  ;;  %v6571_v50 = vld [vmem:[#allocation5 + $0x1f8] sm:$0xf0] }
 0x1d2   :  { %v1772_v33 = vsel %vm1708_vm2, %v1566_v37, %v1740_v27  ;;  %2288 = vmatpush.bf16.msrb.mxu3 %v6530_v42 }
 0x1d3   :  { %v1539_v41 = vpop.f32.mrf.mxu2  ;;  %v1568_v23 = vpop.f32.mrf.mxu3  ;;  %v9476_v28 = vpack.c.bf16 %v1772_v33, %v1768_v5  ;;  %2376 = vmatpush.bf16.msra.mxu2 %v6462_v15 }
 0x1d4   :  { %v1540_v38 = vadd.f32 %v1539_v41, %v1511_v49  ;;  %v8788_v49 = vld [vmem:[%s9849_s4] sm:$0xf] }
 0x1d5   :  { %2267 = vmatmul.bf16.gmra.mxu2 %v9476_v28  ;;  %v9496_v60 = vperm.slane %v8788_v49, 3  ;;  %v6547_v49 = vld [vmem:[#allocation5 + $0x1c8] sm:$0xf0] }
 0x1d6   :  { %v1486_v32 = vpop.f32.mrf.mxu0  ;;  %v1515_v59 = vpop.f32.mrf.mxu1  ;;  %v1569_v58 = vadd.f32 %v1568_v23, %v1540_v38  ;;  %2289 = vmatpush.bf16.msrb.mxu3 %v6522_v14 }
 0x1d7   :  { %v1487_v37 = vadd.f32 %v1486_v32, %v9418_v47  ;;  %2377 = vmatpush.bf16.msra.mxu2 %v6454_v1  ;;  %v6563_v1 = vld [vmem:[#allocation5 + $0x1e8] sm:$0xf0] }
 0x1d8   :  { %vm1712_vm5 = vcmp.gt.f32.partialorder %v1569_v58, 0.0  ;;  %v1744_v13 = vmul.f32 0.2, %v1569_v58 }
 0x1d9   :  { %2219 = vmatmul.bf16.gmra.mxu0 %v9330_v31  ;;  %2248 = vmatmul.bf16.gmra.mxu1 %v9481_v9  ;;  %v1516_v18 = vadd.f32 %v1515_v59, %v1487_v37 }
 0x1da   :  { %v1776_v55 = vsel %vm1712_vm5, %v1569_v58, %v1744_v13  ;;  %2290 = vmatpush.bf16.msrb.mxu3 %v6514_v54 }
 0x1db   :  { %v1541_v52 = vpop.f32.mrf.mxu2  ;;  %v1570_v3 = vpop.f32.mrf.mxu3 }
 0x1dc   :  { %v1542_v63 = vadd.f32 %v1541_v52, %v1513_v0 }
 0x1de   :  { %v1571_v12 = vadd.f32 %v1570_v3, %v1542_v63  ;;  %v1488_v30 = vpop.f32.mrf.mxu0  ;;  %v1517_v53 = vpop.f32.mrf.mxu1 }
 0x1df   :  { %v1489_v4 = vadd.f32 %v1488_v30, %v9418_v47 }
 0x1e0   :  { %vm1716_vm6 = vcmp.gt.f32.partialorder %v1571_v12, 0.0  ;;  %v1748_v29 = vmul.f32 0.2, %v1571_v12 }
 0x1e1   :  { %v1518_v23 = vadd.f32 %v1517_v53, %v1489_v4  ;;  %v8370_v53 = vld [vmem:[#allocation5 + $0x1f4] sm:$0xf] }
 0x1e2   :  { %v1780_v24 = vsel %vm1716_vm6, %v1571_v12, %v1748_v29  ;;  %v6574_v2 = vor.u32 %v8370_v53, %v6571_v50 }
 0x1e3   :  { %v1544_v27 = vpop.f32.mrf.mxu2  ;;  %v1573_v48 = vpop.f32.mrf.mxu3  ;;  %v9487_v8 = vpack.c.bf16 %v1780_v24, %v1776_v55  ;;  %v6566_v55 = vor.u32 %v8368_v16, %v6563_v1 }
 0x1e4   :  { %v1545_v5 = vadd.f32 %v1544_v27, %v1516_v18  ;;  %2399 = vmatpush.bf16.msra.mxu3 %v6574_v2 }
 0x1e5   :  { %2272 = vmatmul.bf16.gmra.mxu2 %v9487_v8 }
 0x1e6   :  { %v1587_v33 = vpop.f32.mrf.mxu0  ;;  %v1616_v41 = vpop.f32.mrf.mxu1  ;;  %v1574_v39 = vadd.f32 %v1573_v48, %v1545_v5  ;;  %v8366_v5 = vld [vmem:[#allocation5 + $0x1d4] sm:$0xf] }
 0x1e8   :  { %v1752_v10 = vmul.f32 0.2, %v1574_v39  ;;  %vm1720_vm7 = vcmp.gt.f32.partialorder %v1574_v39, 0.0  ;;  %2400 = vmatpush.bf16.msra.mxu3 %v6566_v55 }
 0x1e9   :  { %2320 = vmatmul.bf16.vlgmr.msra.gmra.mxu0 %v9295_v22  ;;  %2349 = vmatmul.bf16.vlgmr.msra.gmra.mxu1 %v9410_v34  ;;  %v1588_v22 = vadd.f32 %v1587_v33, %v9496_v60 }
 0x1ea   :  { %v1784_v38 = vsel %vm1720_vm7, %v1574_v39, %v1752_v10 }
 0x1eb   :  { %v1546_v44 = vpop.f32.mrf.mxu2  ;;  %v1575_v46 = vpop.f32.mrf.mxu3  ;;  %v1617_v11 = vadd.f32 %v1616_v41, %v1588_v22 }
 0x1ec   :  { %v1547_v25 = vadd.f32 %v1546_v44, %v1518_v23 }
 0x1ee   :  { %v1576_v47 = vadd.f32 %v1575_v46, %v1547_v25  ;;  %v1589_v61 = vpop.f32.mrf.mxu0  ;;  %v1618_v20 = vpop.f32.mrf.mxu1  ;;  %v8364_v46 = vld [vmem:[#allocation5 + $0x1c4] sm:$0xf] }
 0x1ef   :  { %v1590_v21 = vadd.f32 %v1589_v61, %v9496_v60  ;;  %v6550_v25 = vor.u32 %v8364_v46, %v6547_v49 }
 0x1f0   :  { %vm1724_vm8 = vcmp.gt.f32.partialorder %v1576_v47, 0.0  ;;  %v1756_v34 = vmul.f32 0.2, %v1576_v47 }
 0x1f1   :  { %v1619_v0 = vadd.f32 %v1618_v20, %v1590_v21 }
 0x1f2   :  { %v1788_v32 = vsel %vm1724_vm8, %v1576_v47, %v1756_v34  ;;  %v8362_v34 = vld [vmem:[#allocation5 + $0x1b4] sm:$0xf] }
 0x1f3   :  { %v1645_v59 = vpop.f32.mrf.mxu2  ;;  %v1674_v43 = vpop.f32.mrf.mxu3  ;;  %v9499_v56 = vpack.c.bf16 %v1788_v32, %v1784_v38  ;;  %v6539_v38 = vld [vmem:[#allocation5 + $0x1b8] sm:$0xf0] }
 0x1f4   :  { %v1646_v42 = vadd.f32 %v1645_v59, %v1617_v11  ;;  %v6542_v59 = vor.u32 %v8362_v34, %v6539_v38 }
 0x1f5   :  { %2277 = vmatmul.bf16.gmra.mxu2 %v9499_v56 }
 0x1f6   :  { %v1592_v57 = vpop.f32.mrf.mxu0  ;;  %v1621_v6 = vpop.f32.mrf.mxu1  ;;  %v1675_v58 = vadd.f32 %v1674_v43, %v1646_v42  ;;  %v8360_v42 = vld [vmem:[#allocation5 + $0x1a4] sm:$0xf] }
 0x1f7   :  { %v1593_v14 = vadd.f32 %v1592_v57, %v9496_v60  ;;  %v6531_v57 = vld [vmem:[#allocation5 + $0x1a8] sm:$0xf0] }
 0x1f8   :  { %v1729_v45 = vmul.f32 0.2, %v1675_v58  ;;  %vm1697_vm9 = vcmp.gt.f32.partialorder %v1675_v58, 0.0 }
 0x1f9   :  { %2325 = vmatmul.bf16.gmra.mxu0 %v9304_v17  ;;  %2354 = vmatmul.bf16.gmra.mxu1 %v9438_v36  ;;  %v1622_v51 = vadd.f32 %v1621_v6, %v1593_v14 }
 0x1fa   :  { %v1761_v13 = vsel %vm1697_vm9, %v1675_v58, %v1729_v45  ;;  %v8358_v58 = vld [vmem:[#allocation5 + $0x194] sm:$0xf]  ;;  %vm2478_vm9 = vcmask 523264  }
 0x1fb   :  { %v1647_v52 = vpop.f32.mrf.mxu2  ;;  %v1676_v3 = vpop.f32.mrf.mxu3 }
 0x1fc   :  { %v1648_v26 = vadd.f32 %v1647_v52, %v1619_v0  ;;  %v6534_v0 = vor.u32 %v8360_v42, %v6531_v57  ;;  %v6523_v52 = vld [vmem:[#allocation5 + $0x198] sm:$0xf0] }
 0x1fd   :  { %v6526_v45 = vor.u32 %v8358_v58, %v6523_v52 }
 0x1fe   :  { %v1677_v35 = vadd.f32 %v1676_v3, %v1648_v26  ;;  %v1594_v63 = vpop.f32.mrf.mxu0  ;;  %v1623_v15 = vpop.f32.mrf.mxu1 }
 0x1ff   :  { %v1595_v37 = vadd.f32 %v1594_v63, %v9496_v60 }
 0x200   :  { %vm1701_vm10 = vcmp.gt.f32.partialorder %v1677_v35, 0.0  ;;  %v1733_v7 = vmul.f32 0.2, %v1677_v35 }
 0x201   :  { %v1624_v24 = vadd.f32 %v1623_v15, %v1595_v37 }
 0x202   :  { %v1765_v12 = vsel %vm1701_vm10, %v1677_v35, %v1733_v7 }
 0x203   :  { %v9506_v30 = vpack.c.bf16 %v1765_v12, %v1761_v13  ;;  %v1650_v17 = vpop.f32.mrf.mxu2  ;;  %v1679_v36 = vpop.f32.mrf.mxu3  ;;  %v8356_v13 = vld [vmem:[#allocation5 + $0x184] sm:$0xf]  ;;  %v6515_v12 = vld [vmem:[#allocation5 + $0x188] sm:$0xf0] }
 0x204   :  { %v1651_v29 = vadd.f32 %v1650_v17, %v1622_v51  ;;  %v6518_v17 = vor.u32 %v8356_v13, %v6515_v12 }
 0x205   :  { %2291 = vmatmul.bf16.vlgmr.msrb.gmra.mxu3 %v9506_v30  ;;  %2378 = vmatmul.bf16.vlgmr.msra.gmra.mxu2 %v9456_v40  ;;  %v6555_v40 = vld [vmem:[#allocation5 + $0x1d8] sm:$0xf0] }
 0x206   :  { %v1597_v54 = vpop.f32.mrf.mxu0  ;;  %v1680_v27 = vadd.f32 %v1679_v36, %v1651_v29  ;;  %v1626_v48 = vpop.f32.mrf.mxu1  ;;  %v6558_v41 = vor.u32 %v8366_v5, %v6555_v40 }
 0x208   :  { %v1737_v23 = vmul.f32 0.2, %v1680_v27  ;;  %2401 = vmatpush.bf16.msra.mxu3 %v6558_v41  ;;  %vm1705_vm11 = vcmp.gt.f32.partialorder %v1680_v27, 0.0 }
 0x209   :  { %2330 = vmatmul.bf16.gmra.mxu0 %v9312_v19  ;;  %2359 = vmatmul.bf16.gmra.mxu1 %v9466_v62  ;;  %v1598_v19 = vadd.f32 %v1597_v54, %v9496_v60 }
 0x20a   :  { %v1769_v10 = vsel %vm1705_vm11, %v1680_v27, %v1737_v23 }
 0x20b   :  { %v1652_v18 = vpop.f32.mrf.mxu2  ;;  %v1681_v4 = vpop.f32.mrf.mxu3  ;;  %v1627_v32 = vadd.f32 %v1626_v48, %v1598_v19 }
 0x20c   :  { %v1653_v33 = vadd.f32 %v1652_v18, %v1624_v24  ;;  %2402 = vmatpush.bf16.msra.mxu3 %v6550_v25 }
 0x20e   :  { %v1682_v39 = vadd.f32 %v1681_v4, %v1653_v33  ;;  %v1599_v44 = vpop.f32.mrf.mxu0  ;;  %v1628_v43 = vpop.f32.mrf.mxu1 }
 0x20f   :  { %v1600_v11 = vadd.f32 %v1599_v44, %v9496_v60 }
 0x210   :  { %vm1709_vm12 = vcmp.gt.f32.partialorder %v1682_v39, 0.0  ;;  %v1741_v62 = vmul.f32 0.2, %v1682_v39  ;;  %2403 = vmatpush.bf16.msra.mxu3 %v6542_v59 }
 0x211   :  { %v1629_v3 = vadd.f32 %v1628_v43, %v1600_v11 }
 0x212   :  { %v1773_v47 = vsel %vm1709_vm12, %v1682_v39, %v1741_v62 }
 0x213   :  { %v1655_v61 = vpop.f32.mrf.mxu2  ;;  %v1684_v20 = vpop.f32.mrf.mxu3  ;;  %v9514_v22 = vpack.c.bf16 %v1773_v47, %v1769_v10 }
 0x214   :  { %v1656_v21 = vadd.f32 %v1655_v61, %v1627_v32  ;;  %2404 = vmatpush.bf16.msra.mxu3 %v6534_v0 }
 0x215   :  { %2296 = vmatmul.bf16.gmra.mxu3 %v9514_v22  ;;  %2383 = vmatmul.bf16.gmra.mxu2 %v9476_v28 }
 0x216   :  { %v1602_v6 = vpop.f32.mrf.mxu0  ;;  %v1685_v26 = vadd.f32 %v1684_v20, %v1656_v21  ;;  %v1631_v15 = vpop.f32.mrf.mxu1 }
 0x218   :  { %v1745_v14 = vmul.f32 0.2, %v1685_v26  ;;  %2405 = vmatpush.bf16.msra.mxu3 %v6526_v45  ;;  %vm1713_vm13 = vcmp.gt.f32.partialorder %v1685_v26, 0.0  ;;  %v9544_v45 = vld [vmem:[%s9851_s6] sm:$0x3] }
 0x219   :  { %2335 = vmatmul.bf16.gmra.mxu0 %v9330_v31  ;;  %2364 = vmatmul.bf16.gmra.mxu1 %v9481_v9  ;;  %v1603_v31 = vadd.f32 %v1602_v6, %v9496_v60 }
 0x21a   :  { %v1777_v53 = vsel %vm1713_vm13, %v1685_v26, %v1745_v14 }
 0x21b   :  { %v1657_v35 = vpop.f32.mrf.mxu2  ;;  %v1686_v28 = vpop.f32.mrf.mxu3  ;;  %v1632_v29 = vadd.f32 %v1631_v15, %v1603_v31 }
 0x21c   :  { %v1658_v63 = vadd.f32 %v1657_v35, %v1629_v3  ;;  %2406 = vmatpush.bf16.msra.mxu3 %v6518_v17  ;;  %v1872_v35 = vperm.slane %v9544_v45, 0 }
 0x21e   :  { %v1687_v7 = vadd.f32 %v1686_v28, %v1658_v63  ;;  %v1604_v36 = vpop.f32.mrf.mxu0  ;;  %v1633_v1 = vpop.f32.mrf.mxu1 }
 0x21f   :  { %v1605_v54 = vadd.f32 %v1604_v36, %v9496_v60 }
 0x220   :  { %vm1717_vm14 = vcmp.gt.f32.partialorder %v1687_v7, 0.0  ;;  %v1749_v9 = vmul.f32 0.2, %v1687_v7 }
 0x221   :  { %v1634_v55 = vadd.f32 %v1633_v1, %v1605_v54 }
 0x222   :  { %v1781_v50 = vsel %vm1717_vm14, %v1687_v7, %v1749_v9 }
 0x223   :  { %v1660_v51 = vpop.f32.mrf.mxu2  ;;  %v1689_v2 = vpop.f32.mrf.mxu3  ;;  %v1801_v37 = vpack.c.bf16 %v1781_v50, %v1777_v53 }
 0x224   :  { %v1661_v16 = vadd.f32 %v1660_v51, %v1632_v29 }
 0x225   :  { %2301 = vmatmul.bf16.gmra.mxu3 %v1801_v37  ;;  %2388 = vmatmul.bf16.gmra.mxu2 %v9487_v8 }
 0x226   :  { %v1690_v24 = vadd.f32 %v1689_v2, %v1661_v16  ;;  %v2205_v8 = vpop.f32.mrf.mxu0  ;;  %v9527_v60 = vpop.f32.mrf.mxu1 }
 0x228   :  { %v1753_v4 = vmul.f32 0.2, %v1690_v24  ;;  %vm1721_vm15 = vcmp.gt.f32.partialorder %v1690_v24, 0.0 }
 0x22a   :  { %v1785_v33 = vsel %vm1721_vm15, %v1690_v24, %v1753_v4 }
 0x22b   :  { %v1662_v27 = vpop.f32.mrf.mxu2  ;;  %v1691_v18 = vpop.f32.mrf.mxu3 }
 0x22c   :  { %v1663_v48 = vadd.f32 %v1662_v27, %v1634_v55 }
 0x22e   :  { %v1692_v5 = vadd.f32 %v1691_v18, %v1663_v48  ;;  %v2207_v44 = vpop.f32.mrf.mxu0  ;;  %v9531_v46 = vpop.f32.mrf.mxu1 }
 0x22f   :  { %v2208_v1 = vadd.f32 %v2207_v44, %v1872_v35 }
 0x230   :  { %vm1725_vm0 = vcmp.gt.f32.partialorder %v1692_v5, 0.0  ;;  %v1757_v40 = vmul.f32 0.2, %v1692_v5 }
 0x232   :  { %v1789_v41 = vsel %vm1725_vm0, %v1692_v5, %v1757_v40  ;;  %v2206_v5 = vadd.f32 %v2205_v8, %v1872_v35 }
 0x233   :  { %v1805_v23 = vpack.c.bf16 %v1789_v41, %v1785_v33 }
 0x235   :  { %2306 = vmatmul.bf16.gmra.mxu3 %v1805_v23  ;;  %2393 = vmatmul.bf16.gmra.mxu2 %v9499_v56 }
 0x236   :  { %v2210_v19 = vpop.f32.mrf.mxu0  ;;  %v2239_v62 = vpop.f32.mrf.mxu1 }
 0x237   :  { %v2211_v51 = vadd.f32 %v2210_v19, %v1872_v35 }
 0x239   :  { %v2240_v40 = vadd.f32 %v2239_v62, %v2211_v51 }
 0x23e   :  { %v2212_v56 = vpop.f32.mrf.mxu0  ;;  %v2241_v10 = vpop.f32.mrf.mxu1 }
 0x23f   :  { %v2213_v17 = vadd.f32 %v2212_v56, %v1872_v35  ;;  %v2237_v56 = vadd.f32 %v9531_v46, %v2208_v1  ;;  %v1873_v1 = vperm.slane %v9544_v45, 1 }
 0x241   :  { %v2242_v55 = vadd.f32 %v2241_v10, %v2213_v17 }
 0x245   :  { %2407 = vmatmul.bf16.vlgmr.msra.gmra.mxu3 %v9506_v30 }
 0x246   :  { %v2215_v47 = vpop.f32.mrf.mxu0  ;;  %v2244_v20 = vpop.f32.mrf.mxu1 }
 0x247   :  { %v2216_v31 = vadd.f32 %v2215_v47, %v1872_v35 }
 0x248   :  { %v9529_v39 = vpop.f32.mrf.mxu2 }
 0x249   :  { %v2245_v2 = vadd.f32 %v2244_v20, %v2216_v31 }
 0x24e   :  { %v2217_v38 = vpop.f32.mrf.mxu0  ;;  %v2246_v32 = vpop.f32.mrf.mxu1 }
 0x24f   :  { %v2218_v15 = vadd.f32 %v2217_v38, %v1872_v35 }
 0x250   :  { %v9533_v49 = vpop.f32.mrf.mxu2 }
 0x251   :  { %v2247_v36 = vadd.f32 %v2246_v32, %v2218_v15  ;;  %v2266_v8 = vadd.f32 %v9533_v49, %v2237_v56 }
 0x255   :  { %2412 = vmatmul.bf16.gmra.mxu3 %v9514_v22 }
 0x256   :  { %v2220_v11 = vpop.f32.mrf.mxu0  ;;  %v2249_v42 = vpop.f32.mrf.mxu1 }
 0x257   :  { %v2221_v14 = vadd.f32 %v2220_v11, %v1872_v35 }
 0x258   :  { %v2268_v25 = vpop.f32.mrf.mxu2 }
 0x259   :  { %v2250_v9 = vadd.f32 %v2249_v42, %v2221_v14  ;;  %v2269_v44 = vadd.f32 %v2268_v25, %v2240_v40 }
 0x25e   :  { %v2222_v6 = vpop.f32.mrf.mxu0  ;;  %v2251_v58 = vpop.f32.mrf.mxu1 }
 0x25f   :  { %v2223_v13 = vadd.f32 %v2222_v6, %v1872_v35 }
 0x260   :  { %v2270_v30 = vpop.f32.mrf.mxu2 }
 0x261   :  { %v2252_v53 = vadd.f32 %v2251_v58, %v2223_v13  ;;  %v2271_v33 = vadd.f32 %v2270_v30, %v2242_v55  ;;  %v6803_v55 = vld [vmem:[#allocation7 + $0x1c0] sm:$0xf] }
 0x265   :  { %2417 = vmatmul.bf16.gmra.mxu3 %v1801_v37 }
 0x266   :  { %v9539_v3 = vpop.f32.mrf.mxu0  ;;  %v9547_v28 = vpop.f32.mrf.mxu1 }
 0x268   :  { %v2273_v22 = vpop.f32.mrf.mxu2 }
 0x269   :  { %v2274_v48 = vadd.f32 %v2273_v22, %v2245_v2  ;;  %v2235_v22 = vadd.f32 %v9527_v60, %v2206_v5  ;;  %v8424_v5 = vld [vmem:[#allocation7 + $0x19c] sm:$0xf0] }
 0x26b   :  { %v2264_v25 = vadd.f32 %v9529_v39, %v2235_v22 }
 0x26e   :  { %v9551_v12 = vpop.f32.mrf.mxu0  ;;  %v9553_v37 = vpop.f32.mrf.mxu1 }
 0x270   :  { %v2275_v59 = vpop.f32.mrf.mxu2 }
 0x271   :  { %v2276_v29 = vadd.f32 %v2275_v59, %v2247_v36 }
 0x275   :  { %2422 = vmatmul.bf16.gmra.mxu3 %v1805_v23 }
 0x276   :  { %v9558_v47 = vpop.f32.mrf.mxu0  ;;  %v9571_v59 = vpop.f32.mrf.mxu1 }
 0x278   :  { %v2278_v57 = vpop.f32.mrf.mxu2 }
 0x279   :  { %v2279_v50 = vadd.f32 %v2278_v57, %v2250_v9 }
 0x27e   :  { %v2357_v35 = vpop.f32.mrf.mxu1 }
 0x280   :  { %v2280_v52 = vpop.f32.mrf.mxu2 }
 0x281   :  { %v2281_v54 = vadd.f32 %v2280_v52, %v2252_v53 }
 0x286   :  { %v2360_v31 = vpop.f32.mrf.mxu1 }
 0x288   :  { %v9535_v61 = vpop.f32.mrf.mxu3  ;;  %v9549_v63 = vpop.f32.mrf.mxu2 }
 0x289   :  { %v2293_v49 = vadd.f32 %v9535_v61, %v2264_v25 }
 0x28b   :  { %v2444_v58 = vmul.f32 0.2, %v2293_v49  ;;  %vm2428_vm8 = vcmp.gt.f32.partialorder %v2293_v49, 0.0 }
 0x28d   :  { %v9599_v14 = vsel %vm2428_vm8, %v2293_v49, %v2444_v58 }
 0x28e   :  { %v2362_v53 = vpop.f32.mrf.mxu1 }
 0x290   :  { %v9537_v34 = vpop.f32.mrf.mxu3  ;;  %v9555_v24 = vpop.f32.mrf.mxu2 }
 0x291   :  { %v2295_v60 = vadd.f32 %v9537_v34, %v2266_v8  ;;  %v2328_v34 = vpop.f32.mrf.mxu0  ;;  %v8420_v8 = vld [vmem:[#allocation7 + $0x184] sm:$0xf] }
 0x292   :  { %v2329_v25 = vadd.f32 %v2328_v34, %v1873_v1 }
 0x293   :  { %v2446_v39 = vmul.f32 0.2, %v2295_v60  ;;  %vm2430_vm7 = vcmp.gt.f32.partialorder %v2295_v60, 0.0 }
 0x295   :  { %v9591_v61 = vsel %vm2430_vm7, %v2295_v60, %v2446_v39 }
 0x298   :  { %v2297_v43 = vpop.f32.mrf.mxu3  ;;  %v9576_v42 = vpop.f32.mrf.mxu2 }
 0x299   :  { %v2298_v62 = vadd.f32 %v2297_v43, %v2269_v44  ;;  %v2331_v15 = vpop.f32.mrf.mxu0  ;;  %v8416_v44 = vld [vmem:[#allocation7 + $0x15c] sm:$0xf0] }
 0x29a   :  { %v2332_v45 = vadd.f32 %v2331_v15, %v1873_v1 }
 0x29b   :  { %v2448_v57 = vmul.f32 0.2, %v2298_v62  ;;  %vm2432_vm6 = vcmp.gt.f32.partialorder %v2298_v62, 0.0 }
 0x29c   :  { %v2361_v15 = vadd.f32 %v2360_v31, %v2332_v45  ;;  %v8404_v31 = vld [vmem:[#allocation7 + $0x104] sm:$0xf] }
 0x2a0   :  { %v2299_v21 = vpop.f32.mrf.mxu3 }
 0x2a1   :  { %v2300_v10 = vadd.f32 %v2299_v21, %v2271_v33  ;;  %v2333_v36 = vpop.f32.mrf.mxu0 }
 0x2a3   :  { %v2450_v11 = vmul.f32 0.2, %v2300_v10  ;;  %vm2434_vm5 = vcmp.gt.f32.partialorder %v2300_v10, 0.0 }
 0x2a5   :  { %v9583_v6 = vsel %vm2434_vm5, %v2300_v10, %v2450_v11  ;;  %v8428_v10 = vld [vmem:[#allocation7 + $0x1c4] sm:$0xf] }
 0x2a8   :  { %v2302_v0 = vpop.f32.mrf.mxu3 }
 0x2a9   :  { %v2303_v41 = vadd.f32 %v2302_v0, %v2274_v48  ;;  %v9586_v0 = vsel %vm2432_vm6, %v2298_v62, %v2448_v57  ;;  %v2336_v2 = vpop.f32.mrf.mxu0  ;;  %v6771_v48 = vld [vmem:[#allocation7 + $0x180] sm:$0xf]  ;;  %v6773_v62 = vld [vmem:[#allocation7 + $0x1a0] sm:$0xf0] }
 0x2aa   :  { %v2337_v40 = vadd.f32 %v2336_v2, %v1873_v1  ;;  %v6707_v57 = vld [vmem:[#allocation7 + $0x100] sm:$0xf]  ;;  %v6776_v39 = vor.u32 %v8420_v8, %v6773_v62 }
 0x2ab   :  { %v2452_v32 = vmul.f32 0.2, %v2303_v41  ;;  %vm2436_vm4 = vcmp.gt.f32.partialorder %v2303_v41, 0.0  ;;  %v8392_v62 = vld [vmem:[#allocation7 + $0x9c] sm:$0xf0] }
 0x2ad   :  { %v9580_v43 = vsel %vm2436_vm4, %v2303_v41, %v2452_v32  ;;  %v6772_v41 = vor.u32 %v8424_v5, %v6771_v48  ;;  %v6741_v48 = vld [vmem:[#allocation7 + $0x160] sm:$0xf0] }
 0x2b0   :  { %v2304_v26 = vpop.f32.mrf.mxu3 }
 0x2b1   :  { %v2305_v18 = vadd.f32 %v2304_v26, %v2276_v29  ;;  %v9597_v26 = vld [vmem:[%s9852_s7] sm:$0xff] }
 0x2b3   :  { %v2454_v20 = vmul.f32 0.2, %v2305_v18  ;;  %vm2438_vm3 = vcmp.gt.f32.partialorder %v2305_v18, 0.0 }
 0x2b5   :  { %v9574_v21 = vsel %vm2438_vm3, %v2305_v18, %v2454_v20  ;;  %v2338_v18 = vpop.f32.mrf.mxu0  ;;  %v6805_v20 = vld [vmem:[#allocation7 + $0x1e0] sm:$0xf0] }
 0x2b6   :  { %v2339_v56 = vadd.f32 %v2338_v18, %v1873_v1  ;;  %v6808_v22 = vor.u32 %v8428_v10, %v6805_v20  ;;  %v2324_v18 = vadd.f32 %v9551_v12, %v1873_v1  ;;  %v8400_v10 = vld [vmem:[#allocation7 + $0xdc] sm:$0xf0]  ;;  %v2322_v20 = vadd.f32 %v9539_v3, %v1873_v1 }
 0x2b8   :  { %v2307_v7 = vpop.f32.mrf.mxu3  ;;  %v2353_v8 = vadd.f32 %v9553_v37, %v2324_v18  ;;  %v8396_v37 = vld [vmem:[#allocation7 + $0xc4] sm:$0xf] }
 0x2b9   :  { %v2308_v16 = vadd.f32 %v2307_v7, %v2279_v50  ;;  %v9601_v7 = vpop.f32.mrf.mxu2 }
 0x2bb   :  { %v2456_v19 = vmul.f32 0.2, %v2308_v16  ;;  %vm2440_vm2 = vcmp.gt.f32.partialorder %v2308_v16, 0.0 }
 0x2bd   :  { %v9565_v30 = vsel %vm2440_vm2, %v2308_v16, %v2456_v19  ;;  %v2334_v19 = vadd.f32 %v2333_v36, %v1873_v1 }
 0x2bf   :  { %v2363_v58 = vadd.f32 %v2362_v53, %v2334_v19 }
 0x2c0   :  { %v2309_v27 = vpop.f32.mrf.mxu3 }
 0x2c1   :  { %v2310_v4 = vadd.f32 %v2309_v27, %v2281_v54  ;;  %v2389_v9 = vpop.f32.mrf.mxu2  ;;  %v2365_v54 = vpop.f32.mrf.mxu1  ;;  %v8432_v27 = vld [vmem:[#allocation7 + $0x1dc] sm:$0xf0] }
 0x2c2   :  { %v2366_v32 = vadd.f32 %v2365_v54, %v2337_v40  ;;  %v2358_v40 = vadd.f32 %v2357_v35, %v2329_v25  ;;  %v2390_v53 = vadd.f32 %v2389_v9, %v2361_v15  ;;  %v8376_v15 = vld [vmem:[#allocation7 + $0x1c] sm:$0xf0] }
 0x2c3   :  { %vm2442_vm1 = vcmp.gt.f32.partialorder %v2310_v4, 0.0  ;;  %v2458_v23 = vmul.f32 0.2, %v2310_v4 }
 0x2c5   :  { %v9560_v38 = vsel %vm2442_vm1, %v2310_v4, %v2458_v23  ;;  %v6804_v4 = vor.u32 %v8432_v27, %v6803_v55  ;;  %v6739_v23 = vld [vmem:[#allocation7 + $0x140] sm:$0xf]  ;;  %v8412_v27 = vld [vmem:[#allocation7 + $0x144] sm:$0xf] }
 0x2c6   :  { %2490 = vmatpush.msrb.mxu0 %v9560_v38  ;;  %v6740_v49 = vor.u32 %v8416_v44, %v6739_v23  ;;  %v8408_v55 = vld [vmem:[#allocation7 + $0x11c] sm:$0xf0]  ;;  %v6744_v44 = vor.u32 %v8412_v27, %v6741_v48 }
 0x2c7   :  { %3292 = vmatpush.bf16.msrb.mxu2 %v6804_v4  ;;  %v2327_v4 = vadd.f32 %v9558_v47, %v1873_v1  ;;  %v6708_v23 = vor.u32 %v8408_v55, %v6707_v57  ;;  %v2387_v47 = vadd.f32 %v9601_v7, %v2358_v40  ;;  %v6643_v7 = vld [vmem:[#allocation7 + $0x80] sm:$0xf] }
 0x2c8   :  { %v9567_v46 = vpop.f32.mrf.mxu3  ;;  %2491 = vmatpush.msrb.mxu0 %v9565_v30 }
 0x2c9   :  { %v2391_v50 = vpop.f32.mrf.mxu2  ;;  %v2367_v60 = vpop.f32.mrf.mxu1  ;;  %v2356_v12 = vadd.f32 %v9571_v59, %v2327_v4  ;;  %v6579_v4 = vld [vmem:[#allocation7] sm:$0xf] }
 0x2ca   :  { %2492 = vmatpush.msrb.mxu0 %v9574_v21  ;;  %v2368_v2 = vadd.f32 %v2367_v60, %v2339_v56  ;;  %v2392_v54 = vadd.f32 %v2391_v50, %v2363_v58  ;;  %v6675_v56 = vld [vmem:[#allocation7 + $0xc0] sm:$0xf]  ;;  %v6709_v50 = vld [vmem:[#allocation7 + $0x120] sm:$0xf0] }
 0x2cb   :  { %3293 = vmatpush.bf16.msrb.mxu2 %v6772_v41  ;;  %v2385_v9 = vadd.f32 %v9576_v42, %v2356_v12  ;;  %v6712_v45 = vor.u32 %v8404_v31, %v6709_v50  ;;  %v2382_v42 = vadd.f32 %v9555_v24, %v2353_v8  ;;  %v6611_v58 = vld [vmem:[#allocation7 + $0x40] sm:$0xf]  ;;  %v8372_v12 = vld [vmem:[#allocation7 + $0x4] sm:$0xf]  ;;  %v8429_v31 = vld [vmem:[#allocation7 + $0x1cc] sm:$0xf] }
 0x2cc   :  { %2493 = vmatpush.msrb.mxu0 %v9580_v43  ;;  %v8384_v24 = vld [vmem:[#allocation7 + $0x5c] sm:$0xf0]  ;;  %v6813_v50 = vld [vmem:[#allocation7 + $0x1e8] sm:$0xf0] }
 0x2ce   :  { %2494 = vmatpush.msrb.mxu0 %v9583_v6 }
 0x2cf   :  { %3294 = vmatpush.bf16.msrb.mxu2 %v6740_v49 }
 0x2d0   :  { %v9588_v52 = vpop.f32.mrf.mxu3  ;;  %2495 = vmatpush.msrb.mxu0 %v9586_v0 }
 0x2d1   :  { %v2394_v16 = vpop.f32.mrf.mxu2  ;;  %v2411_v49 = vadd.f32 %v9588_v52, %v2382_v42  ;;  %v6612_v52 = vor.u32 %v8384_v24, %v6611_v58  ;;  %v8401_v42 = vld [vmem:[#allocation7 + $0xe4] sm:$0xf0] }
 0x2d2   :  { %2496 = vmatpush.msrb.mxu0 %v9591_v61  ;;  %v2395_v36 = vadd.f32 %v2394_v16, %v2366_v32  ;;  %v6677_v32 = vld [vmem:[#allocation7 + $0xe0] sm:$0xf0] }
 0x2d3   :  { %3295 = vmatpush.bf16.msrb.mxu2 %v6708_v23  ;;  %v2447_v48 = vmul.f32 0.2, %v2411_v49  ;;  %vm2431_vm0 = vcmp.gt.f32.partialorder %v2411_v49, 0.0  ;;  %v6613_v23 = vld [vmem:[#allocation7 + $0x60] sm:$0xf0] }
 0x2d4   :  { %2497 = vmatpush.msrb.mxu0 %v9599_v14 }
 0x2d5   :  { %6575 = vmatmul.msk.f32.vlgmr.msrb.gmra.mxu0 %vm2478_vm9, %v9597_v26 }
 0x2d6   :  { %3318 = vmatpush.bf16.msra.mxu0 %v6808_v22 }
 0x2d8   :  { %v9606_v13 = vpop.f32.mrf.mxu3 }
 0x2d9   :  { %v2396_v11 = vpop.f32.mrf.mxu2  ;;  %v2414_v25 = vadd.f32 %v9606_v13, %v2385_v9  ;;  %v6680_v13 = vor.u32 %v8396_v37, %v6677_v32  ;;  %v6816_v9 = vor.u32 %v8429_v31, %v6813_v50  ;;  %v8413_v37 = vld [vmem:[#allocation7 + $0x14c] sm:$0xf]  ;;  %v6683_v32 = vld [vmem:[#allocation7 + $0xc8] sm:$0xf]  ;;  %v7061_v31 = vld [vmem:[#allocation7 + $0x3e0] sm:$0xf0] }
 0x2da   :  { %v2397_v34 = vadd.f32 %v2396_v11, %v2368_v2  ;;  %3319 = vmatpush.bf16.msra.mxu0 %v6776_v39  ;;  %v8388_v2 = vld [vmem:[#allocation7 + $0x84] sm:$0xf] }
 0x2db   :  { %v2449_v27 = vmul.f32 0.2, %v2414_v25  ;;  %vm2433_vm15 = vcmp.gt.f32.partialorder %v2414_v25, 0.0 }
 0x2de   :  { %3320 = vmatpush.bf16.msra.mxu0 %v6744_v44  ;;  %v6580_v44 = vor.u32 %v8376_v15, %v6579_v4  ;;  %v6653_v4 = vld [vmem:[#allocation7 + $0xa8] sm:$0xf0] }
 0x2e0   :  { %v9608_v17 = vpop.f32.mrf.mxu3 }
 0x2e1   :  { %v2416_v3 = vadd.f32 %v9608_v17, %v2387_v47  ;;  %v6581_v47 = vld [vmem:[#allocation7 + $0x20] sm:$0xf0] }
 0x2e2   :  { %3321 = vmatpush.bf16.msra.mxu0 %v6712_v45  ;;  %v6584_v8 = vor.u32 %v8372_v12, %v6581_v47  ;;  %v8492_v12 = vld [vmem:[#allocation7 + $0x3c4] sm:$0xf] }
 0x2e3   :  { %v2451_v57 = vmul.f32 0.2, %v2416_v3  ;;  %vm2435_vm14 = vcmp.gt.f32.partialorder %v2416_v3, 0.0  ;;  %v7064_v50 = vor.u32 %v8492_v12, %v7061_v31  ;;  %v8426_v12 = vld [vmem:[#allocation7 + $0x1ac] sm:$0xf0] }
 0x2e4   :  { %v6789_v31 = vld [vmem:[#allocation7 + $0x1b0] sm:$0xf0] }
 0x2e5   :  { %v9641_v18 = vsel %vm2435_vm14, %v2416_v3, %v2451_v57  ;;  %v6781_v3 = vld [vmem:[#allocation7 + $0x1a8] sm:$0xf0] }
 0x2e6   :  { %3322 = vmatpush.bf16.msra.mxu0 %v6680_v13  ;;  %v6717_v57 = vld [vmem:[#allocation7 + $0x128] sm:$0xf0]  ;;  %v6619_v13 = vld [vmem:[#allocation7 + $0x48] sm:$0xf] }
 0x2e8   :  { %v9610_v51 = vpop.f32.mrf.mxu3 }
 0x2e9   :  { %v2419_v35 = vadd.f32 %v9610_v51, %v2390_v53  ;;  %v2351_v51 = vadd.f32 %v9547_v28, %v2322_v20  ;;  %v6644_v28 = vor.u32 %v8392_v62, %v6643_v7  ;;  %v9647_v53 = vsel %vm2431_vm0, %v2411_v49, %v2447_v48  ;;  %v6715_v7 = vld [vmem:[#allocation7 + $0x108] sm:$0xf]  ;;  %v8405_v49 = vld [vmem:[#allocation7 + $0x10c] sm:$0xf] }
 0x2ea   :  { %v8409_v62 = vld [vmem:[#allocation7 + $0x124] sm:$0xf0]  ;;  %v6720_v58 = vor.u32 %v8405_v49, %v6717_v57  ;;  %v8389_v48 = vld [vmem:[#allocation7 + $0x8c] sm:$0xf]  ;;  %v8460_v49 = vld [vmem:[#allocation7 + $0x2c4] sm:$0xf] }
 0x2eb   :  { %v2453_v17 = vmul.f32 0.2, %v2419_v35  ;;  %v2380_v11 = vadd.f32 %v9549_v63, %v2351_v51  ;;  %vm2437_vm13 = vcmp.gt.f32.partialorder %v2419_v35, 0.0  ;;  %v6716_v51 = vor.u32 %v8409_v62, %v6715_v7  ;;  %v8476_v7 = vld [vmem:[#allocation7 + $0x344] sm:$0xf] }
 0x2ec   :  { %v6656_v15 = vor.u32 %v8389_v48, %v6653_v4  ;;  %v8434_v48 = vld [vmem:[#allocation7 + $0x1ec] sm:$0xf0]  ;;  %v8430_v4 = vld [vmem:[#allocation7 + $0x1d4] sm:$0xf] }
 0x2ed   :  { %v2409_v63 = vadd.f32 %v9567_v46, %v2380_v11  ;;  %v9638_v55 = vsel %vm2437_vm13, %v2419_v35, %v2453_v17  ;;  %v8433_v46 = vld [vmem:[#allocation7 + $0x1e4] sm:$0xf0]  ;;  %v6684_v17 = vor.u32 %v8401_v42, %v6683_v32  ;;  %v8468_v32 = vld [vmem:[#allocation7 + $0x304] sm:$0xf] }
 0x2ee   :  { %v6651_v11 = vld [vmem:[#allocation7 + $0x88] sm:$0xf] }
 0x2ef   :  { %v2445_v40 = vmul.f32 0.2, %v2409_v63  ;;  %vm2429_vm1 = vcmp.gt.f32.partialorder %v2409_v63, 0.0 }
 0x2f0   :  { %v2420_v29 = vpop.f32.mrf.mxu3 }
 0x2f1   :  { %v2421_v19 = vadd.f32 %v2420_v29, %v2392_v54  ;;  %v6676_v29 = vor.u32 %v8400_v10, %v6675_v56  ;;  %v8425_v56 = vld [vmem:[#allocation7 + $0x1a4] sm:$0xf0]  ;;  %v9650_v20 = vsel %vm2429_vm1, %v2409_v63, %v2445_v40  ;;  %v6685_v63 = vld [vmem:[#allocation7 + $0xe8] sm:$0xf0] }
 0x2f2   :  { %v6587_v40 = vld [vmem:[#allocation7 + $0x8] sm:$0xf] }
 0x2f3   :  { %v2455_v59 = vmul.f32 0.2, %v2421_v19  ;;  %vm2439_vm12 = vcmp.gt.f32.partialorder %v2421_v19, 0.0  ;;  %3296 = vmatpush.bf16.msrb.mxu2 %v6676_v29  ;;  %v8421_v29 = vld [vmem:[#allocation7 + $0x18c] sm:$0xf] }
 0x2f4   :  { %v6784_v45 = vor.u32 %v8421_v29, %v6781_v3  ;;  %v6995_v3 = vld [vmem:[#allocation7 + $0x340] sm:$0xf] }
 0x2f5   :  { %v9634_v39 = vsel %vm2439_vm12, %v2421_v19, %v2455_v59 }
 0x2f7   :  { %3297 = vmatpush.bf16.msrb.mxu2 %v6644_v28  ;;  %v8393_v28 = vld [vmem:[#allocation7 + $0xa4] sm:$0xf0] }
 0x2f8   :  { %v2423_v33 = vpop.f32.mrf.mxu3  ;;  %v6652_v24 = vor.u32 %v8393_v28, %v6651_v11  ;;  %v6931_v11 = vld [vmem:[#allocation7 + $0x2c0] sm:$0xf] }
 0x2f9   :  { %v2424_v5 = vadd.f32 %v2423_v33, %v2395_v36  ;;  %v6645_v36 = vld [vmem:[#allocation7 + $0xa0] sm:$0xf0]  ;;  %v8464_v28 = vld [vmem:[#allocation7 + $0x2dc] sm:$0xf0] }
 0x2fa   :  { %v6648_v54 = vor.u32 %v8388_v2, %v6645_v36  ;;  %v8385_v2 = vld [vmem:[#allocation7 + $0x64] sm:$0xf0]  ;;  %v8397_v36 = vld [vmem:[#allocation7 + $0xcc] sm:$0xf]  ;;  %v6932_v57 = vor.u32 %v8464_v28, %v6931_v11  ;;  %v6723_v11 = vld [vmem:[#allocation7 + $0x110] sm:$0xf] }
 0x2fb   :  { %v2457_v22 = vmul.f32 0.2, %v2424_v5  ;;  %vm2441_vm11 = vcmp.gt.f32.partialorder %v2424_v5, 0.0  ;;  %3298 = vmatpush.bf16.msrb.mxu2 %v6612_v52  ;;  %v6620_v52 = vor.u32 %v8385_v2, %v6619_v13  ;;  %v6899_v13 = vld [vmem:[#allocation7 + $0x280] sm:$0xf] }
 0x2fc   :  { %3323 = vmatpush.bf16.msra.mxu0 %v6648_v54  ;;  %v8381_v54 = vld [vmem:[#allocation7 + $0x4c] sm:$0xf]  ;;  %v8456_v2 = vld [vmem:[#allocation7 + $0x29c] sm:$0xf0]  ;;  %v8410_v28 = vld [vmem:[#allocation7 + $0x12c] sm:$0xf0] }
 0x2fd   :  { %v9629_v60 = vsel %vm2441_vm11, %v2424_v5, %v2457_v22  ;;  %v9644_v5 = vsel %vm2433_vm15, %v2414_v25, %v2449_v27  ;;  %v8417_v22 = vld [vmem:[#allocation7 + $0x164] sm:$0xf0]  ;;  %v6688_v27 = vor.u32 %v8397_v36, %v6685_v63  ;;  %v8452_v36 = vld [vmem:[#allocation7 + $0x284] sm:$0xf]  ;;  %v6819_v63 = vld [vmem:[#allocation7 + $0x1d0] sm:$0xf] }
 0x2ff   :  { %3299 = vmatpush.bf16.msrb.mxu2 %v6580_v44  ;;  %v8373_v44 = vld [vmem:[#allocation7 + $0xc] sm:$0xf] }
 0x300   :  { %v2425_v41 = vpop.f32.mrf.mxu3 }
 0x301   :  { %v2426_v16 = vadd.f32 %v2425_v41, %v2397_v34  ;;  %v6811_v34 = vld [vmem:[#allocation7 + $0x1c8] sm:$0xf]  ;;  %v8380_v41 = vld [vmem:[#allocation7 + $0x44] sm:$0xf] }
 0x302   :  { %v6812_v19 = vor.u32 %v8433_v46, %v6811_v34  ;;  %v6616_v10 = vor.u32 %v8380_v41, %v6613_v23  ;;  %v6621_v34 = vld [vmem:[#allocation7 + $0x68] sm:$0xf0]  ;;  %v8377_v41 = vld [vmem:[#allocation7 + $0x24] sm:$0xf0] }
 0x303   :  { %vm2443_vm10 = vcmp.gt.f32.partialorder %v2426_v16, 0.0  ;;  %v2459_v33 = vmul.f32 0.2, %v2426_v16  ;;  %v6624_v46 = vor.u32 %v8381_v54, %v6621_v34  ;;  %v6588_v23 = vor.u32 %v8377_v41, %v6587_v40  ;;  %v6867_v34 = vld [vmem:[#allocation7 + $0x240] sm:$0xf] }
 0x304   :  { %3344 = vmatpush.bf16.msra.mxu2 %v6812_v19  ;;  %3324 = vmatpush.bf16.msra.mxu0 %v6616_v10  ;;  %v6589_v19 = vld [vmem:[#allocation7 + $0x28] sm:$0xf0]  ;;  %v8496_v10 = vld [vmem:[#allocation7 + $0x3dc] sm:$0xf0]  ;;  %v8444_v40 = vld [vmem:[#allocation7 + $0x244] sm:$0xf] }
 0x305   :  { %v9622_v1 = vsel %vm2443_vm10, %v2426_v16, %v2459_v33  ;;  %v6779_v16 = vld [vmem:[#allocation7 + $0x188] sm:$0xf] }
 0x306   :  { %2510 = vmatpush.msrb.mxu1 %v9622_v1  ;;  %v6780_v35 = vor.u32 %v8425_v56, %v6779_v16  ;;  %v6747_v33 = vld [vmem:[#allocation7 + $0x148] sm:$0xf]  ;;  %v6592_v16 = vor.u32 %v8373_v44, %v6589_v19  ;;  %v7059_v56 = vld [vmem:[#allocation7 + $0x3c0] sm:$0xf]  ;;  %v6787_v44 = vld [vmem:[#allocation7 + $0x190] sm:$0xf] }
 0x307   :  { %v6748_v59 = vor.u32 %v8417_v22, %v6747_v33  ;;  %v7060_v47 = vor.u32 %v8496_v10, %v7059_v56  ;;  %v8488_v33 = vld [vmem:[#allocation7 + $0x39c] sm:$0xf0]  ;;  %v8484_v22 = vld [vmem:[#allocation7 + $0x384] sm:$0xf] }
 0x308   :  { %2511 = vmatpush.msrb.mxu1 %v9629_v60  ;;  %3345 = vmatpush.bf16.msra.mxu2 %v6780_v35  ;;  %v7027_v35 = vld [vmem:[#allocation7 + $0x380] sm:$0xf]  ;;  %v6869_v56 = vld [vmem:[#allocation7 + $0x260] sm:$0xf0] }
 0x309   :  { %3325 = vmatpush.bf16.msra.mxu0 %v6584_v8  ;;  %3305 = vmatpush.bf16.msrb.mxu3 %v7060_v47  ;;  %v7028_v8 = vor.u32 %v8488_v33, %v7027_v35  ;;  %v8422_v47 = vld [vmem:[#allocation7 + $0x194] sm:$0xf]  ;;  %v6755_v35 = vld [vmem:[#allocation7 + $0x150] sm:$0xf] }
 0x30a   :  { %2512 = vmatpush.msrb.mxu1 %v9634_v39  ;;  %v8418_v33 = vld [vmem:[#allocation7 + $0x16c] sm:$0xf0] }
 0x30c   :  { %2513 = vmatpush.msrb.mxu1 %v9638_v55  ;;  %3346 = vmatpush.bf16.msra.mxu2 %v6748_v59  ;;  %v8480_v59 = vld [vmem:[#allocation7 + $0x35c] sm:$0xf0] }
 0x30d   :  { %3370 = vmatpush.bf16.msrb.mxu0 %v6816_v9  ;;  %v7029_v9 = vld [vmem:[#allocation7 + $0x3a0] sm:$0xf0]  ;;  %3306 = vmatpush.bf16.msrb.mxu3 %v7028_v8  ;;  %v6996_v62 = vor.u32 %v8480_v59, %v6995_v3  ;;  %v6835_v8 = vld [vmem:[#allocation7 + $0x200] sm:$0xf]  ;;  %v6788_v3 = vor.u32 %v8426_v12, %v6787_v44  ;;  %v6792_v59 = vor.u32 %v8422_v47, %v6789_v31  ;;  %v8394_v12 = vld [vmem:[#allocation7 + $0xac] sm:$0xf0] }
 0x30e   :  { %2514 = vmatpush.msrb.mxu1 %v9641_v18  ;;  %v7032_v29 = vor.u32 %v8484_v22, %v7029_v9  ;;  %v8414_v22 = vld [vmem:[#allocation7 + $0x154] sm:$0xf]  ;;  %v8440_v9 = vld [vmem:[#allocation7 + $0x21c] sm:$0xf0] }
 0x310   :  { %2515 = vmatpush.msrb.mxu1 %v9644_v5  ;;  %3347 = vmatpush.bf16.msra.mxu2 %v6716_v51 }
 0x311   :  { %3371 = vmatpush.bf16.msrb.mxu0 %v6784_v45  ;;  %v6997_v45 = vld [vmem:[#allocation7 + $0x360] sm:$0xf0]  ;;  %3307 = vmatpush.bf16.msrb.mxu3 %v6996_v62 }
 0x312   :  { %2516 = vmatpush.msrb.mxu1 %v9647_v53  ;;  %v7000_v51 = vor.u32 %v8476_v7, %v6997_v45  ;;  %v6836_v7 = vor.u32 %v8440_v9, %v6835_v8  ;;  %v6837_v62 = vld [vmem:[#allocation7 + $0x220] sm:$0xf0]  ;;  %v7067_v45 = vld [vmem:[#allocation7 + $0x3c8] sm:$0xf]  ;;  %v6661_v8 = vld [vmem:[#allocation7 + $0xb0] sm:$0xf0] }
 0x314   :  { %2517 = vmatpush.msrb.mxu1 %v9650_v20  ;;  %3348 = vmatpush.bf16.msra.mxu2 %v6684_v17 }
 0x315   :  { %6576 = vmatmul.msk.f32.vlgmr.msrb.gmra.mxu1 %vm2478_vm9, %v9597_v26  ;;  %v6749_v26 = vld [vmem:[#allocation7 + $0x168] sm:$0xf0] }
 0x316   :  { %v6752_v25 = vor.u32 %v8413_v37, %v6749_v26  ;;  %3331 = vmatpush.bf16.msra.mxu1 %v7064_v50  ;;  %v6963_v37 = vld [vmem:[#allocation7 + $0x300] sm:$0xf]  ;;  %v6872_v50 = vor.u32 %v8444_v40, %v6869_v56  ;;  %v8477_v40 = vld [vmem:[#allocation7 + $0x34c] sm:$0xf]  ;;  %v6659_v56 = vld [vmem:[#allocation7 + $0x90] sm:$0xf] }
 0x317   :  { %v8472_v26 = vld [vmem:[#allocation7 + $0x31c] sm:$0xf0] }
 0x318   :  { %3372 = vmatpush.bf16.msrb.mxu0 %v6752_v25  ;;  %3349 = vmatpush.bf16.msra.mxu2 %v6652_v24  ;;  %v6964_v42 = vor.u32 %v8472_v26, %v6963_v37  ;;  %v6965_v25 = vld [vmem:[#allocation7 + $0x320] sm:$0xf0]  ;;  %v6757_v37 = vld [vmem:[#allocation7 + $0x170] sm:$0xf0] }
 0x319   :  { %v6968_v17 = vor.u32 %v8468_v32, %v6965_v25  ;;  %v7069_v25 = vld [vmem:[#allocation7 + $0x3e8] sm:$0xf0] }
 0x31a   :  { %3332 = vmatpush.bf16.msra.mxu1 %v7032_v29  ;;  %3308 = vmatpush.bf16.msrb.mxu3 %v6964_v42  ;;  %v8436_v29 = vld [vmem:[#allocation7 + $0x204] sm:$0xf]  ;;  %v8493_v42 = vld [vmem:[#allocation7 + $0x3cc] sm:$0xf] }
 0x31b   :  { %v6840_v26 = vor.u32 %v8436_v29, %v6837_v62  ;;  %v6973_v29 = vld [vmem:[#allocation7 + $0x328] sm:$0xf0]  ;;  %v6660_v62 = vor.u32 %v8394_v12, %v6659_v56 }
 0x31c   :  { %3373 = vmatpush.bf16.msrb.mxu0 %v6720_v58  ;;  %3350 = vmatpush.bf16.msra.mxu2 %v6620_v52  ;;  %v6933_v58 = vld [vmem:[#allocation7 + $0x2e0] sm:$0xf0] }
 0x31d   :  { %v6936_v24 = vor.u32 %v8460_v49, %v6933_v58  ;;  %v6901_v52 = vld [vmem:[#allocation7 + $0x2a0] sm:$0xf0]  ;;  %v6756_v49 = vor.u32 %v8418_v33, %v6755_v35  ;;  %v7035_v58 = vld [vmem:[#allocation7 + $0x388] sm:$0xf]  ;;  %v8469_v33 = vld [vmem:[#allocation7 + $0x30c] sm:$0xf] }
 0x31e   :  { %3333 = vmatpush.bf16.msra.mxu1 %v7000_v51  ;;  %3309 = vmatpush.bf16.msrb.mxu3 %v6932_v57  ;;  %v6904_v54 = vor.u32 %v8452_v36, %v6901_v52  ;;  %v8497_v51 = vld [vmem:[#allocation7 + $0x3e4] sm:$0xf0]  ;;  %v6760_v57 = vor.u32 %v8414_v22, %v6757_v37  ;;  %v6725_v36 = vld [vmem:[#allocation7 + $0x130] sm:$0xf0] }
 0x31f   :  { %v7068_v32 = vor.u32 %v8497_v51, %v7067_v45  ;;  %v8473_v35 = vld [vmem:[#allocation7 + $0x324] sm:$0xf0]  ;;  %v8390_v22 = vld [vmem:[#allocation7 + $0x94] sm:$0xf] }
 0x320   :  { %3374 = vmatpush.bf16.msrb.mxu0 %v6688_v27  ;;  %3351 = vmatpush.bf16.msra.mxu2 %v6588_v23  ;;  %v6900_v27 = vor.u32 %v8456_v2, %v6899_v13  ;;  %v6820_v23 = vor.u32 %v8434_v48, %v6819_v63  ;;  %v8485_v13 = vld [vmem:[#allocation7 + $0x38c] sm:$0xf]  ;;  %v8406_v2 = vld [vmem:[#allocation7 + $0x114] sm:$0xf]  ;;  %v6691_v48 = vld [vmem:[#allocation7 + $0xd0] sm:$0xf]  ;;  %v6664_v45 = vor.u32 %v8390_v22, %v6661_v8 }
 0x321   :  { %v6939_v51 = vld [vmem:[#allocation7 + $0x2c8] sm:$0xf] }
 0x322   :  { %3334 = vmatpush.bf16.msra.mxu1 %v6968_v17  ;;  %3310 = vmatpush.bf16.msrb.mxu3 %v6900_v27  ;;  %v7072_v17 = vor.u32 %v8493_v42, %v7069_v25  ;;  %v7037_v27 = vld [vmem:[#allocation7 + $0x3a8] sm:$0xf0]  ;;  %v8465_v37 = vld [vmem:[#allocation7 + $0x2e4] sm:$0xf0]  ;;  %v6629_v42 = vld [vmem:[#allocation7 + $0x70] sm:$0xf0] }
 0x323   :  { %v7040_v52 = vor.u32 %v8485_v13, %v7037_v27  ;;  %v6940_v25 = vor.u32 %v8465_v37, %v6939_v51  ;;  %v6907_v13 = vld [vmem:[#allocation7 + $0x288] sm:$0xf]  ;;  %v6597_v27 = vld [vmem:[#allocation7 + $0x30] sm:$0xf0]  ;;  %v8415_v51 = vld [vmem:[#allocation7 + $0x15c] sm:$0xf] }
 0x324   :  { %3375 = vmatpush.bf16.msrb.mxu0 %v6656_v15  ;;  %v6821_v15 = vld [vmem:[#allocation7 + $0x1f0] sm:$0xf0]  ;;  %v6843_v22 = vld [vmem:[#allocation7 + $0x208] sm:$0xf]  ;;  %v6765_v37 = vld [vmem:[#allocation7 + $0x178] sm:$0xf0] }
 0x325   :  { %v6824_v19 = vor.u32 %v8430_v4, %v6821_v15  ;;  %v8402_v4 = vld [vmem:[#allocation7 + $0xec] sm:$0xf0]  ;;  %v6724_v15 = vor.u32 %v8410_v28, %v6723_v11  ;;  %v8441_v8 = vld [vmem:[#allocation7 + $0x224] sm:$0xf0] }
 0x326   :  { %3335 = vmatpush.bf16.msra.mxu1 %v6936_v24  ;;  %v8489_v24 = vld [vmem:[#allocation7 + $0x3a4] sm:$0xf0]  ;;  %v6692_v47 = vor.u32 %v8402_v4, %v6691_v48  ;;  %v6595_v28 = vld [vmem:[#allocation7 + $0x10] sm:$0xf]  ;;  %v6909_v48 = vld [vmem:[#allocation7 + $0x2a8] sm:$0xf0] }
 0x327   :  { %v7036_v63 = vor.u32 %v8489_v24, %v7035_v58  ;;  %v8435_v4 = vld [vmem:[#allocation7 + $0x1f4] sm:$0xf0] }
 0x328   :  { %3376 = vmatpush.bf16.msrb.mxu0 %v6624_v46  ;;  %v8448_v46 = vld [vmem:[#allocation7 + $0x25c] sm:$0xf0] }
 0x32a   :  { %3336 = vmatpush.bf16.msra.mxu1 %v6904_v54  ;;  %v6728_v54 = vor.u32 %v8406_v2, %v6725_v36  ;;  %v8457_v2 = vld [vmem:[#allocation7 + $0x2a4] sm:$0xf0]  ;;  %v8453_v36 = vld [vmem:[#allocation7 + $0x28c] sm:$0xf] }
 0x32c   :  { %3377 = vmatpush.bf16.msrb.mxu0 %v6592_v16  ;;  %v6868_v16 = vor.u32 %v8448_v46, %v6867_v34  ;;  %v7003_v34 = vld [vmem:[#allocation7 + $0x348] sm:$0xf] }
 0x32d   :  { %v8481_v46 = vld [vmem:[#allocation7 + $0x364] sm:$0xf0] }
 0x32e   :  { %3311 = vmatpush.bf16.msrb.mxu3 %v6868_v16  ;;  %3337 = vmatpush.bf16.msra.mxu1 %v6872_v50  ;;  %v7004_v44 = vor.u32 %v8481_v46, %v7003_v34  ;;  %v6971_v50 = vld [vmem:[#allocation7 + $0x308] sm:$0xf]  ;;  %v6912_v34 = vor.u32 %v8453_v36, %v6909_v48  ;;  %v8391_v48 = vld [vmem:[#allocation7 + $0x9c] sm:$0xf] }
 0x32f   :  { %v6972_v9 = vor.u32 %v8473_v35, %v6971_v50  ;;  %v8423_v50 = vld [vmem:[#allocation7 + $0x19c] sm:$0xf] }
 0x330   :  { %v6797_v35 = vld [vmem:[#allocation7 + $0x1b8] sm:$0xf0] }
 0x332   :  { %3312 = vmatpush.bf16.msrb.mxu3 %v6836_v7  ;;  %3338 = vmatpush.bf16.msra.mxu1 %v6840_v26  ;;  %v8386_v7 = vld [vmem:[#allocation7 + $0x6c] sm:$0xf0]  ;;  %v8461_v26 = vld [vmem:[#allocation7 + $0x2cc] sm:$0xf] }
 0x336   :  { %3357 = vmatpush.bf16.msra.mxu3 %v7068_v32  ;;  %3383 = vmatpush.bf16.msrb.mxu1 %v7072_v17  ;;  %v8382_v32 = vld [vmem:[#allocation7 + $0x54] sm:$0xf]  ;;  %v6941_v17 = vld [vmem:[#allocation7 + $0x2e8] sm:$0xf0] }
 0x337   :  { %v6944_v11 = vor.u32 %v8461_v26, %v6941_v17  ;;  %v6632_v24 = vor.u32 %v8382_v32, %v6629_v42  ;;  %v6731_v42 = vld [vmem:[#allocation7 + $0x118] sm:$0xf] }
 0x338   :  { %v8411_v17 = vld [vmem:[#allocation7 + $0x134] sm:$0xf0] }
 0x33a   :  { %3358 = vmatpush.bf16.msra.mxu3 %v7036_v63  ;;  %3384 = vmatpush.bf16.msrb.mxu1 %v7040_v52  ;;  %v6827_v63 = vld [vmem:[#allocation7 + $0x1d8] sm:$0xf]  ;;  %v6908_v52 = vor.u32 %v8457_v2, %v6907_v13  ;;  %v8399_v13 = vld [vmem:[#allocation7 + $0xdc] sm:$0xf] }
 0x33b   :  { %v6701_v2 = vld [vmem:[#allocation7 + $0xf8] sm:$0xf0] }
 0x33e   :  { %3359 = vmatpush.bf16.msra.mxu3 %v7004_v44  ;;  %v8445_v44 = vld [vmem:[#allocation7 + $0x24c] sm:$0xf] }
 0x342   :  { %3360 = vmatpush.bf16.msra.mxu3 %v6972_v9  ;;  %v8437_v9 = vld [vmem:[#allocation7 + $0x20c] sm:$0xf] }
 0x346   :  { %3361 = vmatpush.bf16.msra.mxu3 %v6940_v25  ;;  %v6768_v25 = vor.u32 %v8415_v51, %v6765_v37  ;;  %v7011_v51 = vld [vmem:[#allocation7 + $0x350] sm:$0xf] }
 0x347   :  { %v8482_v37 = vld [vmem:[#allocation7 + $0x36c] sm:$0xf0] }
 0x34a   :  { %3362 = vmatpush.bf16.msra.mxu3 %v6908_v52  ;;  %v8395_v52 = vld [vmem:[#allocation7 + $0xb4] sm:$0xf0] }
 0x352   :  { %v2499_v41 = vpop.f32.mrf.mxu0 }
 0x353   :  { %v9655_v10 = vpack.c.bf16 %v2499_v41, %v2499_v41  ;;  %v8398_v41 = vld [vmem:[#allocation7 + $0xd4] sm:$0xf] }
 0x355   :  { %3300 = vmatmul.bf16.vlgmr.msrb.gmra.mxu2 %v9655_v10  ;;  %3326 = vmatmul.bf16.vlgmr.msra.gmra.mxu0 %v9655_v10 }
 0x356   :  { %3396 = vmatpush.bf16.msrb.mxu2 %v6820_v23  ;;  %3422 = vmatpush.bf16.msra.mxu0 %v6824_v19  ;;  %v6693_v23 = vld [vmem:[#allocation7 + $0xf0] sm:$0xf0]  ;;  %v7005_v19 = vld [vmem:[#allocation7 + $0x368] sm:$0xf0] }
 0x357   :  { %v7008_v16 = vor.u32 %v8477_v40, %v7005_v19  ;;  %v6696_v31 = vor.u32 %v8398_v41, %v6693_v23  ;;  %v6875_v41 = vld [vmem:[#allocation7 + $0x248] sm:$0xf]  ;;  %v6828_v19 = vor.u32 %v8435_v4, %v6827_v63  ;;  %v6667_v63 = vld [vmem:[#allocation7 + $0x98] sm:$0xf]  ;;  %v6669_v4 = vld [vmem:[#allocation7 + $0xb8] sm:$0xf0] }
 0x358   :  { %v8449_v23 = vld [vmem:[#allocation7 + $0x264] sm:$0xf0] }
 0x359   :  { %3385 = vmatpush.bf16.msrb.mxu1 %v7008_v16  ;;  %v6795_v16 = vld [vmem:[#allocation7 + $0x198] sm:$0xf]  ;;  %v6876_v12 = vor.u32 %v8449_v23, %v6875_v41  ;;  %v6637_v41 = vld [vmem:[#allocation7 + $0x78] sm:$0xf0] }
 0x35a   :  { %3397 = vmatpush.bf16.msrb.mxu2 %v6788_v3  ;;  %3423 = vmatpush.bf16.msra.mxu0 %v6792_v59  ;;  %v6976_v3 = vor.u32 %v8469_v33, %v6973_v29  ;;  %v6627_v59 = vld [vmem:[#allocation7 + $0x50] sm:$0xf] }
 0x35b   :  { %v6628_v58 = vor.u32 %v8386_v7, %v6627_v59  ;;  %3363 = vmatpush.bf16.msra.mxu3 %v6876_v12  ;;  %v6800_v59 = vor.u32 %v8423_v50, %v6797_v35  ;;  %v6844_v7 = vor.u32 %v8441_v8, %v6843_v22  ;;  %v6605_v12 = vld [vmem:[#allocation7 + $0x38] sm:$0xf0]  ;;  %v7075_v50 = vld [vmem:[#allocation7 + $0x3d0] sm:$0xf]  ;;  %v7077_v22 = vld [vmem:[#allocation7 + $0x3f0] sm:$0xf0] }
 0x35c   :  { %v8498_v35 = vld [vmem:[#allocation7 + $0x3ec] sm:$0xf0] }
 0x35d   :  { %3386 = vmatpush.bf16.msrb.mxu1 %v6976_v3  ;;  %v6763_v3 = vld [vmem:[#allocation7 + $0x158] sm:$0xf] }
 0x35e   :  { %3398 = vmatpush.bf16.msrb.mxu2 %v6756_v49  ;;  %3424 = vmatpush.bf16.msra.mxu0 %v6760_v57  ;;  %v8378_v49 = vld [vmem:[#allocation7 + $0x2c] sm:$0xf0]  ;;  %v8374_v57 = vld [vmem:[#allocation7 + $0x14] sm:$0xf] }
 0x35f   :  { %v6596_v46 = vor.u32 %v8378_v49, %v6595_v28  ;;  %v6600_v40 = vor.u32 %v8374_v57, %v6597_v27  ;;  %3364 = vmatpush.bf16.msra.mxu3 %v6844_v7  ;;  %v6733_v28 = vld [vmem:[#allocation7 + $0x138] sm:$0xf0]  ;;  %v6732_v49 = vor.u32 %v8411_v17, %v6731_v42  ;;  %v6699_v57 = vld [vmem:[#allocation7 + $0xd8] sm:$0xf]  ;;  %v6704_v27 = vor.u32 %v8399_v13, %v6701_v2  ;;  %v8490_v7 = vld [vmem:[#allocation7 + $0x3ac] sm:$0xf0] }
 0x360   :  { %v6979_v42 = vld [vmem:[#allocation7 + $0x310] sm:$0xf]  ;;  %v8470_v17 = vld [vmem:[#allocation7 + $0x314] sm:$0xf] }
 0x361   :  { %3387 = vmatpush.bf16.msrb.mxu1 %v6944_v11  ;;  %v8407_v11 = vld [vmem:[#allocation7 + $0x11c] sm:$0xf]  ;;  %v8458_v2 = vld [vmem:[#allocation7 + $0x2ac] sm:$0xf0] }
 0x362   :  { %3399 = vmatpush.bf16.msrb.mxu2 %v6724_v15  ;;  %3425 = vmatpush.bf16.msra.mxu0 %v6728_v54  ;;  %v8431_v15 = vld [vmem:[#allocation7 + $0x1dc] sm:$0xf] }
 0x363   :  { %v6829_v54 = vld [vmem:[#allocation7 + $0x1f8] sm:$0xf0] }
 0x364   :  { %v6832_v56 = vor.u32 %v8431_v15, %v6829_v54  ;;  %v6668_v15 = vor.u32 %v8395_v52, %v6667_v63  ;;  %v6635_v54 = vld [vmem:[#allocation7 + $0x58] sm:$0xf]  ;;  %v6917_v63 = vld [vmem:[#allocation7 + $0x2b0] sm:$0xf0]  ;;  %v6883_v52 = vld [vmem:[#allocation7 + $0x250] sm:$0xf] }
 0x365   :  { %3352 = vmatmul.bf16.vlgmr.msra.gmra.mxu2 %v9655_v10  ;;  %3378 = vmatmul.bf16.vlgmr.msrb.gmra.mxu0 %v9655_v10 }
 0x366   :  { %3400 = vmatpush.bf16.msrb.mxu2 %v6692_v47  ;;  %3426 = vmatpush.bf16.msra.mxu0 %v6696_v31  ;;  %v6877_v47 = vld [vmem:[#allocation7 + $0x268] sm:$0xf0]  ;;  %v8427_v31 = vld [vmem:[#allocation7 + $0x1b4] sm:$0xf0] }
 0x367   :  { %3388 = vmatpush.bf16.msrb.mxu1 %v6912_v34  ;;  %v6880_v33 = vor.u32 %v8445_v44, %v6877_v47  ;;  %v6796_v29 = vor.u32 %v8427_v31, %v6795_v16  ;;  %v6672_v34 = vor.u32 %v8391_v48, %v6669_v4  ;;  %v6603_v44 = vld [vmem:[#allocation7 + $0x18] sm:$0xf]  ;;  %v8450_v48 = vld [vmem:[#allocation7 + $0x26c] sm:$0xf0]  ;;  %v8446_v4 = vld [vmem:[#allocation7 + $0x254] sm:$0xf] }
 0x368   :  { %v8379_v16 = vld [vmem:[#allocation7 + $0x34] sm:$0xf0] }
 0x369   :  { %v6604_v47 = vor.u32 %v8379_v16, %v6603_v44  ;;  %v7083_v44 = vld [vmem:[#allocation7 + $0x3d8] sm:$0xf]  ;;  %v8495_v16 = vld [vmem:[#allocation7 + $0x3dc] sm:$0xf] }
 0x36a   :  { %3401 = vmatpush.bf16.msrb.mxu2 %v6660_v62  ;;  %3427 = vmatpush.bf16.msra.mxu0 %v6664_v45  ;;  %v6845_v62 = vld [vmem:[#allocation7 + $0x228] sm:$0xf0]  ;;  %v8419_v45 = vld [vmem:[#allocation7 + $0x174] sm:$0xf0] }
 0x36b   :  { %3389 = vmatpush.bf16.msrb.mxu1 %v6880_v33  ;;  %v6848_v26 = vor.u32 %v8437_v9, %v6845_v62  ;;  %v6764_v32 = vor.u32 %v8419_v45, %v6763_v3  ;;  %v8494_v33 = vld [vmem:[#allocation7 + $0x3d4] sm:$0xf]  ;;  %v7076_v9 = vor.u32 %v8498_v35, %v7075_v50  ;;  %v7043_v3 = vld [vmem:[#allocation7 + $0x390] sm:$0xf]  ;;  %v7051_v35 = vld [vmem:[#allocation7 + $0x398] sm:$0xf] }
 0x36c   :  { %v8486_v62 = vld [vmem:[#allocation7 + $0x394] sm:$0xf] }
 0x36d   :  { %v7045_v45 = vld [vmem:[#allocation7 + $0x3b0] sm:$0xf0] }
 0x36e   :  { %3402 = vmatpush.bf16.msrb.mxu2 %v6628_v58  ;;  %3428 = vmatpush.bf16.msra.mxu0 %v6632_v24  ;;  %v6736_v58 = vor.u32 %v8407_v11, %v6733_v28  ;;  %v8403_v24 = vld [vmem:[#allocation7 + $0xf4] sm:$0xf0]  ;;  %v6981_v11 = vld [vmem:[#allocation7 + $0x330] sm:$0xf0] }
 0x36f   :  { %3390 = vmatpush.bf16.msrb.mxu1 %v6848_v26  ;;  %v6700_v36 = vor.u32 %v8403_v24, %v6699_v57  ;;  %v8478_v26 = vld [vmem:[#allocation7 + $0x354] sm:$0xf]  ;;  %v6984_v28 = vor.u32 %v8470_v17, %v6981_v11  ;;  %v9680_v24 = vld [vmem:[%s9852_s7 + $0x8] sm:$0xff]  ;;  %v8463_v17 = vld [vmem:[#allocation7 + $0x2dc] sm:$0xf] }
 0x370   :  { %v8462_v57 = vld [vmem:[#allocation7 + $0x2d4] sm:$0xf]  ;;  %v6957_v11 = vld [vmem:[#allocation7 + $0x2f8] sm:$0xf0] }
 0x372   :  { %3403 = vmatpush.bf16.msrb.mxu2 %v6596_v46  ;;  %3429 = vmatpush.bf16.msra.mxu0 %v6600_v40  ;;  %v8387_v46 = vld [vmem:[#allocation7 + $0x74] sm:$0xf0]  ;;  %v8383_v40 = vld [vmem:[#allocation7 + $0x5c] sm:$0xf] }
 0x373   :  { %v6636_v23 = vor.u32 %v8387_v46, %v6635_v54  ;;  %v6884_v54 = vor.u32 %v8450_v48, %v6883_v52  ;;  %v6851_v46 = vld [vmem:[#allocation7 + $0x210] sm:$0xf]  ;;  %v6893_v52 = vld [vmem:[#allocation7 + $0x278] sm:$0xf0] }
 0x375   :  { %3404 = vmatmul.bf16.vlgmr.msrb.gmra.mxu2 %v9655_v10  ;;  %3430 = vmatmul.bf16.vlgmr.msra.gmra.mxu0 %v9655_v10 }
 0x376   :  { %3448 = vmatpush.bf16.msra.mxu2 %v6828_v19  ;;  %3474 = vmatpush.bf16.msrb.mxu0 %v6832_v56  ;;  %v6640_v19 = vor.u32 %v8383_v40, %v6637_v41  ;;  %v8375_v56 = vld [vmem:[#allocation7 + $0x1c] sm:$0xf]  ;;  %v8442_v40 = vld [vmem:[#allocation7 + $0x22c] sm:$0xf0]  ;;  %v8438_v41 = vld [vmem:[#allocation7 + $0x214] sm:$0xf] }
 0x377   :  { %v6608_v31 = vor.u32 %v8375_v56, %v6605_v12  ;;  %v7085_v56 = vld [vmem:[#allocation7 + $0x3f8] sm:$0xf0]  ;;  %v6852_v12 = vor.u32 %v8442_v40, %v6851_v46  ;;  %v8548_v46 = vld [vmem:[#allocation7 + $0x584] sm:$0xf] }
 0x378   :  { %v7088_v50 = vor.u32 %v8495_v16, %v7085_v56  ;;  %v8443_v56 = vld [vmem:[#allocation7 + $0x234] sm:$0xf0] }
 0x37a   :  { %3449 = vmatpush.bf16.msra.mxu2 %v6796_v29  ;;  %3475 = vmatpush.bf16.msrb.mxu0 %v6800_v59  ;;  %v7080_v29 = vor.u32 %v8494_v33, %v7077_v22  ;;  %v8491_v33 = vld [vmem:[#allocation7 + $0x3b4] sm:$0xf0]  ;;  %v8487_v22 = vld [vmem:[#allocation7 + $0x39c] sm:$0xf] }
 0x37e   :  { %3450 = vmatpush.bf16.msra.mxu2 %v6764_v32  ;;  %3476 = vmatpush.bf16.msrb.mxu0 %v6768_v25  ;;  %v7013_v32 = vld [vmem:[#allocation7 + $0x370] sm:$0xf0]  ;;  %v8474_v25 = vld [vmem:[#allocation7 + $0x32c] sm:$0xf0] }
 0x382   :  { %3451 = vmatpush.bf16.msra.mxu2 %v6732_v49  ;;  %3477 = vmatpush.bf16.msrb.mxu0 %v6736_v58  ;;  %v6947_v49 = vld [vmem:[#allocation7 + $0x2d0] sm:$0xf]  ;;  %v6949_v58 = vld [vmem:[#allocation7 + $0x2f0] sm:$0xf0] }
 0x383   :  { %v6952_v13 = vor.u32 %v8462_v57, %v6949_v58  ;;  %v8455_v57 = vld [vmem:[#allocation7 + $0x29c] sm:$0xf] }
 0x384   :  { %v6925_v58 = vld [vmem:[#allocation7 + $0x2b8] sm:$0xf0] }
 0x386   :  { %3452 = vmatpush.bf16.msra.mxu2 %v6700_v36  ;;  %3478 = vmatpush.bf16.msrb.mxu0 %v6704_v27  ;;  %v8454_v36 = vld [vmem:[#allocation7 + $0x294] sm:$0xf] }
 0x387   :  { %v6920_v27 = vor.u32 %v8454_v36, %v6917_v63  ;;  %v8556_v36 = vld [vmem:[#allocation7 + $0x5c4] sm:$0xf] }
 0x38a   :  { %3453 = vmatpush.bf16.msra.mxu2 %v6668_v15  ;;  %3479 = vmatpush.bf16.msrb.mxu0 %v6672_v34  ;;  %v6885_v15 = vld [vmem:[#allocation7 + $0x270] sm:$0xf0] }
 0x38b   :  { %v6888_v34 = vor.u32 %v8446_v4, %v6885_v15  ;;  %v7320_v4 = vld [vmem:[#allocation7 + $0x5e0] sm:$0xf0] }
 0x38c   :  { %v7323_v15 = vor.u32 %v8556_v36, %v7320_v4  ;;  %v8561_v36 = vld [vmem:[#allocation7 + $0x5e4] sm:$0xf0] }
 0x38e   :  { %3454 = vmatpush.bf16.msra.mxu2 %v6636_v23  ;;  %3480 = vmatpush.bf16.msrb.mxu0 %v6640_v19  ;;  %v6853_v23 = vld [vmem:[#allocation7 + $0x230] sm:$0xf0]  ;;  %v8499_v19 = vld [vmem:[#allocation7 + $0x3f4] sm:$0xf0] }
 0x392   :  { %3455 = vmatpush.bf16.msra.mxu2 %v6604_v47  ;;  %3481 = vmatpush.bf16.msrb.mxu0 %v6608_v31  ;;  %v2519_v8 = vpop.f32.mrf.mxu1  ;;  %v6856_v47 = vor.u32 %v8438_v41, %v6853_v23  ;;  %v7084_v31 = vor.u32 %v8499_v19, %v7083_v44  ;;  %v7288_v41 = vld [vmem:[#allocation7 + $0x5a0] sm:$0xf0]  ;;  %v6859_v23 = vld [vmem:[#allocation7 + $0x218] sm:$0xf] }
 0x393   :  { %v9666_v59 = vpack.c.bf16 %v2519_v8, %v2519_v8  ;;  %v7053_v8 = vld [vmem:[#allocation7 + $0x3b8] sm:$0xf0]  ;;  %v7291_v44 = vor.u32 %v8548_v46, %v7288_v41 }
 0x395   :  { %3482 = vmatmul.bf16.vlgmr.msrb.gmra.mxu0 %v9655_v10  ;;  %3456 = vmatmul.bf16.vlgmr.msra.gmra.mxu2 %v9655_v10  ;;  %v7012_v10 = vor.u32 %v8482_v37, %v7011_v51  ;;  %v6987_v51 = vld [vmem:[#allocation7 + $0x318] sm:$0xf] }
 0x396   :  { %3538 = vmatpush.msrb.mxu2 %v9560_v38  ;;  %3313 = vmatmul.bf16.vlgmr.msrb.gmra.mxu3 %v9666_v59  ;;  %v7044_v38 = vor.u32 %v8490_v7, %v7043_v3  ;;  %v7019_v3 = vld [vmem:[#allocation7 + $0x358] sm:$0xf] }
 0x397   :  { %3339 = vmatmul.bf16.vlgmr.msra.gmra.mxu1 %v9666_v59  ;;  %3409 = vmatpush.bf16.msrb.mxu3 %v7076_v9  ;;  %v7052_v9 = vor.u32 %v8491_v33, %v7051_v35  ;;  %v8483_v7 = vld [vmem:[#allocation7 + $0x374] sm:$0xf0]  ;;  %v8540_v35 = vld [vmem:[#allocation7 + $0x544] sm:$0xf] }
 0x398   :  { %3539 = vmatpush.msrb.mxu2 %v9565_v30  ;;  %3435 = vmatpush.bf16.msra.mxu1 %v7080_v29  ;;  %v7048_v30 = vor.u32 %v8486_v62, %v7045_v45  ;;  %v7056_v29 = vor.u32 %v8487_v22, %v7053_v8  ;;  %v8479_v62 = vld [vmem:[#allocation7 + $0x35c] sm:$0xf]  ;;  %v8475_v37 = vld [vmem:[#allocation7 + $0x334] sm:$0xf0]  ;;  %v7256_v22 = vld [vmem:[#allocation7 + $0x560] sm:$0xf0] }
 0x399   :  { %v7021_v45 = vld [vmem:[#allocation7 + $0x378] sm:$0xf0]  ;;  %4367 = vmatpush.bf16.msra.mxu0 %v7323_v15  ;;  %v7259_v8 = vor.u32 %v8540_v35, %v7256_v22  ;;  %v7294_v15 = vld [vmem:[#allocation7 + $0x588] sm:$0xf] }
 0x39a   :  { %3540 = vmatpush.msrb.mxu2 %v9574_v21  ;;  %v7016_v21 = vor.u32 %v8478_v26, %v7013_v32  ;;  %v8471_v26 = vld [vmem:[#allocation7 + $0x31c] sm:$0xf]  ;;  %v8537_v35 = vld [vmem:[#allocation7 + $0x524] sm:$0xf0] }
 0x39b   :  { %3410 = vmatpush.bf16.msrb.mxu3 %v7044_v38  ;;  %v7020_v38 = vor.u32 %v8483_v7, %v7019_v3  ;;  %v6989_v32 = vld [vmem:[#allocation7 + $0x338] sm:$0xf0]  ;;  %v7222_v3 = vld [vmem:[#allocation7 + $0x500] sm:$0xf] }
 0x39c   :  { %3541 = vmatpush.msrb.mxu2 %v9580_v43  ;;  %3436 = vmatpush.bf16.msra.mxu1 %v7048_v30  ;;  %v6980_v43 = vor.u32 %v8474_v25, %v6979_v42  ;;  %v7024_v30 = vor.u32 %v8479_v62, %v7021_v45  ;;  %v6955_v42 = vld [vmem:[#allocation7 + $0x2d8] sm:$0xf]  ;;  %v8536_v7 = vld [vmem:[#allocation7 + $0x51c] sm:$0xf0]  ;;  %v8532_v62 = vld [vmem:[#allocation7 + $0x504] sm:$0xf] }
 0x39d   :  { %v8467_v25 = vld [vmem:[#allocation7 + $0x2f4] sm:$0xf0]  ;;  %4368 = vmatpush.bf16.msra.mxu0 %v7291_v44  ;;  %v7223_v45 = vor.u32 %v8536_v7, %v7222_v3  ;;  %v7262_v44 = vld [vmem:[#allocation7 + $0x548] sm:$0xf] }
 0x39e   :  { %3542 = vmatpush.msrb.mxu2 %v9583_v6  ;;  %v8466_v6 = vld [vmem:[#allocation7 + $0x2ec] sm:$0xf0]  ;;  %v7198_v3 = vld [vmem:[#allocation7 + $0x4c8] sm:$0xf] }
 0x39f   :  { %3411 = vmatpush.bf16.msrb.mxu3 %v7012_v10  ;;  %v6988_v10 = vor.u32 %v8475_v37, %v6987_v51  ;;  %v8529_v7 = vld [vmem:[#allocation7 + $0x4e4] sm:$0xf0] }
 0x3a0   :  { %3543 = vmatpush.msrb.mxu2 %v9586_v0  ;;  %3437 = vmatpush.bf16.msra.mxu1 %v7016_v21  ;;  %v6948_v0 = vor.u32 %v8466_v6, %v6947_v49  ;;  %v6992_v21 = vor.u32 %v8471_v26, %v6989_v32  ;;  %v6923_v49 = vld [vmem:[#allocation7 + $0x298] sm:$0xf]  ;;  %v8528_v32 = vld [vmem:[#allocation7 + $0x4dc] sm:$0xf0] }
 0x3a1   :  { %v8459_v6 = vld [vmem:[#allocation7 + $0x2b4] sm:$0xf0]  ;;  %4369 = vmatpush.bf16.msra.mxu0 %v7259_v8  ;;  %v7232_v8 = vld [vmem:[#allocation7 + $0x528] sm:$0xf0] }
 0x3a2   :  { %3544 = vmatpush.msrb.mxu2 %v9591_v61  ;;  %v6915_v61 = vld [vmem:[#allocation7 + $0x290] sm:$0xf]  ;;  %v6924_v63 = vor.u32 %v8459_v6, %v6923_v49  ;;  %v7128_v49 = vld [vmem:[#allocation7 + $0x460] sm:$0xf0] }
 0x3a3   :  { %3412 = vmatpush.bf16.msrb.mxu3 %v6980_v43  ;;  %v6956_v43 = vor.u32 %v8467_v25, %v6955_v42  ;;  %v8520_v42 = vld [vmem:[#allocation7 + $0x49c] sm:$0xf0]  ;;  %v8516_v25 = vld [vmem:[#allocation7 + $0x484] sm:$0xf] }
 0x3a4   :  { %3545 = vmatpush.msrb.mxu2 %v9599_v14  ;;  %3438 = vmatpush.bf16.msra.mxu1 %v6984_v28  ;;  %v6916_v14 = vor.u32 %v8458_v2, %v6915_v61  ;;  %v6960_v28 = vor.u32 %v8463_v17, %v6957_v11  ;;  %v7318_v61 = vld [vmem:[#allocation7 + $0x5c0] sm:$0xf]  ;;  %v7160_v17 = vld [vmem:[#allocation7 + $0x4a0] sm:$0xf0] }
 0x3a5   :  { %7090 = vmatmul.msk.f32.vlgmr.msrb.gmra.mxu2 %vm2478_vm9, %v9680_v24  ;;  %v8560_v2 = vld [vmem:[#allocation7 + $0x5dc] sm:$0xf0] }
 0x3a6   :  { %3365 = vmatmul.bf16.vlgmr.msra.gmra.mxu3 %v9666_v59  ;;  %v7319_v48 = vor.u32 %v8560_v2, %v7318_v61  ;;  %v7326_v2 = vld [vmem:[#allocation7 + $0x5c8] sm:$0xf] }
 0x3a7   :  { %3391 = vmatmul.bf16.vlgmr.msrb.gmra.mxu1 %v9666_v59  ;;  %3413 = vmatpush.bf16.msrb.mxu3 %v6948_v0  ;;  %v6891_v0 = vld [vmem:[#allocation7 + $0x258] sm:$0xf] }
 0x3a8   :  { %3439 = vmatpush.bf16.msra.mxu1 %v6952_v13  ;;  %v8451_v13 = vld [vmem:[#allocation7 + $0x274] sm:$0xf0]  ;;  %4341 = vmatpush.bf16.msra.mxu2 %v7319_v48 }
 0x3a9   :  { %v6892_v19 = vor.u32 %v8451_v13, %v6891_v0  ;;  %v8504_v0 = vld [vmem:[#allocation7 + $0x41c] sm:$0xf0]  ;;  %v8500_v13 = vld [vmem:[#allocation7 + $0x404] sm:$0xf] }
 0x3ab   :  { %3414 = vmatpush.bf16.msrb.mxu3 %v6916_v14  ;;  %v6928_v14 = vor.u32 %v8455_v57, %v6925_v58  ;;  %v7094_v58 = vld [vmem:[#allocation7 + $0x400] sm:$0xf] }
 0x3ac   :  { %3440 = vmatpush.bf16.msra.mxu1 %v6920_v27  ;;  %v8447_v27 = vld [vmem:[#allocation7 + $0x25c] sm:$0xf]  ;;  %v7095_v61 = vor.u32 %v8504_v0, %v7094_v58  ;;  %v7574_v58 = vld [vmem:[#allocation7 + $0x7c0] sm:$0xf] }
 0x3ad   :  { %v6896_v16 = vor.u32 %v8447_v27, %v6893_v52  ;;  %v8557_v27 = vld [vmem:[#allocation7 + $0x5cc] sm:$0xf]  ;;  %v8624_v0 = vld [vmem:[#allocation7 + $0x7dc] sm:$0xf0] }
 0x3ae   :  { %v7328_v52 = vld [vmem:[#allocation7 + $0x5e8] sm:$0xf0] }
 0x3af   :  { %3415 = vmatpush.bf16.msrb.mxu3 %v6884_v54  ;;  %v7286_v54 = vld [vmem:[#allocation7 + $0x580] sm:$0xf]  ;;  %v7331_v48 = vor.u32 %v8557_v27, %v7328_v52  ;;  %v8612_v27 = vld [vmem:[#allocation7 + $0x784] sm:$0xf] }
 0x3b0   :  { %3441 = vmatpush.bf16.msra.mxu1 %v6888_v34  ;;  %v8552_v34 = vld [vmem:[#allocation7 + $0x59c] sm:$0xf0] }
 0x3b1   :  { %v7287_v40 = vor.u32 %v8552_v34, %v7286_v54  ;;  %v8553_v54 = vld [vmem:[#allocation7 + $0x5a4] sm:$0xf0]  ;;  %v8549_v34 = vld [vmem:[#allocation7 + $0x58c] sm:$0xf] }
 0x3b2   :  { %v7295_v46 = vor.u32 %v8553_v54, %v7294_v15 }
 0x3b3   :  { %3416 = vmatpush.bf16.msrb.mxu3 %v6852_v12  ;;  %v8439_v12 = vld [vmem:[#allocation7 + $0x21c] sm:$0xf]  ;;  %4342 = vmatpush.bf16.msra.mxu2 %v7287_v40  ;;  %v7296_v40 = vld [vmem:[#allocation7 + $0x5a8] sm:$0xf0] }
 0x3b4   :  { %3442 = vmatpush.bf16.msra.mxu1 %v6856_v47  ;;  %v6861_v47 = vld [vmem:[#allocation7 + $0x238] sm:$0xf0]  ;;  %v7299_v41 = vor.u32 %v8549_v34, %v7296_v40  ;;  %v7510_v34 = vld [vmem:[#allocation7 + $0x740] sm:$0xf]  ;;  %v8604_v40 = vld [vmem:[#allocation7 + $0x744] sm:$0xf] }
 0x3b6   :  { %3417 = vmatmul.bf16.vlgmr.msrb.gmra.mxu3 %v9666_v59 }
 0x3b7   :  { %3461 = vmatpush.bf16.msra.mxu3 %v7084_v31  ;;  %3443 = vmatmul.bf16.vlgmr.msra.gmra.mxu1 %v9666_v59  ;;  %v7254_v31 = vld [vmem:[#allocation7 + $0x540] sm:$0xf] }
 0x3b8   :  { %3487 = vmatpush.bf16.msrb.mxu1 %v7088_v50  ;;  %v8544_v50 = vld [vmem:[#allocation7 + $0x55c] sm:$0xf0] }
 0x3b9   :  { %v7255_v33 = vor.u32 %v8544_v50, %v7254_v31  ;;  %v7230_v50 = vld [vmem:[#allocation7 + $0x508] sm:$0xf] }
 0x3ba   :  { %v7231_v22 = vor.u32 %v8537_v35, %v7230_v50  ;;  %v8596_v50 = vld [vmem:[#allocation7 + $0x704] sm:$0xf] }
 0x3bb   :  { %3462 = vmatpush.bf16.msra.mxu3 %v7052_v9  ;;  %v6860_v9 = vor.u32 %v8443_v56, %v6859_v23  ;;  %4343 = vmatpush.bf16.msra.mxu2 %v7255_v33  ;;  %v8533_v33 = vld [vmem:[#allocation7 + $0x50c] sm:$0xf]  ;;  %v7480_v35 = vld [vmem:[#allocation7 + $0x720] sm:$0xf0] }
 0x3bc   :  { %3488 = vmatpush.bf16.msrb.mxu1 %v7056_v29  ;;  %v6864_v29 = vor.u32 %v8439_v12, %v6861_v47  ;;  %v7264_v12 = vld [vmem:[#allocation7 + $0x568] sm:$0xf0] }
 0x3bf   :  { %3463 = vmatpush.bf16.msra.mxu3 %v7020_v38  ;;  %v7224_v38 = vld [vmem:[#allocation7 + $0x520] sm:$0xf0]  ;;  %4344 = vmatpush.bf16.msra.mxu2 %v7223_v45  ;;  %v8525_v45 = vld [vmem:[#allocation7 + $0x4cc] sm:$0xf] }
 0x3c0   :  { %3489 = vmatpush.bf16.msrb.mxu1 %v7024_v30  ;;  %v7227_v30 = vor.u32 %v8532_v62, %v7224_v38  ;;  %v7199_v62 = vor.u32 %v8529_v7, %v7198_v3  ;;  %v7200_v38 = vld [vmem:[#allocation7 + $0x4e8] sm:$0xf0]  ;;  %v8588_v3 = vld [vmem:[#allocation7 + $0x6c4] sm:$0xf] }
 0x3c2   :  { %4370 = vmatpush.bf16.msra.mxu0 %v7227_v30  ;;  %v7203_v30 = vor.u32 %v8525_v45, %v7200_v38 }
 0x3c3   :  { %3464 = vmatpush.bf16.msra.mxu3 %v6988_v10  ;;  %v8524_v10 = vld [vmem:[#allocation7 + $0x4c4] sm:$0xf] }
 0x3c4   :  { %3490 = vmatpush.bf16.msrb.mxu1 %v6992_v21  ;;  %v7192_v21 = vld [vmem:[#allocation7 + $0x4e0] sm:$0xf0] }
 0x3c7   :  { %3465 = vmatpush.bf16.msra.mxu3 %v6956_v43  ;;  %v8512_v43 = vld [vmem:[#allocation7 + $0x45c] sm:$0xf0] }
 0x3c8   :  { %3491 = vmatpush.bf16.msrb.mxu1 %v6960_v28  ;;  %v8508_v28 = vld [vmem:[#allocation7 + $0x444] sm:$0xf] }
 0x3c9   :  { %v7131_v6 = vor.u32 %v8508_v28, %v7128_v49  ;;  %v8501_v28 = vld [vmem:[#allocation7 + $0x40c] sm:$0xf] }
 0x3ca   :  { %v7104_v49 = vld [vmem:[#allocation7 + $0x428] sm:$0xf0] }
 0x3cb   :  { %3466 = vmatpush.bf16.msra.mxu3 %v6924_v63 }
 0x3cc   :  { %3492 = vmatpush.bf16.msrb.mxu1 %v6928_v14  ;;  %v7327_v14 = vor.u32 %v8561_v36, %v7326_v2 }
 0x3cf   :  { %3467 = vmatpush.bf16.msra.mxu3 %v6892_v19  ;;  %v8545_v19 = vld [vmem:[#allocation7 + $0x564] sm:$0xf0] }
 0x3d0   :  { %3493 = vmatpush.bf16.msrb.mxu1 %v6896_v16  ;;  %v8541_v16 = vld [vmem:[#allocation7 + $0x54c] sm:$0xf]  ;;  %v7263_v56 = vor.u32 %v8545_v19, %v7262_v44 }
 0x3d1   :  { %v7267_v47 = vor.u32 %v8541_v16, %v7264_v12  ;;  %v7478_v12 = vld [vmem:[#allocation7 + $0x700] sm:$0xf] }
 0x3d2   :  { %v9691_v51 = vpop.f32.mrf.mxu0 }
 0x3d3   :  { %3468 = vmatpush.bf16.msra.mxu3 %v6860_v9  ;;  %v7235_v9 = vor.u32 %v8533_v33, %v7232_v8  ;;  %v7446_v8 = vld [vmem:[#allocation7 + $0x6c0] sm:$0xf] }
 0x3d4   :  { %3494 = vmatpush.bf16.msrb.mxu1 %v6864_v29 }
 0x3d6   :  { %3469 = vmatmul.bf16.vlgmr.msra.gmra.mxu3 %v9666_v59 }
 0x3d7   :  { %3558 = vmatpush.msrb.mxu3 %v9622_v1  ;;  %3495 = vmatmul.bf16.vlgmr.msrb.gmra.mxu1 %v9666_v59  ;;  %v7190_v1 = vld [vmem:[#allocation7 + $0x4c0] sm:$0xf] }
 0x3d8   :  { %v9696_v37 = vpop.f32.mrf.mxu2  ;;  %v7191_v59 = vor.u32 %v8528_v32, %v7190_v1  ;;  %v7166_v1 = vld [vmem:[#allocation7 + $0x488] sm:$0xf] }
 0x3d9   :  { %3559 = vmatpush.msrb.mxu3 %v9629_v60  ;;  %v7195_v60 = vor.u32 %v8524_v10, %v7192_v21  ;;  %v8521_v32 = vld [vmem:[#allocation7 + $0x4a4] sm:$0xf0]  ;;  %v8517_v10 = vld [vmem:[#allocation7 + $0x48c] sm:$0xf] }
 0x3da   :  { %v3329_v26 = vpop.f32.mrf.mxu0  ;;  %4345 = vmatpush.bf16.msra.mxu2 %v7191_v59  ;;  %v7167_v59 = vor.u32 %v8521_v32, %v7166_v1  ;;  %v7168_v21 = vld [vmem:[#allocation7 + $0x4a8] sm:$0xf0]  ;;  %v8584_v1 = vld [vmem:[#allocation7 + $0x69c] sm:$0xf0]  ;;  %v8580_v32 = vld [vmem:[#allocation7 + $0x684] sm:$0xf] }
 0x3db   :  { %3560 = vmatpush.msrb.mxu3 %v9634_v39  ;;  %4371 = vmatpush.bf16.msra.mxu0 %v7195_v60  ;;  %v7171_v60 = vor.u32 %v8517_v10, %v7168_v21  ;;  %v7382_v21 = vld [vmem:[#allocation7 + $0x640] sm:$0xf] }
 0x3dd   :  { %3561 = vmatpush.msrb.mxu3 %v9638_v55  ;;  %v7158_v55 = vld [vmem:[#allocation7 + $0x480] sm:$0xf] }
 0x3df   :  { %3562 = vmatpush.msrb.mxu3 %v9641_v18  ;;  %v7159_v18 = vor.u32 %v8520_v42, %v7158_v55  ;;  %v7134_v55 = vld [vmem:[#allocation7 + $0x448] sm:$0xf] }
 0x3e0   :  { %v3303_v39 = vpop.f32.mrf.mxu2  ;;  %v8513_v42 = vld [vmem:[#allocation7 + $0x464] sm:$0xf0] }
 0x3e1   :  { %3563 = vmatpush.msrb.mxu3 %v9644_v5  ;;  %v7163_v5 = vor.u32 %v8516_v25, %v7160_v17  ;;  %4346 = vmatpush.bf16.msra.mxu2 %v7159_v18  ;;  %v8509_v25 = vld [vmem:[#allocation7 + $0x44c] sm:$0xf]  ;;  %v7135_v18 = vor.u32 %v8513_v42, %v7134_v55  ;;  %v7334_v55 = vld [vmem:[#allocation7 + $0x5d0] sm:$0xf] }
 0x3e2   :  { %v9704_v11 = vpop.f32.mrf.mxu0  ;;  %v7136_v17 = vld [vmem:[#allocation7 + $0x468] sm:$0xf0] }
 0x3e3   :  { %3564 = vmatpush.msrb.mxu3 %v9647_v53  ;;  %4372 = vmatpush.bf16.msra.mxu0 %v7163_v5  ;;  %v7126_v53 = vld [vmem:[#allocation7 + $0x440] sm:$0xf]  ;;  %v7139_v5 = vor.u32 %v8509_v25, %v7136_v17  ;;  %v8572_v25 = vld [vmem:[#allocation7 + $0x644] sm:$0xf] }
 0x3e5   :  { %3565 = vmatpush.msrb.mxu3 %v9650_v20  ;;  %v7127_v20 = vor.u32 %v8512_v43, %v7126_v53  ;;  %v7102_v53 = vld [vmem:[#allocation7 + $0x408] sm:$0xf] }
 0x3e6   :  { %7091 = vmatmul.msk.f32.vlgmr.msrb.gmra.mxu3 %vm2478_vm9, %v9680_v24  ;;  %v7096_v24 = vld [vmem:[#allocation7 + $0x420] sm:$0xf0]  ;;  %v8505_v43 = vld [vmem:[#allocation7 + $0x424] sm:$0xf0] }
 0x3e7   :  { %4347 = vmatpush.bf16.msra.mxu2 %v7127_v20  ;;  %4373 = vmatpush.bf16.msra.mxu0 %v7131_v6  ;;  %v7099_v63 = vor.u32 %v8500_v13, %v7096_v24  ;;  %v7103_v20 = vor.u32 %v8505_v43, %v7102_v53  ;;  %v7107_v6 = vor.u32 %v8501_v28, %v7104_v49  ;;  %v8620_v13 = vld [vmem:[#allocation7 + $0x7c4] sm:$0xf]  ;;  %v8558_v53 = vld [vmem:[#allocation7 + $0x5d4] sm:$0xf]  ;;  %v7350_v49 = vld [vmem:[#allocation7 + $0x600] sm:$0xf] }
 0x3e8   :  { %v9706_v57 = vpop.f32.mrf.mxu2  ;;  %v7576_v24 = vld [vmem:[#allocation7 + $0x7e0] sm:$0xf0]  ;;  %v7336_v43 = vld [vmem:[#allocation7 + $0x5f0] sm:$0xf0] }
 0x3e9   :  { %v7579_v2 = vor.u32 %v8620_v13, %v7576_v24  ;;  %v7582_v13 = vld [vmem:[#allocation7 + $0x7c8] sm:$0xf] }
 0x3ea   :  { %v3381_v4 = vpop.f32.mrf.mxu0 }
 0x3eb   :  { %4348 = vmatpush.bf16.msra.mxu2 %v7095_v61  ;;  %4374 = vmatpush.bf16.msra.mxu0 %v7099_v63  ;;  %v7575_v61 = vor.u32 %v8624_v0, %v7574_v58  ;;  %v7542_v63 = vld [vmem:[#allocation7 + $0x780] sm:$0xf]  ;;  %v8564_v58 = vld [vmem:[#allocation7 + $0x604] sm:$0xf] }
 0x3ec   :  { %4380 = vmatpush.bf16.msra.mxu1 %v7579_v2  ;;  %v7352_v0 = vld [vmem:[#allocation7 + $0x620] sm:$0xf0] }
 0x3ed   :  { %4354 = vmatpush.bf16.msra.mxu3 %v7575_v61  ;;  %v8625_v61 = vld [vmem:[#allocation7 + $0x7e4] sm:$0xf0] }
 0x3ef   :  { %4393 = vmatpush.bf16.msrb.mxu2 %v7327_v14  ;;  %4419 = vmatpush.bf16.msrb.mxu0 %v7331_v48  ;;  %v8616_v14 = vld [vmem:[#allocation7 + $0x79c] sm:$0xf0]  ;;  %v7544_v48 = vld [vmem:[#allocation7 + $0x7a0] sm:$0xf0] }
 0x3f0   :  { %v3355_v23 = vpop.f32.mrf.mxu2  ;;  %v7543_v52 = vor.u32 %v8616_v14, %v7542_v63  ;;  %v7547_v15 = vor.u32 %v8612_v27, %v7544_v48  ;;  %v7339_v63 = vor.u32 %v8558_v53, %v7336_v43  ;;  %v7302_v14 = vld [vmem:[#allocation7 + $0x590] sm:$0xf]  ;;  %v8621_v27 = vld [vmem:[#allocation7 + $0x7cc] sm:$0xf]  ;;  %v7208_v53 = vld [vmem:[#allocation7 + $0x4f0] sm:$0xf0] }
 0x3f1   :  { %v7512_v23 = vld [vmem:[#allocation7 + $0x760] sm:$0xf0]  ;;  %v8554_v48 = vld [vmem:[#allocation7 + $0x5ac] sm:$0xf0] }
 0x3f2   :  { %v9708_v31 = vpop.f32.mrf.mxu0  ;;  %4355 = vmatpush.bf16.msra.mxu3 %v7543_v52  ;;  %4381 = vmatpush.bf16.msra.mxu1 %v7547_v15  ;;  %v7515_v19 = vor.u32 %v8604_v40, %v7512_v23  ;;  %v7304_v15 = vld [vmem:[#allocation7 + $0x5b0] sm:$0xf0]  ;;  %v7355_v40 = vor.u32 %v8564_v58, %v7352_v0 }
 0x3f3   :  { %4394 = vmatpush.bf16.msrb.mxu2 %v7295_v46  ;;  %4420 = vmatpush.bf16.msrb.mxu0 %v7299_v41  ;;  %v8608_v46 = vld [vmem:[#allocation7 + $0x75c] sm:$0xf0] }
 0x3f4   :  { %v7511_v41 = vor.u32 %v8608_v46, %v7510_v34 }
 0x3f6   :  { %4356 = vmatpush.bf16.msra.mxu3 %v7511_v41  ;;  %4382 = vmatpush.bf16.msra.mxu1 %v7515_v19  ;;  %v7583_v41 = vor.u32 %v8625_v61, %v7582_v13  ;;  %v8518_v13 = vld [vmem:[#allocation7 + $0x494] sm:$0xf]  ;;  %v7486_v61 = vld [vmem:[#allocation7 + $0x708] sm:$0xf] }
 0x3f7   :  { %4395 = vmatpush.bf16.msrb.mxu2 %v7263_v56  ;;  %4421 = vmatpush.bf16.msrb.mxu0 %v7267_v47  ;;  %v8600_v47 = vld [vmem:[#allocation7 + $0x71c] sm:$0xf0] }
 0x3f8   :  { %v9710_v29 = vpop.f32.mrf.mxu2 }
 0x3fa   :  { %v3433_v26 = vpop.f32.mrf.mxu0 }
 0x3fb   :  { %4396 = vmatpush.bf16.msrb.mxu2 %v7231_v22  ;;  %4422 = vmatpush.bf16.msrb.mxu0 %v7235_v9  ;;  %v7483_v22 = vor.u32 %v8596_v50, %v7480_v35  ;;  %v8592_v9 = vld [vmem:[#allocation7 + $0x6dc] sm:$0xf0]  ;;  %v8546_v50 = vld [vmem:[#allocation7 + $0x56c] sm:$0xf0]  ;;  %v7272_v35 = vld [vmem:[#allocation7 + $0x570] sm:$0xf0] }
 0x3fc   :  { %v7447_v7 = vor.u32 %v8592_v9, %v7446_v8  ;;  %v7414_v26 = vld [vmem:[#allocation7 + $0x680] sm:$0xf] }
 0x3fd   :  { %4383 = vmatpush.bf16.msra.mxu1 %v7483_v22  ;;  %v7415_v10 = vor.u32 %v8584_v1, %v7414_v26  ;;  %v8538_v22 = vld [vmem:[#allocation7 + $0x52c] sm:$0xf0]  ;;  %v7552_v26 = vld [vmem:[#allocation7 + $0x7a8] sm:$0xf0] }
 0x3ff   :  { %4397 = vmatpush.bf16.msrb.mxu2 %v7199_v62  ;;  %4423 = vmatpush.bf16.msrb.mxu0 %v7203_v30  ;;  %v7448_v62 = vld [vmem:[#allocation7 + $0x6e0] sm:$0xf0] }
 0x400   :  { %v3407_v39 = vpop.f32.mrf.mxu2  ;;  %v7451_v45 = vor.u32 %v8588_v3, %v7448_v62  ;;  %v7550_v3 = vld [vmem:[#allocation7 + $0x788] sm:$0xf]  ;;  %v8613_v62 = vld [vmem:[#allocation7 + $0x78c] sm:$0xf] }
 0x402   :  { %4384 = vmatpush.bf16.msra.mxu1 %v7451_v45  ;;  %v8534_v45 = vld [vmem:[#allocation7 + $0x514] sm:$0xf] }
 0x403   :  { %4398 = vmatpush.bf16.msrb.mxu2 %v7167_v59  ;;  %4424 = vmatpush.bf16.msrb.mxu0 %v7171_v60  ;;  %v7416_v59 = vld [vmem:[#allocation7 + $0x6a0] sm:$0xf0]  ;;  %v8576_v60 = vld [vmem:[#allocation7 + $0x65c] sm:$0xf0] }
 0x404   :  { %v7419_v42 = vor.u32 %v8580_v32, %v7416_v59  ;;  %v7383_v28 = vor.u32 %v8576_v60, %v7382_v21  ;;  %v7555_v32 = vor.u32 %v8613_v62, %v7552_v26  ;;  %v8530_v59 = vld [vmem:[#allocation7 + $0x4ec] sm:$0xf0]  ;;  %v8502_v26 = vld [vmem:[#allocation7 + $0x414] sm:$0xf] }
 0x406   :  { %4385 = vmatpush.bf16.msra.mxu1 %v7419_v42  ;;  %v8609_v42 = vld [vmem:[#allocation7 + $0x764] sm:$0xf0] }
 0x407   :  { %4399 = vmatpush.bf16.msrb.mxu2 %v7135_v18  ;;  %4425 = vmatpush.bf16.msrb.mxu0 %v7139_v5  ;;  %v7384_v18 = vld [vmem:[#allocation7 + $0x660] sm:$0xf0]  ;;  %v8562_v5 = vld [vmem:[#allocation7 + $0x5ec] sm:$0xf0] }
 0x408   :  { %v7335_v2 = vor.u32 %v8562_v5, %v7334_v55  ;;  %v7518_v55 = vld [vmem:[#allocation7 + $0x748] sm:$0xf]  ;;  %v8526_v5 = vld [vmem:[#allocation7 + $0x4d4] sm:$0xf] }
 0x409   :  { %v7519_v43 = vor.u32 %v8609_v42, %v7518_v55  ;;  %v7211_v0 = vor.u32 %v8526_v5, %v7208_v53  ;;  %v8573_v42 = vld [vmem:[#allocation7 + $0x64c] sm:$0xf] }
 0x40b   :  { %4400 = vmatpush.bf16.msrb.mxu2 %v7103_v20  ;;  %4426 = vmatpush.bf16.msrb.mxu0 %v7107_v6  ;;  %v7387_v20 = vor.u32 %v8572_v25, %v7384_v18  ;;  %v8568_v6 = vld [vmem:[#allocation7 + $0x61c] sm:$0xf0]  ;;  %v8605_v25 = vld [vmem:[#allocation7 + $0x74c] sm:$0xf] }
 0x40c   :  { %v7351_v34 = vor.u32 %v8568_v6, %v7350_v49  ;;  %v7174_v49 = vld [vmem:[#allocation7 + $0x490] sm:$0xf] }
 0x40d   :  { %4386 = vmatpush.bf16.msra.mxu1 %v7387_v20  ;;  %v8522_v6 = vld [vmem:[#allocation7 + $0x4ac] sm:$0xf0] }
 0x411   :  { %4387 = vmatpush.bf16.msra.mxu1 %v7355_v40 }
 0x412   :  { %v9712_v36 = vpop.f32.mrf.mxu0 }
 0x414   :  { %v3340_v4 = vpop.f32.mrf.mxu1 }
 0x415   :  { %v9715_v54 = vadd.f32 %v3340_v4, %v9691_v51  ;;  %v7479_v51 = vor.u32 %v8600_v47, %v7478_v12  ;;  %v8550_v4 = vld [vmem:[#allocation7 + $0x594] sm:$0xf]  ;;  %v7270_v47 = vld [vmem:[#allocation7 + $0x550] sm:$0xf] }
 0x416   :  { %v7307_v12 = vor.u32 %v8550_v4, %v7304_v15  ;;  %v7271_v8 = vor.u32 %v8546_v50, %v7270_v47  ;;  %v8593_v4 = vld [vmem:[#allocation7 + $0x6e4] sm:$0xf0]  ;;  %v8589_v15 = vld [vmem:[#allocation7 + $0x6cc] sm:$0xf]  ;;  %v8514_v47 = vld [vmem:[#allocation7 + $0x46c] sm:$0xf0] }
 0x417   :  { %4357 = vmatpush.bf16.msra.mxu3 %v7479_v51  ;;  %v8542_v51 = vld [vmem:[#allocation7 + $0x554] sm:$0xf] }
 0x418   :  { %v9717_v44 = vpop.f32.mrf.mxu2  ;;  %v7275_v9 = vor.u32 %v8542_v51, %v7272_v35  ;;  %v8510_v50 = vld [vmem:[#allocation7 + $0x454] sm:$0xf] }
 0x419   :  { %v9719_v56 = vpop.f32.mrf.mxu3  ;;  %v7144_v51 = vld [vmem:[#allocation7 + $0x470] sm:$0xf0] }
 0x41a   :  { %v3485_v16 = vpop.f32.mrf.mxu0 }
 0x41b   :  { %4358 = vmatpush.bf16.msra.mxu3 %v7447_v7  ;;  %v7303_v16 = vor.u32 %v8554_v48, %v7302_v14  ;;  %v8617_v7 = vld [vmem:[#allocation7 + $0x7a4] sm:$0xf0]  ;;  %v7488_v14 = vld [vmem:[#allocation7 + $0x728] sm:$0xf0] }
 0x41c   :  { %v3342_v33 = vpop.f32.mrf.mxu1  ;;  %v7454_v48 = vld [vmem:[#allocation7 + $0x6c8] sm:$0xf] }
 0x41d   :  { %v7238_v33 = vld [vmem:[#allocation7 + $0x510] sm:$0xf]  ;;  %v7455_v40 = vor.u32 %v8593_v4, %v7454_v48  ;;  %v8543_v48 = vld [vmem:[#allocation7 + $0x55c] sm:$0xf] }
 0x41e   :  { %v7239_v60 = vor.u32 %v8538_v22, %v7238_v33  ;;  %v8506_v33 = vld [vmem:[#allocation7 + $0x42c] sm:$0xf0]  ;;  %v7422_v22 = vld [vmem:[#allocation7 + $0x688] sm:$0xf]  ;;  %v7280_v4 = vld [vmem:[#allocation7 + $0x578] sm:$0xf0] }
 0x41f   :  { %4359 = vmatpush.bf16.msra.mxu3 %v7415_v10  ;;  %v7206_v10 = vld [vmem:[#allocation7 + $0x4d0] sm:$0xf] }
 0x420   :  { %v3459_v38 = vpop.f32.mrf.mxu2  ;;  %v7207_v58 = vor.u32 %v8530_v59, %v7206_v10 }
 0x421   :  { %v3316_v30 = vpop.f32.mrf.mxu3  ;;  %v7240_v38 = vld [vmem:[#allocation7 + $0x530] sm:$0xf0] }
 0x422   :  { %v7551_v30 = vor.u32 %v8617_v7, %v7550_v3  ;;  %v7147_v7 = vor.u32 %v8510_v50, %v7144_v51 }
 0x423   :  { %4360 = vmatpush.bf16.msra.mxu3 %v7383_v28  ;;  %v7520_v28 = vld [vmem:[#allocation7 + $0x768] sm:$0xf0] }
 0x424   :  { %v3392_v39 = vpop.f32.mrf.mxu1  ;;  %v7523_v20 = vor.u32 %v8605_v25, %v7520_v28  ;;  %v7392_v25 = vld [vmem:[#allocation7 + $0x668] sm:$0xf0] }
 0x425   :  { %v9722_v17 = vadd.f32 %v3392_v39, %v9704_v11  ;;  %v7584_v11 = vld [vmem:[#allocation7 + $0x7e8] sm:$0xf0]  ;;  %v7243_v39 = vor.u32 %v8534_v45, %v7240_v38  ;;  %v7390_v38 = vld [vmem:[#allocation7 + $0x648] sm:$0xf] }
 0x426   :  { %v7587_v23 = vor.u32 %v8621_v27, %v7584_v11  ;;  %v7424_v45 = vld [vmem:[#allocation7 + $0x6a8] sm:$0xf0] }
 0x427   :  { %4361 = vmatpush.bf16.msra.mxu3 %v7351_v34 }
 0x428   :  { %v3547_v24 = vpop.f32.mrf.mxu2  ;;  %4432 = vmatpush.bf16.msrb.mxu1 %v7587_v23 }
 0x429   :  { %v9724_v52 = vpack.c.bf16 %v3547_v24, %v3547_v24  ;;  %v9726_v46 = vpop.f32.mrf.mxu3  ;;  %v8601_v24 = vld [vmem:[#allocation7 + $0x724] sm:$0xf0] }
 0x42b   :  { %4349 = vmatmul.bf16.vlgmr.msra.gmra.mxu2 %v9724_v52  ;;  %4375 = vmatmul.bf16.vlgmr.msra.gmra.mxu0 %v9724_v52 }
 0x42c   :  { %v3394_v19 = vpop.f32.mrf.mxu1  ;;  %4445 = vmatpush.bf16.msra.mxu2 %v7335_v2  ;;  %4471 = vmatpush.bf16.msra.mxu0 %v7339_v63  ;;  %v7176_v2 = vld [vmem:[#allocation7 + $0x4b0] sm:$0xf0]  ;;  %v8597_v63 = vld [vmem:[#allocation7 + $0x70c] sm:$0xf] }
 0x42d   :  { %4406 = vmatpush.bf16.msrb.mxu3 %v7583_v41  ;;  %4433 = vmatpush.bf16.msrb.mxu1 %v7555_v32  ;;  %v7491_v11 = vor.u32 %v8597_v63, %v7488_v14  ;;  %v7456_v41 = vld [vmem:[#allocation7 + $0x6e8] sm:$0xf0]  ;;  %v7175_v19 = vor.u32 %v8522_v6, %v7174_v49  ;;  %v7342_v32 = vld [vmem:[#allocation7 + $0x5d8] sm:$0xf]  ;;  %v8551_v6 = vld [vmem:[#allocation7 + $0x59c] sm:$0xf] }
 0x42e   :  { %v7459_v35 = vor.u32 %v8589_v15, %v7456_v41  ;;  %v8555_v49 = vld [vmem:[#allocation7 + $0x5b4] sm:$0xf0]  ;;  %v7283_v41 = vor.u32 %v8543_v48, %v7280_v4  ;;  %v7526_v48 = vld [vmem:[#allocation7 + $0x750] sm:$0xf] }
 0x42f   :  { %v7278_v63 = vld [vmem:[#allocation7 + $0x558] sm:$0xf]  ;;  %v8610_v4 = vld [vmem:[#allocation7 + $0x76c] sm:$0xf0] }
 0x430   :  { %4446 = vmatpush.bf16.msra.mxu2 %v7303_v16  ;;  %4472 = vmatpush.bf16.msra.mxu0 %v7307_v12  ;;  %v7179_v16 = vor.u32 %v8518_v13, %v7176_v2  ;;  %v7142_v12 = vld [vmem:[#allocation7 + $0x450] sm:$0xf]  ;;  %v7358_v13 = vld [vmem:[#allocation7 + $0x608] sm:$0xf] }
 0x431   :  { %v3368_v1 = vpop.f32.mrf.mxu3  ;;  %4407 = vmatpush.bf16.msrb.mxu3 %v7551_v30  ;;  %4434 = vmatpush.bf16.msrb.mxu1 %v7523_v20  ;;  %v7143_v3 = vor.u32 %v8514_v47, %v7142_v12  ;;  %v8577_v30 = vld [vmem:[#allocation7 + $0x664] sm:$0xf0]  ;;  %v7310_v20 = vld [vmem:[#allocation7 + $0x598] sm:$0xf]  ;;  %v7248_v12 = vld [vmem:[#allocation7 + $0x538] sm:$0xf0] }
 0x432   :  { %v7112_v1 = vld [vmem:[#allocation7 + $0x430] sm:$0xf0]  ;;  %v7391_v55 = vor.u32 %v8577_v30, %v7390_v38  ;;  %v7311_v2 = vor.u32 %v8555_v49, %v7310_v20  ;;  %v7184_v38 = vld [vmem:[#allocation7 + $0x4b8] sm:$0xf0]  ;;  %v7590_v20 = vld [vmem:[#allocation7 + $0x7d0] sm:$0xf] }
 0x433   :  { %v7115_v53 = vor.u32 %v8502_v26, %v7112_v1  ;;  %v8626_v49 = vld [vmem:[#allocation7 + $0x7ec] sm:$0xf0] }
 0x434   :  { %v3444_v21 = vpop.f32.mrf.mxu1  ;;  %4447 = vmatpush.bf16.msra.mxu2 %v7271_v8  ;;  %4473 = vmatpush.bf16.msra.mxu0 %v7275_v9  ;;  %v8585_v8 = vld [vmem:[#allocation7 + $0x6a4] sm:$0xf0]  ;;  %v8581_v9 = vld [vmem:[#allocation7 + $0x68c] sm:$0xf] }
 0x435   :  { %v9731_v18 = vadd.f32 %v3444_v21, %v9708_v31  ;;  %4408 = vmatpush.bf16.msrb.mxu3 %v7519_v43  ;;  %v7487_v31 = vor.u32 %v8601_v24, %v7486_v61  ;;  %4435 = vmatpush.bf16.msrb.mxu1 %v7491_v11  ;;  %v7423_v62 = vor.u32 %v8585_v8, %v7422_v22  ;;  %v8563_v21 = vld [vmem:[#allocation7 + $0x5f4] sm:$0xf0]  ;;  %v8569_v61 = vld [vmem:[#allocation7 + $0x624] sm:$0xf0]  ;;  %v8565_v24 = vld [vmem:[#allocation7 + $0x60c] sm:$0xf] }
 0x436   :  { %v7427_v10 = vor.u32 %v8581_v9, %v7424_v45  ;;  %v7343_v43 = vor.u32 %v8563_v21, %v7342_v32  ;;  %v7359_v14 = vor.u32 %v8569_v61, %v7358_v13  ;;  %v8547_v11 = vld [vmem:[#allocation7 + $0x574] sm:$0xf0]  ;;  %v8527_v22 = vld [vmem:[#allocation7 + $0x4dc] sm:$0xf]  ;;  %v7591_v13 = vor.u32 %v8626_v49, %v7590_v20 }
 0x437   :  { %v7216_v8 = vld [vmem:[#allocation7 + $0x4f8] sm:$0xf0] }
 0x438   :  { %4448 = vmatpush.bf16.msra.mxu2 %v7239_v60  ;;  %4474 = vmatpush.bf16.msra.mxu0 %v7243_v39  ;;  %v8559_v60 = vld [vmem:[#allocation7 + $0x5dc] sm:$0xf] }
 0x439   :  { %v3418_v27 = vpop.f32.mrf.mxu3  ;;  %4409 = vmatpush.bf16.msrb.mxu3 %v7487_v31  ;;  %4436 = vmatpush.bf16.msrb.mxu1 %v7459_v35  ;;  %v7344_v39 = vld [vmem:[#allocation7 + $0x5f8] sm:$0xf0]  ;;  %v7214_v35 = vld [vmem:[#allocation7 + $0x4d8] sm:$0xf] }
 0x43a   :  { %v9734_v34 = vadd.f32 %v3418_v27, %v9710_v29  ;;  %v7110_v29 = vld [vmem:[#allocation7 + $0x410] sm:$0xf]  ;;  %v7347_v28 = vor.u32 %v8559_v60, %v7344_v39  ;;  %v7360_v27 = vld [vmem:[#allocation7 + $0x628] sm:$0xf0]  ;;  %v8519_v45 = vld [vmem:[#allocation7 + $0x49c] sm:$0xf] }
 0x43b   :  { %4401 = vmatmul.bf16.vlgmr.msrb.gmra.mxu2 %v9724_v52  ;;  %4427 = vmatmul.bf16.vlgmr.msrb.gmra.mxu0 %v9724_v52  ;;  %v7111_v5 = vor.u32 %v8506_v33, %v7110_v29  ;;  %v7363_v15 = vor.u32 %v8565_v24, %v7360_v27  ;;  %v8531_v33 = vld [vmem:[#allocation7 + $0x4f4] sm:$0xf0]  ;;  %v7187_v32 = vor.u32 %v8519_v45, %v7184_v38  ;;  %v8511_v21 = vld [vmem:[#allocation7 + $0x45c] sm:$0xf]  ;;  %v7558_v24 = vld [vmem:[#allocation7 + $0x790] sm:$0xf] }
 0x43c   :  { %v3446_v23 = vpop.f32.mrf.mxu1  ;;  %4449 = vmatpush.bf16.msra.mxu2 %v7207_v58  ;;  %4475 = vmatpush.bf16.msra.mxu0 %v7211_v0  ;;  %v7312_v58 = vld [vmem:[#allocation7 + $0x5b8] sm:$0xf0]  ;;  %v7395_v0 = vor.u32 %v8573_v42, %v7392_v25  ;;  %v7215_v9 = vor.u32 %v8531_v33, %v7214_v35  ;;  %v7118_v42 = vld [vmem:[#allocation7 + $0x418] sm:$0xf]  ;;  %v8594_v35 = vld [vmem:[#allocation7 + $0x6ec] sm:$0xf0] }
 0x43d   :  { %4410 = vmatpush.bf16.msrb.mxu3 %v7455_v40  ;;  %4437 = vmatpush.bf16.msrb.mxu1 %v7427_v10  ;;  %v7315_v31 = vor.u32 %v8551_v6, %v7312_v58  ;;  %v7279_v40 = vor.u32 %v8547_v11, %v7278_v63  ;;  %v7246_v23 = vld [vmem:[#allocation7 + $0x518] sm:$0xf]  ;;  %v7152_v60 = vld [vmem:[#allocation7 + $0x478] sm:$0xf0]  ;;  %v8622_v6 = vld [vmem:[#allocation7 + $0x7d4] sm:$0xf] }
 0x43e   :  { %v7150_v10 = vld [vmem:[#allocation7 + $0x458] sm:$0xf]  ;;  %v7592_v58 = vld [vmem:[#allocation7 + $0x7f0] sm:$0xf0] }
 0x43f   :  { %v8507_v25 = vld [vmem:[#allocation7 + $0x434] sm:$0xf0]  ;;  %v7595_v61 = vor.u32 %v8622_v6, %v7592_v58  ;;  %v8614_v63 = vld [vmem:[#allocation7 + $0x794] sm:$0xf] }
 0x440   :  { %4450 = vmatpush.bf16.msra.mxu2 %v7175_v19  ;;  %4476 = vmatpush.bf16.msra.mxu0 %v7179_v16  ;;  %v8539_v19 = vld [vmem:[#allocation7 + $0x534] sm:$0xf0]  ;;  %v8535_v16 = vld [vmem:[#allocation7 + $0x51c] sm:$0xf]  ;;  %v8590_v33 = vld [vmem:[#allocation7 + $0x6d4] sm:$0xf] }
 0x441   :  { %v3420_v59 = vpop.f32.mrf.mxu3  ;;  %4411 = vmatpush.bf16.msrb.mxu3 %v7423_v62  ;;  %4438 = vmatpush.bf16.msrb.mxu1 %v7395_v0  ;;  %v7247_v50 = vor.u32 %v8539_v19, %v7246_v23  ;;  %v7251_v51 = vor.u32 %v8535_v16, %v7248_v12  ;;  %v8523_v62 = vld [vmem:[#allocation7 + $0x4b4] sm:$0xf0]  ;;  %v7494_v19 = vld [vmem:[#allocation7 + $0x710] sm:$0xf]  ;;  %v8598_v12 = vld [vmem:[#allocation7 + $0x714] sm:$0xf] }
 0x442   :  { %v8515_v59 = vld [vmem:[#allocation7 + $0x474] sm:$0xf0]  ;;  %v8602_v16 = vld [vmem:[#allocation7 + $0x72c] sm:$0xf0]  ;;  %v7432_v45 = vld [vmem:[#allocation7 + $0x6b0] sm:$0xf0] }
 0x443   :  { %v7151_v39 = vor.u32 %v8515_v59, %v7150_v10  ;;  %v7400_v10 = vld [vmem:[#allocation7 + $0x670] sm:$0xf0]  ;;  %v7566_v6 = vld [vmem:[#allocation7 + $0x798] sm:$0xf] }
 0x444   :  { %4451 = vmatpush.bf16.msra.mxu2 %v7143_v3  ;;  %4477 = vmatpush.bf16.msra.mxu0 %v7147_v7  ;;  %v7219_v3 = vor.u32 %v8527_v22, %v7216_v8  ;;  %v7182_v7 = vld [vmem:[#allocation7 + $0x498] sm:$0xf]  ;;  %v7464_v22 = vld [vmem:[#allocation7 + $0x6f0] sm:$0xf0] }
 0x445   :  { %4412 = vmatpush.bf16.msrb.mxu3 %v7391_v55  ;;  %4439 = vmatpush.bf16.msrb.mxu1 %v7363_v15  ;;  %v7155_v55 = vor.u32 %v8511_v21, %v7152_v60  ;;  %v8606_v15 = vld [vmem:[#allocation7 + $0x754] sm:$0xf]  ;;  %v7366_v60 = vld [vmem:[#allocation7 + $0x610] sm:$0xf]  ;;  %v8619_v58 = vld [vmem:[#allocation7 + $0x7b4] sm:$0xf0] }
 0x448   :  { %4452 = vmatpush.bf16.msra.mxu2 %v7111_v5  ;;  %4478 = vmatpush.bf16.msra.mxu0 %v7115_v53  ;;  %v8503_v5 = vld [vmem:[#allocation7 + $0x41c] sm:$0xf] }
 0x449   :  { %4413 = vmatpush.bf16.msrb.mxu3 %v7359_v14  ;;  %v7120_v53 = vld [vmem:[#allocation7 + $0x438] sm:$0xf0]  ;;  %v7560_v14 = vld [vmem:[#allocation7 + $0x7b0] sm:$0xf0] }
 0x44a   :  { %v7563_v11 = vor.u32 %v8614_v63, %v7560_v14  ;;  %v8611_v63 = vld [vmem:[#allocation7 + $0x774] sm:$0xf0]  ;;  %v8607_v14 = vld [vmem:[#allocation7 + $0x75c] sm:$0xf] }
 0x44b   :  { %4453 = vmatmul.bf16.vlgmr.msra.gmra.mxu2 %v9724_v52  ;;  %4479 = vmatmul.bf16.vlgmr.msra.gmra.mxu0 %v9724_v52 }
 0x44c   :  { %4497 = vmatpush.bf16.msrb.mxu2 %v7343_v43  ;;  %4523 = vmatpush.bf16.msrb.mxu0 %v7347_v28  ;;  %v7123_v28 = vor.u32 %v8503_v5, %v7120_v53  ;;  %v8627_v5 = vld [vmem:[#allocation7 + $0x7f4] sm:$0xf0]  ;;  %v8623_v53 = vld [vmem:[#allocation7 + $0x7dc] sm:$0xf] }
 0x450   :  { %4498 = vmatpush.bf16.msrb.mxu2 %v7311_v2  ;;  %4524 = vmatpush.bf16.msrb.mxu0 %v7315_v31  ;;  %v8618_v31 = vld [vmem:[#allocation7 + $0x7ac] sm:$0xf0] }
 0x451   :  { %v7559_v27 = vor.u32 %v8618_v31, %v7558_v24  ;;  %v7534_v31 = vld [vmem:[#allocation7 + $0x758] sm:$0xf] }
 0x454   :  { %v3496_v47 = vpop.f32.mrf.mxu1  ;;  %4499 = vmatpush.bf16.msrb.mxu2 %v7279_v40  ;;  %4525 = vmatpush.bf16.msrb.mxu0 %v7283_v41  ;;  %v7528_v40 = vld [vmem:[#allocation7 + $0x770] sm:$0xf0]  ;;  %v7527_v41 = vor.u32 %v8610_v4, %v7526_v48  ;;  %v8643_v48 = vld [vmem:[#allocation8 + $0x74] sm:$0xf0] }
 0x455   :  { %v9741_v29 = vadd.f32 %v3496_v47, %v9712_v36  ;;  %v7183_v36 = vor.u32 %v8523_v62, %v7182_v7  ;;  %v7531_v23 = vor.u32 %v8606_v15, %v7528_v40  ;;  %v7495_v47 = vor.u32 %v8602_v16, %v7494_v19  ;;  %v8586_v7 = vld [vmem:[#allocation7 + $0x6ac] sm:$0xf0]  ;;  %v8582_v62 = vld [vmem:[#allocation7 + $0x694] sm:$0xf]  ;;  %v8599_v19 = vld [vmem:[#allocation7 + $0x71c] sm:$0xf] }
 0x456   :  { %v7535_v15 = vor.u32 %v8611_v63, %v7534_v31  ;;  %v7504_v16 = vld [vmem:[#allocation7 + $0x738] sm:$0xf0] }
 0x458   :  { %4500 = vmatpush.bf16.msrb.mxu2 %v7247_v50  ;;  %4526 = vmatpush.bf16.msrb.mxu0 %v7251_v51  ;;  %v7462_v51 = vld [vmem:[#allocation7 + $0x6d0] sm:$0xf] }
 0x459   :  { %v3470_v30 = vpop.f32.mrf.mxu3  ;;  %v7463_v8 = vor.u32 %v8594_v35, %v7462_v51  ;;  %v7507_v51 = vor.u32 %v8599_v19, %v7504_v16  ;;  %v7470_v35 = vld [vmem:[#allocation7 + $0x6d8] sm:$0xf]  ;;  %v7846_v16 = vld [vmem:[#allocation8 + $0x1e0] sm:$0xf] }
 0x45a   :  { %v9744_v26 = vadd.f32 %v3470_v30, %v9717_v44  ;;  %v7119_v44 = vor.u32 %v8507_v25, %v7118_v42  ;;  %v7435_v30 = vor.u32 %v8582_v62, %v7432_v45  ;;  %v7368_v42 = vld [vmem:[#allocation7 + $0x630] sm:$0xf0]  ;;  %v7598_v25 = vld [vmem:[#allocation7 + $0x7d8] sm:$0xf] }
 0x45b   :  { %v7599_v20 = vor.u32 %v8627_v5, %v7598_v25  ;;  %v7408_v25 = vld [vmem:[#allocation7 + $0x678] sm:$0xf0]  ;;  %v7630_v5 = vld [vmem:[#allocation8 + $0x30] sm:$0xf] }
 0x45c   :  { %v3498_v1 = vpop.f32.mrf.mxu1  ;;  %4501 = vmatpush.bf16.msrb.mxu2 %v7215_v9  ;;  %4527 = vmatpush.bf16.msrb.mxu0 %v7219_v3  ;;  %v7467_v9 = vor.u32 %v8590_v33, %v7464_v22  ;;  %v7430_v3 = vld [vmem:[#allocation7 + $0x690] sm:$0xf]  ;;  %v8595_v33 = vld [vmem:[#allocation7 + $0x6f4] sm:$0xf0]  ;;  %v8591_v22 = vld [vmem:[#allocation7 + $0x6dc] sm:$0xf] }
 0x45d   :  { %v7431_v38 = vor.u32 %v8586_v7, %v7430_v3  ;;  %v7398_v1 = vld [vmem:[#allocation7 + $0x650] sm:$0xf]  ;;  %v8639_v3 = vld [vmem:[#allocation8 + $0x54] sm:$0xf0]  ;;  %v7471_v62 = vor.u32 %v8595_v33, %v7470_v35  ;;  %v7606_v35 = vld [vmem:[#allocation8] sm:$0xf] }
 0x45e   :  { %v8629_v33 = vld [vmem:[#allocation8 + $0x4] sm:$0xf0] }
 0x460   :  { %4502 = vmatpush.bf16.msrb.mxu2 %v7183_v36  ;;  %4528 = vmatpush.bf16.msrb.mxu0 %v7187_v32  ;;  %v8578_v36 = vld [vmem:[#allocation7 + $0x66c] sm:$0xf0]  ;;  %v8574_v32 = vld [vmem:[#allocation7 + $0x654] sm:$0xf] }
 0x461   :  { %v3472_v43 = vpop.f32.mrf.mxu3  ;;  %v7399_v59 = vor.u32 %v8578_v36, %v7398_v1  ;;  %v7403_v21 = vor.u32 %v8574_v32, %v7400_v10  ;;  %v8583_v1 = vld [vmem:[#allocation7 + $0x69c] sm:$0xf]  ;;  %v7638_v32 = vld [vmem:[#allocation8 + $0x40] sm:$0xf]  ;;  %v8637_v10 = vld [vmem:[#allocation8 + $0x44] sm:$0xf0] }
 0x462   :  { %v7600_v43 = vld [vmem:[#allocation7 + $0x7f8] sm:$0xf0] }
 0x463   :  { %v7603_v49 = vor.u32 %v8623_v53, %v7600_v43  ;;  %v7440_v36 = vld [vmem:[#allocation7 + $0x6b8] sm:$0xf0]  ;;  %v8635_v53 = vld [vmem:[#allocation8 + $0x34] sm:$0xf0] }
 0x464   :  { %4503 = vmatpush.bf16.msrb.mxu2 %v7151_v39  ;;  %4529 = vmatpush.bf16.msrb.mxu0 %v7155_v55  ;;  %v8570_v39 = vld [vmem:[#allocation7 + $0x62c] sm:$0xf0]  ;;  %v8566_v55 = vld [vmem:[#allocation7 + $0x614] sm:$0xf]  ;;  %v7631_v43 = vor.u32 %v8635_v53, %v7630_v5 }
 0x468   :  { %4504 = vmatpush.bf16.msrb.mxu2 %v7119_v44  ;;  %4530 = vmatpush.bf16.msrb.mxu0 %v7123_v28  ;;  %v7367_v44 = vor.u32 %v8570_v39, %v7366_v60  ;;  %v7371_v28 = vor.u32 %v8566_v55, %v7368_v42  ;;  %v7443_v60 = vor.u32 %v8583_v1, %v7440_v36  ;;  %v7406_v39 = vld [vmem:[#allocation7 + $0x658] sm:$0xf]  ;;  %v8575_v42 = vld [vmem:[#allocation7 + $0x65c] sm:$0xf] }
 0x469   :  { %v3567_v0 = vpop.f32.mrf.mxu3  ;;  %v8579_v55 = vld [vmem:[#allocation7 + $0x674] sm:$0xf0] }
 0x46a   :  { %v9746_v2 = vpack.c.bf16 %v3567_v0, %v3567_v0  ;;  %v8615_v0 = vld [vmem:[#allocation7 + $0x79c] sm:$0xf]  ;;  %v8687_v1 = vld [vmem:[#allocation8 + $0x1d4] sm:$0xf0] }
 0x46b   :  { %4505 = vmatmul.bf16.vlgmr.msrb.gmra.mxu2 %v9724_v52  ;;  %4531 = vmatmul.bf16.vlgmr.msrb.gmra.mxu0 %v9724_v52  ;;  %v7496_v52 = vld [vmem:[#allocation7 + $0x730] sm:$0xf0] }
 0x46c   :  { %4362 = vmatmul.bf16.vlgmr.msra.gmra.mxu3 %v9746_v2  ;;  %4388 = vmatmul.bf16.vlgmr.msra.gmra.mxu1 %v9746_v2  ;;  %v7499_v50 = vor.u32 %v8598_v12, %v7496_v52  ;;  %v7654_v12 = vld [vmem:[#allocation8 + $0x60] sm:$0xf]  ;;  %v8641_v52 = vld [vmem:[#allocation8 + $0x64] sm:$0xf0] }
 0x46d   :  { %4458 = vmatpush.bf16.msra.mxu3 %v7591_v13  ;;  %4484 = vmatpush.bf16.msra.mxu1 %v7595_v61  ;;  %v7568_v13 = vld [vmem:[#allocation7 + $0x7b8] sm:$0xf0]  ;;  %v7567_v61 = vor.u32 %v8619_v58, %v7566_v6 }
 0x46e   :  { %v7571_v24 = vor.u32 %v8615_v0, %v7568_v13  ;;  %v8567_v6 = vld [vmem:[#allocation7 + $0x61c] sm:$0xf]  ;;  %v7622_v0 = vld [vmem:[#allocation8 + $0x20] sm:$0xf]  ;;  %v8633_v13 = vld [vmem:[#allocation8 + $0x24] sm:$0xf0] }
 0x46f   :  { %v7376_v58 = vld [vmem:[#allocation7 + $0x638] sm:$0xf0]  ;;  %v7623_v31 = vor.u32 %v8633_v13, %v7622_v0  ;;  %v8703_v13 = vld [vmem:[#allocation8 + $0x254] sm:$0xf0] }
 0x471   :  { %4459 = vmatpush.bf16.msra.mxu3 %v7559_v27  ;;  %4485 = vmatpush.bf16.msra.mxu1 %v7563_v11  ;;  %v7536_v27 = vld [vmem:[#allocation7 + $0x778] sm:$0xf0]  ;;  %v7662_v11 = vld [vmem:[#allocation8 + $0x70] sm:$0xf] }
 0x472   :  { %v7663_v4 = vor.u32 %v8643_v48, %v7662_v11  ;;  %v7539_v40 = vor.u32 %v8607_v14, %v7536_v27  ;;  %v7379_v14 = vor.u32 %v8567_v6, %v7376_v58  ;;  %v7718_v11 = vld [vmem:[#allocation8 + $0xe0] sm:$0xf]  ;;  %v7854_v48 = vld [vmem:[#allocation8 + $0x1f0] sm:$0xf]  ;;  %v8671_v6 = vld [vmem:[#allocation8 + $0x154] sm:$0xf0] }
 0x473   :  { %v7902_v58 = vld [vmem:[#allocation8 + $0x250] sm:$0xf] }
 0x474   :  { %5363 = vmatpush.bf16.msra.mxu2 %v7663_v4  ;;  %v8691_v4 = vld [vmem:[#allocation8 + $0x1f4] sm:$0xf0] }
 0x475   :  { %4460 = vmatpush.bf16.msra.mxu3 %v7527_v41  ;;  %4486 = vmatpush.bf16.msra.mxu1 %v7531_v23  ;;  %v7502_v41 = vld [vmem:[#allocation7 + $0x718] sm:$0xf] }
 0x476   :  { %v8603_v23 = vld [vmem:[#allocation7 + $0x734] sm:$0xf0] }
 0x479   :  { %4461 = vmatpush.bf16.msra.mxu3 %v7495_v47  ;;  %4487 = vmatpush.bf16.msra.mxu1 %v7499_v50  ;;  %v7655_v47 = vor.u32 %v8641_v52, %v7654_v12  ;;  %v7503_v50 = vor.u32 %v8603_v23, %v7502_v41  ;;  %v7614_v41 = vld [vmem:[#allocation8 + $0x10] sm:$0xf]  ;;  %v8631_v23 = vld [vmem:[#allocation8 + $0x14] sm:$0xf0]  ;;  %v8689_v12 = vld [vmem:[#allocation8 + $0x1e4] sm:$0xf0] }
 0x47a   :  { %v7615_v19 = vor.u32 %v8631_v23, %v7614_v41  ;;  %v8645_v41 = vld [vmem:[#allocation8 + $0x84] sm:$0xf0] }
 0x47b   :  { %5364 = vmatpush.bf16.msra.mxu2 %v7655_v47  ;;  %v7710_v47 = vld [vmem:[#allocation8 + $0xd0] sm:$0xf] }
 0x47c   :  { %4414 = vmatmul.bf16.vlgmr.msrb.gmra.mxu3 %v9746_v2  ;;  %4440 = vmatmul.bf16.vlgmr.msrb.gmra.mxu1 %v9746_v2 }
 0x47d   :  { %4462 = vmatpush.bf16.msra.mxu3 %v7463_v8  ;;  %4488 = vmatpush.bf16.msra.mxu1 %v7467_v9  ;;  %v7472_v8 = vld [vmem:[#allocation7 + $0x6f8] sm:$0xf0]  ;;  %v7646_v9 = vld [vmem:[#allocation8 + $0x50] sm:$0xf] }
 0x47e   :  { %v7647_v7 = vor.u32 %v8639_v3, %v7646_v9  ;;  %v7475_v45 = vor.u32 %v8591_v22, %v7472_v8  ;;  %v7790_v22 = vld [vmem:[#allocation8 + $0x170] sm:$0xf]  ;;  %v7607_v8 = vor.u32 %v8629_v33, %v7606_v35  ;;  %v8675_v9 = vld [vmem:[#allocation8 + $0x174] sm:$0xf0] }
 0x47f   :  { %v7918_v3 = vld [vmem:[#allocation8 + $0x270] sm:$0xf] }
 0x480   :  { %5365 = vmatpush.bf16.msra.mxu2 %v7647_v7  ;;  %v8707_v7 = vld [vmem:[#allocation8 + $0x274] sm:$0xf0] }
 0x481   :  { %4463 = vmatpush.bf16.msra.mxu3 %v7431_v38  ;;  %4489 = vmatpush.bf16.msra.mxu1 %v7435_v30  ;;  %v7438_v38 = vld [vmem:[#allocation7 + $0x698] sm:$0xf] }
 0x482   :  { %v8587_v30 = vld [vmem:[#allocation7 + $0x6b4] sm:$0xf0] }
 0x485   :  { %4464 = vmatpush.bf16.msra.mxu3 %v7399_v59  ;;  %4490 = vmatpush.bf16.msra.mxu1 %v7403_v21  ;;  %v7639_v59 = vor.u32 %v8637_v10, %v7638_v32  ;;  %v7439_v21 = vor.u32 %v8587_v30, %v7438_v38  ;;  %v7919_v38 = vor.u32 %v8707_v7, %v7918_v3  ;;  %v7838_v30 = vld [vmem:[#allocation8 + $0x1d0] sm:$0xf]  ;;  %v7702_v32 = vld [vmem:[#allocation8 + $0xc0] sm:$0xf]  ;;  %v8653_v10 = vld [vmem:[#allocation8 + $0xc4] sm:$0xf0] }
 0x486   :  { %v7703_v53 = vor.u32 %v8653_v10, %v7702_v32  ;;  %v7822_v7 = vld [vmem:[#allocation8 + $0x1b0] sm:$0xf]  ;;  %v8669_v32 = vld [vmem:[#allocation8 + $0x144] sm:$0xf0] }
 0x487   :  { %5366 = vmatpush.bf16.msra.mxu2 %v7639_v59  ;;  %v7839_v59 = vor.u32 %v8687_v1, %v7838_v30  ;;  %v8717_v30 = vld [vmem:[#allocation8 + $0x2c4] sm:$0xf0] }
 0x489   :  { %4465 = vmatpush.bf16.msra.mxu3 %v7367_v44  ;;  %4491 = vmatpush.bf16.msra.mxu1 %v7371_v28  ;;  %v7407_v44 = vor.u32 %v8579_v55, %v7406_v39  ;;  %v7411_v28 = vor.u32 %v8575_v42, %v7408_v25  ;;  %v8705_v55 = vld [vmem:[#allocation8 + $0x264] sm:$0xf0]  ;;  %v7830_v42 = vld [vmem:[#allocation8 + $0x1c0] sm:$0xf] }
 0x48a   :  { %v8685_v25 = vld [vmem:[#allocation8 + $0x1c4] sm:$0xf0] }
 0x48b   :  { %5367 = vmatpush.bf16.msra.mxu2 %v7631_v43  ;;  %v7694_v43 = vld [vmem:[#allocation8 + $0xb0] sm:$0xf] }
 0x48c   :  { %4466 = vmatmul.bf16.vlgmr.msra.gmra.mxu3 %v9746_v2  ;;  %4492 = vmatmul.bf16.vlgmr.msra.gmra.mxu1 %v9746_v2 }
 0x48d   :  { %4510 = vmatpush.bf16.msrb.mxu3 %v7599_v20  ;;  %4536 = vmatpush.bf16.msrb.mxu1 %v7603_v49  ;;  %v7374_v20 = vld [vmem:[#allocation7 + $0x618] sm:$0xf] }
 0x48e   :  { %v8571_v49 = vld [vmem:[#allocation7 + $0x634] sm:$0xf0] }
 0x48f   :  { %v7375_v63 = vor.u32 %v8571_v49, %v7374_v20  ;;  %5368 = vmatpush.bf16.msra.mxu2 %v7623_v31  ;;  %v7774_v49 = vld [vmem:[#allocation8 + $0x150] sm:$0xf] }
 0x490   :  { %v7775_v0 = vor.u32 %v8671_v6, %v7774_v49  ;;  %v7886_v49 = vld [vmem:[#allocation8 + $0x230] sm:$0xf]  ;;  %v8699_v6 = vld [vmem:[#allocation8 + $0x234] sm:$0xf0] }
 0x491   :  { %4511 = vmatpush.bf16.msrb.mxu3 %v7567_v61  ;;  %4537 = vmatpush.bf16.msrb.mxu1 %v7571_v24  ;;  %v7726_v61 = vld [vmem:[#allocation8 + $0xf0] sm:$0xf]  ;;  %v8659_v24 = vld [vmem:[#allocation8 + $0xf4] sm:$0xf0] }
 0x492   :  { %v7727_v27 = vor.u32 %v8659_v24, %v7726_v61  ;;  %v7903_v24 = vor.u32 %v8703_v13, %v7902_v58  ;;  %v7887_v13 = vor.u32 %v8699_v6, %v7886_v49  ;;  %v8094_v49 = vld [vmem:[#allocation8 + $0x3d0] sm:$0xf]  ;;  %v8751_v6 = vld [vmem:[#allocation8 + $0x3d4] sm:$0xf0] }
 0x493   :  { %5369 = vmatpush.bf16.msra.mxu2 %v7615_v19  ;;  %v7982_v19 = vld [vmem:[#allocation8 + $0x2f0] sm:$0xf] }
 0x495   :  { %4512 = vmatpush.bf16.msrb.mxu3 %v7535_v15  ;;  %4538 = vmatpush.bf16.msrb.mxu1 %v7539_v40  ;;  %v8657_v15 = vld [vmem:[#allocation8 + $0xe4] sm:$0xf0]  ;;  %v7855_v40 = vor.u32 %v8691_v4, %v7854_v48  ;;  %v8647_v48 = vld [vmem:[#allocation8 + $0x94] sm:$0xf0] }
 0x496   :  { %v7719_v52 = vor.u32 %v8657_v15, %v7718_v11  ;;  %v7678_v11 = vld [vmem:[#allocation8 + $0x90] sm:$0xf] }
 0x497   :  { %5370 = vmatpush.bf16.msra.mxu2 %v7607_v8  ;;  %v7679_v15 = vor.u32 %v8647_v48, %v7678_v11  ;;  %v8719_v8 = vld [vmem:[#allocation8 + $0x2d4] sm:$0xf0]  ;;  %v8665_v11 = vld [vmem:[#allocation8 + $0x124] sm:$0xf0] }
 0x499   :  { %4513 = vmatpush.bf16.msrb.mxu3 %v7503_v50  ;;  %4539 = vmatpush.bf16.msrb.mxu1 %v7507_v51  ;;  %v8655_v50 = vld [vmem:[#allocation8 + $0xd4] sm:$0xf0]  ;;  %v7847_v51 = vor.u32 %v8689_v12, %v7846_v16 }
 0x49a   :  { %v7711_v36 = vor.u32 %v8655_v50, %v7710_v47  ;;  %v8723_v16 = vld [vmem:[#allocation8 + $0x2f4] sm:$0xf0]  ;;  %v7974_v50 = vld [vmem:[#allocation8 + $0x2e0] sm:$0xf] }
 0x49b   :  { %5415 = vmatpush.bf16.msrb.mxu2 %v7919_v38  ;;  %v7958_v38 = vld [vmem:[#allocation8 + $0x2c0] sm:$0xf] }
 0x49d   :  { %4514 = vmatpush.bf16.msrb.mxu3 %v7471_v62  ;;  %4540 = vmatpush.bf16.msrb.mxu1 %v7475_v45  ;;  %v7791_v45 = vor.u32 %v8675_v9, %v7790_v22  ;;  %v7966_v22 = vld [vmem:[#allocation8 + $0x2d0] sm:$0xf] }
 0x49e   :  { %v7967_v9 = vor.u32 %v8719_v8, %v7966_v22  ;;  %v7742_v22 = vld [vmem:[#allocation8 + $0x110] sm:$0xf]  ;;  %v8663_v8 = vld [vmem:[#allocation8 + $0x114] sm:$0xf0] }
 0x49f   :  { %5389 = vmatpush.bf16.msra.mxu0 %v7791_v45  ;;  %v8683_v45 = vld [vmem:[#allocation8 + $0x1b4] sm:$0xf0] }
 0x4a0   :  { %v7823_v1 = vor.u32 %v8683_v45, %v7822_v7  ;;  %v7870_v7 = vld [vmem:[#allocation8 + $0x210] sm:$0xf] }
 0x4a1   :  { %4515 = vmatpush.bf16.msrb.mxu3 %v7439_v21  ;;  %4541 = vmatpush.bf16.msrb.mxu1 %v7443_v60  ;;  %v7782_v21 = vld [vmem:[#allocation8 + $0x160] sm:$0xf] }
 0x4a2   :  { %v7910_v60 = vld [vmem:[#allocation8 + $0x260] sm:$0xf] }
 0x4a3   :  { %v7911_v5 = vor.u32 %v8705_v55, %v7910_v60  ;;  %v8681_v55 = vld [vmem:[#allocation8 + $0x1a4] sm:$0xf0] }
 0x4a5   :  { %4516 = vmatpush.bf16.msrb.mxu3 %v7407_v44  ;;  %4542 = vmatpush.bf16.msrb.mxu1 %v7411_v28  ;;  %v8651_v44 = vld [vmem:[#allocation8 + $0xb4] sm:$0xf0]  ;;  %v7831_v28 = vor.u32 %v8685_v25, %v7830_v42  ;;  %v7950_v25 = vld [vmem:[#allocation8 + $0x2b0] sm:$0xf] }
 0x4a6   :  { %5416 = vmatpush.bf16.msrb.mxu2 %v7911_v5  ;;  %v7695_v31 = vor.u32 %v8651_v44, %v7694_v43  ;;  %v8715_v5 = vld [vmem:[#allocation8 + $0x2b4] sm:$0xf0]  ;;  %v7758_v43 = vld [vmem:[#allocation8 + $0x130] sm:$0xf] }
 0x4a7   :  { %v8667_v44 = vld [vmem:[#allocation8 + $0x134] sm:$0xf0]  ;;  %v7951_v58 = vor.u32 %v8715_v5, %v7950_v25  ;;  %v8693_v25 = vld [vmem:[#allocation8 + $0x204] sm:$0xf0] }
 0x4a8   :  { %v9758_v62 = vpop.f32.mrf.mxu0 }
 0x4a9   :  { %4517 = vmatpush.bf16.msrb.mxu3 %v7375_v63  ;;  %4543 = vmatpush.bf16.msrb.mxu1 %v7379_v14  ;;  %v7686_v63 = vld [vmem:[#allocation8 + $0xa0] sm:$0xf]  ;;  %v8649_v14 = vld [vmem:[#allocation8 + $0xa4] sm:$0xf0] }
 0x4aa   :  { %5417 = vmatpush.bf16.msrb.mxu2 %v7903_v24  ;;  %v8679_v24 = vld [vmem:[#allocation8 + $0x194] sm:$0xf0] }
 0x4ac   :  { %4518 = vmatmul.bf16.vlgmr.msrb.gmra.mxu3 %v9746_v2  ;;  %4544 = vmatmul.bf16.vlgmr.msrb.gmra.mxu1 %v9746_v2  ;;  %v8673_v2 = vld [vmem:[#allocation8 + $0x164] sm:$0xf0] }
 0x4ad   :  { %5376 = vmatpush.bf16.msra.mxu3 %v7727_v27  ;;  %5402 = vmatpush.bf16.msra.mxu1 %v7855_v40  ;;  %v7783_v39 = vor.u32 %v8673_v2, %v7782_v21  ;;  %v7687_v27 = vor.u32 %v8649_v14, %v7686_v63  ;;  %v7670_v40 = vld [vmem:[#allocation8 + $0x80] sm:$0xf]  ;;  %v8701_v21 = vld [vmem:[#allocation8 + $0x244] sm:$0xf0]  ;;  %v7959_v2 = vor.u32 %v8717_v30, %v7958_v38 }
 0x4ae   :  { %v9760_v20 = vpop.f32.mrf.mxu2  ;;  %v7671_v12 = vor.u32 %v8645_v41, %v7670_v40  ;;  %v8713_v63 = vld [vmem:[#allocation8 + $0x2a4] sm:$0xf0]  ;;  %v7926_v38 = vld [vmem:[#allocation8 + $0x280] sm:$0xf] }
 0x4af   :  { %5390 = vmatpush.bf16.msra.mxu0 %v7783_v39  ;;  %v7814_v39 = vld [vmem:[#allocation8 + $0x1a0] sm:$0xf] }
 0x4b0   :  { %v4378_v61 = vpop.f32.mrf.mxu0 }
 0x4b1   :  { %5377 = vmatpush.bf16.msra.mxu3 %v7719_v52  ;;  %5403 = vmatpush.bf16.msra.mxu1 %v7847_v51  ;;  %v7983_v52 = vor.u32 %v8723_v16, %v7982_v19  ;;  %v8721_v51 = vld [vmem:[#allocation8 + $0x2e4] sm:$0xf0]  ;;  %v7806_v61 = vld [vmem:[#allocation8 + $0x190] sm:$0xf]  ;;  %v7798_v19 = vld [vmem:[#allocation8 + $0x180] sm:$0xf] }
 0x4b2   :  { %v7975_v35 = vor.u32 %v8721_v51, %v7974_v50  ;;  %v7807_v14 = vor.u32 %v8679_v24, %v7806_v61  ;;  %v8677_v16 = vld [vmem:[#allocation8 + $0x184] sm:$0xf0]  ;;  %v8711_v50 = vld [vmem:[#allocation8 + $0x294] sm:$0xf0] }
 0x4b3   :  { %5391 = vmatpush.bf16.msra.mxu0 %v7775_v0  ;;  %v7799_v51 = vor.u32 %v8677_v16, %v7798_v19  ;;  %v8737_v61 = vld [vmem:[#allocation8 + $0x364] sm:$0xf0] }
 0x4b5   :  { %5378 = vmatpush.bf16.msra.mxu3 %v7711_v36  ;;  %5404 = vmatpush.bf16.msra.mxu1 %v7839_v59  ;;  %v7766_v36 = vld [vmem:[#allocation8 + $0x140] sm:$0xf] }
 0x4b6   :  { %v4352_v4 = vpop.f32.mrf.mxu2  ;;  %v7767_v10 = vor.u32 %v8669_v32, %v7766_v36  ;;  %v7894_v59 = vld [vmem:[#allocation8 + $0x240] sm:$0xf]  ;;  %v8709_v36 = vld [vmem:[#allocation8 + $0x284] sm:$0xf0] }
 0x4b7   :  { %v7895_v60 = vor.u32 %v8701_v21, %v7894_v59  ;;  %v7878_v4 = vld [vmem:[#allocation8 + $0x220] sm:$0xf]  ;;  %v8753_v59 = vld [vmem:[#allocation8 + $0x3e4] sm:$0xf0]  ;;  %v7927_v5 = vor.u32 %v8709_v36, %v7926_v38  ;;  %v8731_v38 = vld [vmem:[#allocation8 + $0x334] sm:$0xf0] }
 0x4b8   :  { %v9762_v23 = vpop.f32.mrf.mxu0  ;;  %5392 = vmatpush.bf16.msra.mxu0 %v7767_v10  ;;  %v8102_v10 = vld [vmem:[#allocation8 + $0x3e0] sm:$0xf] }
 0x4b9   :  { %5379 = vmatpush.bf16.msra.mxu3 %v7703_v53  ;;  %5405 = vmatpush.bf16.msra.mxu1 %v7831_v28  ;;  %v7815_v53 = vor.u32 %v8681_v55, %v7814_v39  ;;  %v7759_v28 = vor.u32 %v8667_v44, %v7758_v43  ;;  %v8103_v21 = vor.u32 %v8753_v59, %v8102_v10  ;;  %v7862_v55 = vld [vmem:[#allocation8 + $0x200] sm:$0xf]  ;;  %v8046_v43 = vld [vmem:[#allocation8 + $0x370] sm:$0xf]  ;;  %v8739_v44 = vld [vmem:[#allocation8 + $0x374] sm:$0xf0] }
 0x4ba   :  { %5418 = vmatpush.bf16.msrb.mxu2 %v7895_v60  ;;  %v8661_v60 = vld [vmem:[#allocation8 + $0x104] sm:$0xf0]  ;;  %v8062_v59 = vld [vmem:[#allocation8 + $0x390] sm:$0xf] }
 0x4bc   :  { %5393 = vmatpush.bf16.msra.mxu0 %v7759_v28  ;;  %v8047_v28 = vor.u32 %v8739_v44, %v8046_v43 }
 0x4bd   :  { %5380 = vmatpush.bf16.msra.mxu3 %v7695_v31  ;;  %5406 = vmatpush.bf16.msra.mxu1 %v7823_v1  ;;  %v7942_v31 = vld [vmem:[#allocation8 + $0x2a0] sm:$0xf]  ;;  %v8695_v1 = vld [vmem:[#allocation8 + $0x214] sm:$0xf0] }
 0x4be   :  { %v9764_v47 = vpop.f32.mrf.mxu2  ;;  %5419 = vmatpush.bf16.msrb.mxu2 %v7887_v13  ;;  %v7943_v40 = vor.u32 %v8713_v63, %v7942_v31  ;;  %v7871_v32 = vor.u32 %v8695_v1, %v7870_v7  ;;  %v8038_v13 = vld [vmem:[#allocation8 + $0x360] sm:$0xf]  ;;  %v8749_v63 = vld [vmem:[#allocation8 + $0x3c4] sm:$0xf0]  ;;  %v8658_v1 = vld [vmem:[#allocation8 + $0xf4] sm:$0xf] }
 0x4bf   :  { %v8039_v24 = vor.u32 %v8737_v61, %v8038_v13  ;;  %v8086_v31 = vld [vmem:[#allocation8 + $0x3c0] sm:$0xf]  ;;  %v8642_v61 = vld [vmem:[#allocation8 + $0x74] sm:$0xf] }
 0x4c0   :  { %v4430_v33 = vpop.f32.mrf.mxu0 }
 0x4c1   :  { %5381 = vmatpush.bf16.msra.mxu3 %v7687_v27  ;;  %5407 = vmatpush.bf16.msra.mxu1 %v7815_v53  ;;  %v7750_v27 = vld [vmem:[#allocation8 + $0x120] sm:$0xf]  ;;  %v8755_v33 = vld [vmem:[#allocation8 + $0x3f4] sm:$0xf0]  ;;  %v7863_v53 = vor.u32 %v8693_v25, %v7862_v55 }
 0x4c2   :  { %v7751_v48 = vor.u32 %v8665_v11, %v7750_v27  ;;  %v9773_v27 = vld [vmem:[%s9854_s9] sm:$0xff]  ;;  %v8030_v11 = vld [vmem:[#allocation8 + $0x350] sm:$0xf] }
 0x4c3   :  { %v3501_v7 = vperm.slane %v9773_v27, 0 }
 0x4c4   :  { %5394 = vmatpush.bf16.msra.mxu0 %v7751_v48  ;;  %v8735_v48 = vld [vmem:[#allocation8 + $0x354] sm:$0xf0] }
 0x4c5   :  { %5382 = vmatpush.bf16.msra.mxu3 %v7679_v15  ;;  %5408 = vmatpush.bf16.msra.mxu1 %v7807_v14  ;;  %v8697_v15 = vld [vmem:[#allocation8 + $0x224] sm:$0xf0]  ;;  %v8087_v14 = vor.u32 %v8749_v63, %v8086_v31  ;;  %v7664_v31 = vld [vmem:[#allocation8 + $0x78] sm:$0xf0]  ;;  %v7998_v63 = vld [vmem:[#allocation8 + $0x310] sm:$0xf] }
 0x4c6   :  { %v4404_v3 = vpop.f32.mrf.mxu2  ;;  %v7879_v41 = vor.u32 %v8697_v15, %v7878_v4  ;;  %v8031_v4 = vor.u32 %v8735_v48, %v8030_v11  ;;  %v8078_v15 = vld [vmem:[#allocation8 + $0x3b0] sm:$0xf] }
 0x4c7   :  { %v7743_v3 = vor.u32 %v8663_v8, %v7742_v22 }
 0x4c8   :  { %v9766_v42 = vpop.f32.mrf.mxu0  ;;  %5420 = vmatpush.bf16.msrb.mxu2 %v7879_v41  ;;  %v3502_v41 = vperm.slane %v9773_v27, 1 }
 0x4c9   :  { %5383 = vmatpush.bf16.msra.mxu3 %v7671_v12  ;;  %5409 = vmatpush.bf16.msra.mxu1 %v7799_v51 }
 0x4ca   :  { %5395 = vmatpush.bf16.msra.mxu0 %v7743_v3  ;;  %v3518_v22 = vadd.f32 %v3502_v41, %v9715_v54  ;;  %v3315_v3 = vadd.f32 %v9719_v56, %v9696_v37  ;;  %v8743_v54 = vld [vmem:[#allocation8 + $0x394] sm:$0xf0]  ;;  %v8006_v56 = vld [vmem:[#allocation8 + $0x320] sm:$0xf]  ;;  %v3504_v41 = vperm.slane %v9773_v27, 3 }
 0x4cc   :  { %5421 = vmatpush.bf16.msrb.mxu2 %v7871_v32  ;;  %v7728_v32 = vld [vmem:[#allocation8 + $0xf8] sm:$0xf0] }
 0x4cd   :  { %5428 = vmatpush.bf16.msrb.mxu3 %v7983_v52  ;;  %v7934_v52 = vld [vmem:[#allocation8 + $0x290] sm:$0xf] }
 0x4ce   :  { %v9768_v0 = vpop.f32.mrf.mxu2  ;;  %v7935_v45 = vor.u32 %v8711_v50, %v7934_v52  ;;  %v8733_v52 = vld [vmem:[#allocation8 + $0x344] sm:$0xf0] }
 0x4d0   :  { %v4482_v12 = vpop.f32.mrf.mxu0  ;;  %5422 = vmatpush.bf16.msrb.mxu2 %v7863_v53  ;;  %v8656_v53 = vld [vmem:[#allocation8 + $0xe4] sm:$0xf] }
 0x4d1   :  { %5429 = vmatpush.bf16.msrb.mxu3 %v7975_v35  ;;  %v8110_v35 = vld [vmem:[#allocation8 + $0x3f0] sm:$0xf]  ;;  %v8022_v12 = vld [vmem:[#allocation8 + $0x340] sm:$0xf] }
 0x4d2   :  { %v8023_v50 = vor.u32 %v8733_v52, %v8022_v12  ;;  %v7667_v12 = vor.u32 %v8642_v61, %v7664_v31  ;;  %v8640_v52 = vld [vmem:[#allocation8 + $0x64] sm:$0xf]  ;;  %v7848_v61 = vld [vmem:[#allocation8 + $0x1e8] sm:$0xf0] }
 0x4d5   :  { %5430 = vmatpush.bf16.msrb.mxu3 %v7967_v9  ;;  %v8111_v9 = vor.u32 %v8755_v33, %v8110_v35  ;;  %v8070_v35 = vld [vmem:[#allocation8 + $0x3a0] sm:$0xf]  ;;  %v8745_v33 = vld [vmem:[#allocation8 + $0x3a4] sm:$0xf0] }
 0x4d6   :  { %v4456_v30 = vpop.f32.mrf.mxu2 }
 0x4d7   :  { %5454 = vmatpush.bf16.msrb.mxu1 %v8111_v9  ;;  %v8071_v9 = vor.u32 %v8745_v33, %v8070_v35  ;;  %v7656_v35 = vld [vmem:[#allocation8 + $0x68] sm:$0xf0]  ;;  %v7990_v33 = vld [vmem:[#allocation8 + $0x300] sm:$0xf] }
 0x4d9   :  { %5431 = vmatpush.bf16.msrb.mxu3 %v7959_v2  ;;  %v7734_v2 = vld [vmem:[#allocation8 + $0x100] sm:$0xf] }
 0x4da   :  { %v7735_v39 = vor.u32 %v8661_v60, %v7734_v2  ;;  %v3517_v2 = vadd.f32 %v3501_v7, %v3315_v3  ;;  %v8652_v7 = vld [vmem:[#allocation8 + $0xc4] sm:$0xf] }
 0x4db   :  { %5455 = vmatpush.bf16.msrb.mxu1 %v8103_v21  ;;  %v8063_v21 = vor.u32 %v8743_v54, %v8062_v59  ;;  %v8638_v59 = vld [vmem:[#allocation8 + $0x54] sm:$0xf]  ;;  %v7648_v54 = vld [vmem:[#allocation8 + $0x58] sm:$0xf0] }
 0x4dc   :  { %5396 = vmatpush.bf16.msra.mxu0 %v7735_v39  ;;  %v8729_v39 = vld [vmem:[#allocation8 + $0x324] sm:$0xf0] }
 0x4dd   :  { %5432 = vmatpush.bf16.msrb.mxu3 %v7951_v58  ;;  %v8095_v58 = vor.u32 %v8751_v6, %v8094_v49  ;;  %v8007_v43 = vor.u32 %v8729_v39, %v8006_v56  ;;  %v7720_v49 = vld [vmem:[#allocation8 + $0xe8] sm:$0xf0]  ;;  %v8054_v6 = vld [vmem:[#allocation8 + $0x380] sm:$0xf]  ;;  %v7856_v56 = vld [vmem:[#allocation8 + $0x1f8] sm:$0xf0] }
 0x4de   :  { %v7723_v11 = vor.u32 %v8656_v53, %v7720_v49 }
 0x4df   :  { %5456 = vmatpush.bf16.msrb.mxu1 %v8095_v58  ;;  %v8741_v58 = vld [vmem:[#allocation8 + $0x384] sm:$0xf0] }
 0x4e0   :  { %5441 = vmatpush.bf16.msrb.mxu0 %v8047_v28 }
 0x4e1   :  { %5433 = vmatpush.bf16.msrb.mxu3 %v7943_v40  ;;  %v8747_v40 = vld [vmem:[#allocation8 + $0x3b4] sm:$0xf0] }
 0x4e2   :  { %v8079_v19 = vor.u32 %v8747_v40, %v8078_v15  ;;  %v7712_v15 = vld [vmem:[#allocation8 + $0xd8] sm:$0xf0] }
 0x4e3   :  { %5457 = vmatpush.bf16.msrb.mxu1 %v8087_v14  ;;  %v8727_v14 = vld [vmem:[#allocation8 + $0x314] sm:$0xf0] }
 0x4e4   :  { %5442 = vmatpush.bf16.msrb.mxu0 %v8039_v24  ;;  %v8055_v24 = vor.u32 %v8741_v58, %v8054_v6  ;;  %v7999_v48 = vor.u32 %v8727_v14, %v7998_v63  ;;  %v7688_v58 = vld [vmem:[#allocation8 + $0xa8] sm:$0xf0]  ;;  %v8634_v14 = vld [vmem:[#allocation8 + $0x34] sm:$0xf] }
 0x4e5   :  { %5434 = vmatpush.bf16.msrb.mxu3 %v7935_v45  ;;  %v8014_v45 = vld [vmem:[#allocation8 + $0x330] sm:$0xf] }
 0x4e6   :  { %v8015_v36 = vor.u32 %v8731_v38, %v8014_v45  ;;  %v7704_v45 = vld [vmem:[#allocation8 + $0xc8] sm:$0xf0]  ;;  %v3520_v38 = vadd.f32 %v3504_v41, %v9722_v17  ;;  %v7680_v41 = vld [vmem:[#allocation8 + $0x98] sm:$0xf0] }
 0x4e7   :  { %5458 = vmatpush.bf16.msrb.mxu1 %v8079_v19 }
 0x4e8   :  { %v9776_v16 = vpop.f32.mrf.mxu0  ;;  %5443 = vmatpush.bf16.msrb.mxu0 %v8031_v4  ;;  %v8654_v4 = vld [vmem:[#allocation8 + $0xd4] sm:$0xf] }
 0x4e9   :  { %5435 = vmatpush.bf16.msrb.mxu3 %v7927_v5  ;;  %v4389_v51 = vpop.f32.mrf.mxu1  ;;  %v7731_v5 = vor.u32 %v8658_v1, %v7728_v32  ;;  %v7659_v1 = vor.u32 %v8640_v52, %v7656_v35  ;;  %v3503_v32 = vperm.slane %v9773_v27, 2  ;;  %v8632_v35 = vld [vmem:[#allocation8 + $0x24] sm:$0xf] }
 0x4ea   :  { %v4390_v8 = vadd.f32 %v4389_v51, %v9758_v62 }
 0x4eb   :  { %5459 = vmatpush.bf16.msrb.mxu1 %v8071_v9 }
 0x4ec   :  { %5444 = vmatpush.bf16.msrb.mxu0 %v8023_v50  ;;  %v4550_v30 = vadd.f32 %v4390_v8, %v3518_v22  ;;  %v8725_v22 = vld [vmem:[#allocation8 + $0x304] sm:$0xf0]  ;;  %v7715_v8 = vor.u32 %v8654_v4, %v7712_v15  ;;  %v8646_v15 = vld [vmem:[#allocation8 + $0x94] sm:$0xf] }
 0x4ed   :  { %v7991_v9 = vor.u32 %v8725_v22, %v7990_v33 }
 0x4ee   :  { %v9783_v10 = vpop.f32.mrf.mxu2  ;;  %vm4558_vm2 = vcmp.gt.f32.partialorder %v4550_v30, 0.0  ;;  %v4566_v62 = vmul.f32 0.2, %v4550_v30 }
 0x4ef   :  { %v4363_v60 = vpop.f32.mrf.mxu3  ;;  %5460 = vmatpush.bf16.msrb.mxu1 %v8063_v21  ;;  %v7707_v21 = vor.u32 %v8652_v7, %v7704_v45  ;;  %v7784_v7 = vld [vmem:[#allocation8 + $0x168] sm:$0xf0]  ;;  %v7683_v45 = vor.u32 %v8646_v15, %v7680_v41  ;;  %v8680_v15 = vld [vmem:[#allocation8 + $0x1a4] sm:$0xf] }
 0x4f0   :  { %v4534_v37 = vpop.f32.mrf.mxu0  ;;  %5445 = vmatpush.bf16.msrb.mxu0 %v8015_v36  ;;  %v4574_v55 = vsel %vm4558_vm2, %v4550_v30, %v4566_v62  ;;  %v4364_v25 = vadd.f32 %v4363_v60, %v9760_v20  ;;  %v3367_v36 = vadd.f32 %v9726_v46, %v9706_v57  ;;  %v7696_v60 = vld [vmem:[#allocation8 + $0xb8] sm:$0xf0]  ;;  %v7640_v57 = vld [vmem:[#allocation8 + $0x48] sm:$0xf0] }
 0x4f1   :  { %v9786_v44 = vpack.c.bf16 %v4574_v55, %v4574_v55  ;;  %v4391_v28 = vpop.f32.mrf.mxu1  ;;  %v8690_v37 = vld [vmem:[#allocation8 + $0x1f4] sm:$0xf] }
 0x4f2   :  { %v4549_v13 = vadd.f32 %v4364_v25, %v3517_v2  ;;  %v8650_v2 = vld [vmem:[#allocation8 + $0xb4] sm:$0xf]  ;;  %v3519_v39 = vadd.f32 %v3503_v32, %v3367_v36  ;;  %v8636_v25 = vld [vmem:[#allocation8 + $0x44] sm:$0xf]  ;;  %v7859_v28 = vor.u32 %v8690_v37, %v7856_v56  ;;  %v7672_v32 = vld [vmem:[#allocation8 + $0x88] sm:$0xf0] }
 0x4f3   :  { %5384 = vmatmul.bf16.vlgmr.msra.gmra.mxu3 %v9786_v44  ;;  %5461 = vmatpush.bf16.msrb.mxu1 %v8055_v24  ;;  %v7699_v53 = vor.u32 %v8650_v2, %v7696_v60  ;;  %v3506_v24 = vperm.slane %v9773_v27, 5  ;;  %v7643_v63 = vor.u32 %v8636_v25, %v7640_v57  ;;  %v8630_v60 = vld [vmem:[#allocation8 + $0x14] sm:$0xf]  ;;  %v7616_v56 = vld [vmem:[#allocation8 + $0x18] sm:$0xf0] }
 0x4f4   :  { %5446 = vmatpush.bf16.msrb.mxu0 %v8007_v43  ;;  %vm4557_vm3 = vcmp.gt.f32.partialorder %v4549_v13, 0.0  ;;  %v4565_v20 = vmul.f32 0.2, %v4549_v13  ;;  %5480 = vmatpush.bf16.msra.mxu3 %v7731_v5  ;;  %v8648_v43 = vld [vmem:[#allocation8 + $0xa4] sm:$0xf] }
 0x4f5   :  { %v7691_v4 = vor.u32 %v8648_v43, %v7688_v58  ;;  %v7984_v25 = vld [vmem:[#allocation8 + $0x2f8] sm:$0xf0]  ;;  %v8628_v43 = vld [vmem:[#allocation8 + $0x4] sm:$0xf] }
 0x4f6   :  { %v4508_v40 = vpop.f32.mrf.mxu2  ;;  %v4573_v19 = vsel %vm4557_vm3, %v4549_v13, %v4565_v20  ;;  %v8688_v13 = vld [vmem:[#allocation8 + $0x1e4] sm:$0xf]  ;;  %v7632_v20 = vld [vmem:[#allocation8 + $0x38] sm:$0xf0] }
 0x4f7   :  { %v9790_v50 = vpack.c.bf16 %v4573_v19, %v4573_v19  ;;  %v4365_v51 = vpop.f32.mrf.mxu3  ;;  %v7851_v40 = vor.u32 %v8688_v13, %v7848_v61  ;;  %v8686_v19 = vld [vmem:[#allocation8 + $0x1d4] sm:$0xf]  ;;  %v7608_v61 = vld [vmem:[#allocation8 + $0x8] sm:$0xf0] }
 0x4f8   :  { %5447 = vmatpush.bf16.msrb.mxu0 %v7999_v48  ;;  %5481 = vmatpush.bf16.msra.mxu3 %v7723_v11  ;;  %v7792_v11 = vld [vmem:[#allocation8 + $0x178] sm:$0xf0]  ;;  %v7635_v51 = vor.u32 %v8634_v14, %v7632_v20  ;;  %v8720_v20 = vld [vmem:[#allocation8 + $0x2e4] sm:$0xf] }
 0x4f9   :  { %v4441_v3 = vpop.f32.mrf.mxu1  ;;  %5371 = vmatmul.bf16.vlgmr.msra.gmra.mxu2 %v9790_v50 }
 0x4fa   :  { %v4442_v30 = vadd.f32 %v4441_v3, %v9762_v23  ;;  %5467 = vmatpush.bf16.msra.mxu2 %v7667_v12  ;;  %v7651_v23 = vor.u32 %v8638_v59, %v7648_v54  ;;  %v7840_v12 = vld [vmem:[#allocation8 + $0x1d8] sm:$0xf0]  ;;  %v8672_v3 = vld [vmem:[#allocation8 + $0x164] sm:$0xf]  ;;  %v7832_v54 = vld [vmem:[#allocation8 + $0x1c8] sm:$0xf0] }
 0x4fb   :  { %v8684_v59 = vld [vmem:[#allocation8 + $0x1c4] sm:$0xf]  ;;  %v7787_v37 = vor.u32 %v8672_v3, %v7784_v7  ;;  %v7968_v3 = vld [vmem:[#allocation8 + $0x2d8] sm:$0xf0]  ;;  %v8678_v7 = vld [vmem:[#allocation8 + $0x194] sm:$0xf] }
 0x4fc   :  { %5448 = vmatpush.bf16.msrb.mxu0 %v7991_v9  ;;  %v4552_v62 = vadd.f32 %v4442_v30, %v3520_v38  ;;  %5482 = vmatpush.bf16.msra.mxu3 %v7715_v8  ;;  %v7624_v9 = vld [vmem:[#allocation8 + $0x28] sm:$0xf0]  ;;  %v8644_v38 = vld [vmem:[#allocation8 + $0x84] sm:$0xf]  ;;  %v7843_v30 = vor.u32 %v8686_v19, %v7840_v12  ;;  %v7835_v57 = vor.u32 %v8684_v59, %v7832_v54  ;;  %v8706_v19 = vld [vmem:[#allocation8 + $0x274] sm:$0xf] }
 0x4fd   :  { %v7627_v2 = vor.u32 %v8632_v35, %v7624_v9  ;;  %v7912_v54 = vld [vmem:[#allocation8 + $0x268] sm:$0xf0] }
 0x4fe   :  { %vm4560_vm4 = vcmp.gt.f32.partialorder %v4552_v62, 0.0  ;;  %v4568_v17 = vmul.f32 0.2, %v4552_v62  ;;  %5468 = vmatpush.bf16.msra.mxu2 %v7659_v1  ;;  %v3522_v1 = vadd.f32 %v3506_v24, %v9731_v18  ;;  %v7675_v18 = vor.u32 %v8644_v38, %v7672_v32  ;;  %v8668_v24 = vld [vmem:[#allocation8 + $0x144] sm:$0xf] }
 0x4ff   :  { %v4415_v55 = vpop.f32.mrf.mxu3 }
 0x500   :  { %v4576_v46 = vsel %vm4560_vm4, %v4552_v62, %v4568_v17  ;;  %v4416_v5 = vadd.f32 %v4415_v55, %v9764_v47  ;;  %5483 = vmatpush.bf16.msra.mxu3 %v7707_v21  ;;  %v8674_v47 = vld [vmem:[#allocation8 + $0x174] sm:$0xf]  ;;  %v3505_v62 = vperm.slane %v9773_v27, 4 }
 0x501   :  { %v9799_v49 = vpack.c.bf16 %v4576_v46, %v4576_v46  ;;  %v4443_v6 = vpop.f32.mrf.mxu1  ;;  %v7795_v33 = vor.u32 %v8674_v47, %v7792_v11  ;;  %v8670_v17 = vld [vmem:[#allocation8 + $0x154] sm:$0xf] }
 0x502   :  { %v4551_v31 = vadd.f32 %v4416_v5, %v3519_v39  ;;  %5469 = vmatpush.bf16.msra.mxu2 %v7651_v23  ;;  %v7776_v23 = vld [vmem:[#allocation8 + $0x158] sm:$0xf0]  ;;  %v8722_v55 = vld [vmem:[#allocation8 + $0x2f4] sm:$0xf]  ;;  %v3521_v6 = vadd.f32 %v3505_v62, %v9734_v34  ;;  %v7611_v34 = vor.u32 %v8628_v43, %v7608_v61  ;;  %v8664_v62 = vld [vmem:[#allocation8 + $0x124] sm:$0xf] }
 0x503   :  { %5410 = vmatmul.bf16.vlgmr.msra.gmra.mxu1 %v9799_v49  ;;  %v8682_v46 = vld [vmem:[#allocation8 + $0x1b4] sm:$0xf]  ;;  %v7824_v5 = vld [vmem:[#allocation8 + $0x1b8] sm:$0xf0]  ;;  %v7987_v13 = vor.u32 %v8722_v55, %v7984_v25  ;;  %v8660_v61 = vld [vmem:[#allocation8 + $0x104] sm:$0xf] }
 0x504   :  { %vm4559_vm5 = vcmp.gt.f32.partialorder %v4551_v31, 0.0  ;;  %v4567_v48 = vmul.f32 0.2, %v4551_v31  ;;  %5484 = vmatpush.bf16.msra.mxu3 %v7699_v53  ;;  %5506 = vmatpush.bf16.msra.mxu1 %v7859_v28  ;;  %v7779_v28 = vor.u32 %v8670_v17, %v7776_v23  ;;  %v7827_v47 = vor.u32 %v8682_v46, %v7824_v5  ;;  %v8676_v17 = vld [vmem:[#allocation8 + $0x184] sm:$0xf] }
 0x505   :  { %v7800_v23 = vld [vmem:[#allocation8 + $0x188] sm:$0xf0]  ;;  %v7904_v25 = vld [vmem:[#allocation8 + $0x258] sm:$0xf0] }
 0x506   :  { %v4575_v52 = vsel %vm4559_vm5, %v4551_v31, %v4567_v48  ;;  %5470 = vmatpush.bf16.msra.mxu2 %v7643_v63  ;;  %v7768_v31 = vld [vmem:[#allocation8 + $0x148] sm:$0xf0]  ;;  %v7744_v46 = vld [vmem:[#allocation8 + $0x118] sm:$0xf0] }
 0x507   :  { %v9803_v22 = vpack.c.bf16 %v4575_v52, %v4575_v52  ;;  %v4417_v8 = vpop.f32.mrf.mxu3  ;;  %v7771_v12 = vor.u32 %v8668_v24, %v7768_v31  ;;  %v7920_v52 = vld [vmem:[#allocation8 + $0x278] sm:$0xf0]  ;;  %v7736_v24 = vld [vmem:[#allocation8 + $0x108] sm:$0xf0] }
 0x508   :  { %5485 = vmatpush.bf16.msra.mxu3 %v7691_v4  ;;  %5507 = vmatpush.bf16.msra.mxu1 %v7851_v40  ;;  %v7976_v4 = vld [vmem:[#allocation8 + $0x2e8] sm:$0xf0]  ;;  %v8718_v8 = vld [vmem:[#allocation8 + $0x2d4] sm:$0xf]  ;;  %v7952_v43 = vld [vmem:[#allocation8 + $0x2b8] sm:$0xf0] }
 0x509   :  { %v4493_v36 = vpop.f32.mrf.mxu1  ;;  %5397 = vmatmul.bf16.vlgmr.msra.gmra.mxu0 %v9803_v22  ;;  %v7816_v40 = vld [vmem:[#allocation8 + $0x1a8] sm:$0xf0] }
 0x50a   :  { %v4494_v21 = vadd.f32 %v4493_v36, %v9766_v42  ;;  %5471 = vmatpush.bf16.msra.mxu2 %v7635_v51  ;;  %5493 = vmatpush.bf16.msra.mxu0 %v7795_v33  ;;  %v7619_v42 = vor.u32 %v8630_v60, %v7616_v56  ;;  %v7760_v51 = vld [vmem:[#allocation8 + $0x138] sm:$0xf0]  ;;  %v7979_v33 = vor.u32 %v8720_v20, %v7976_v4  ;;  %v8716_v60 = vld [vmem:[#allocation8 + $0x2c4] sm:$0xf]  ;;  %v7960_v56 = vld [vmem:[#allocation8 + $0x2c8] sm:$0xf0] }
 0x50b   :  { %v7819_v9 = vor.u32 %v8680_v15, %v7816_v40  ;;  %v7963_v5 = vor.u32 %v8716_v60, %v7960_v56  ;;  %v8698_v4 = vld [vmem:[#allocation8 + $0x234] sm:$0xf]  ;;  %v7888_v15 = vld [vmem:[#allocation8 + $0x238] sm:$0xf0]  ;;  %v8752_v60 = vld [vmem:[#allocation8 + $0x3e4] sm:$0xf] }
 0x50c   :  { %v4554_v39 = vadd.f32 %v4494_v21, %v3522_v1  ;;  %5486 = vmatpush.bf16.msra.mxu3 %v7683_v45  ;;  %5508 = vmatpush.bf16.msra.mxu1 %v7843_v30  ;;  %v7808_v45 = vld [vmem:[#allocation8 + $0x198] sm:$0xf0]  ;;  %v7923_v30 = vor.u32 %v8706_v19, %v7920_v52  ;;  %v8704_v1 = vld [vmem:[#allocation8 + $0x264] sm:$0xf]  ;;  %v7752_v21 = vld [vmem:[#allocation8 + $0x128] sm:$0xf0] }
 0x50d   :  { %v7755_v55 = vor.u32 %v8664_v62, %v7752_v21 }
 0x50e   :  { %vm4562_vm6 = vcmp.gt.f32.partialorder %v4554_v39, 0.0  ;;  %v4570_v53 = vmul.f32 0.2, %v4554_v39  ;;  %5472 = vmatpush.bf16.msra.mxu2 %v7627_v2  ;;  %5494 = vmatpush.bf16.msra.mxu0 %v7787_v37  ;;  %v7971_v2 = vor.u32 %v8718_v8, %v7968_v3  ;;  %v7811_v37 = vor.u32 %v8678_v7, %v7808_v45  ;;  %v7928_v3 = vld [vmem:[#allocation8 + $0x288] sm:$0xf0] }
 0x50f   :  { %v4467_v58 = vpop.f32.mrf.mxu3  ;;  %v8754_v45 = vld [vmem:[#allocation8 + $0x3f4] sm:$0xf] }
 0x510   :  { %v4578_v63 = vsel %vm4562_vm6, %v4554_v39, %v4570_v53  ;;  %v4468_v14 = vadd.f32 %v4467_v58, %v9768_v0  ;;  %5487 = vmatpush.bf16.msra.mxu3 %v7675_v18  ;;  %5509 = vmatpush.bf16.msra.mxu1 %v7835_v57  ;;  %v8666_v0 = vld [vmem:[#allocation8 + $0x134] sm:$0xf]  ;;  %v7915_v39 = vor.u32 %v8704_v1, %v7912_v54  ;;  %v7872_v1 = vld [vmem:[#allocation8 + $0x218] sm:$0xf0] }
 0x511   :  { %v9811_v11 = vpack.c.bf16 %v4578_v63, %v4578_v63  ;;  %v4495_v48 = vpop.f32.mrf.mxu1  ;;  %v7763_v36 = vor.u32 %v8666_v0, %v7760_v51  ;;  %v8702_v18 = vld [vmem:[#allocation8 + $0x254] sm:$0xf]  ;;  %v7803_v53 = vor.u32 %v8676_v17, %v7800_v23  ;;  %v8712_v63 = vld [vmem:[#allocation8 + $0x2a4] sm:$0xf]  ;;  %v7864_v23 = vld [vmem:[#allocation8 + $0x208] sm:$0xf0] }
 0x512   :  { %v4553_v41 = vadd.f32 %v4468_v14, %v3521_v6  ;;  %5473 = vmatpush.bf16.msra.mxu2 %v7619_v42  ;;  %5495 = vmatpush.bf16.msra.mxu0 %v7779_v28  ;;  %v8662_v57 = vld [vmem:[#allocation8 + $0x114] sm:$0xf]  ;;  %v7907_v28 = vor.u32 %v8702_v18, %v7904_v25  ;;  %v8700_v6 = vld [vmem:[#allocation8 + $0x244] sm:$0xf]  ;;  %v7944_v14 = vld [vmem:[#allocation8 + $0x2a8] sm:$0xf0] }
 0x513   :  { %5436 = vmatmul.bf16.vlgmr.msrb.gmra.mxu3 %v9811_v11  ;;  %v8714_v42 = vld [vmem:[#allocation8 + $0x2b4] sm:$0xf]  ;;  %v7747_v58 = vor.u32 %v8662_v57, %v7744_v46  ;;  %v3508_v48 = vperm.slane %v9773_v27, 7  ;;  %v7947_v40 = vor.u32 %v8712_v63, %v7944_v14  ;;  %v8696_v51 = vld [vmem:[#allocation8 + $0x224] sm:$0xf] }
 0x514   :  { %vm4561_vm7 = vcmp.gt.f32.partialorder %v4553_v41, 0.0  ;;  %v4569_v35 = vmul.f32 0.2, %v4553_v41  ;;  %5532 = vmatpush.bf16.msrb.mxu3 %v7987_v13  ;;  %5510 = vmatpush.bf16.msra.mxu1 %v7827_v47  ;;  %v7896_v13 = vld [vmem:[#allocation8 + $0x248] sm:$0xf0]  ;;  %v7955_v31 = vor.u32 %v8714_v42, %v7952_v43  ;;  %v7739_v47 = vor.u32 %v8660_v61, %v7736_v24 }
 0x515   :  { %v7899_v20 = vor.u32 %v8700_v6, %v7896_v13  ;;  %v3524_v52 = vadd.f32 %v3508_v48, %v9741_v29  ;;  %v8692_v17 = vld [vmem:[#allocation8 + $0x204] sm:$0xf]  ;;  %v8048_v18 = vld [vmem:[#allocation8 + $0x378] sm:$0xf0]  ;;  %v8750_v25 = vld [vmem:[#allocation8 + $0x3d4] sm:$0xf] }
 0x516   :  { %v4577_v38 = vsel %vm4561_vm7, %v4553_v41, %v4569_v35  ;;  %5474 = vmatpush.bf16.msra.mxu2 %v7611_v34  ;;  %5496 = vmatpush.bf16.msra.mxu0 %v7771_v12  ;;  %v8710_v41 = vld [vmem:[#allocation8 + $0x294] sm:$0xf]  ;;  %v7936_v34 = vld [vmem:[#allocation8 + $0x298] sm:$0xf0]  ;;  %v7891_v12 = vor.u32 %v8698_v4, %v7888_v15  ;;  %v7880_v35 = vld [vmem:[#allocation8 + $0x228] sm:$0xf0] }
 0x517   :  { %v9814_v32 = vpack.c.bf16 %v4577_v38, %v4577_v38  ;;  %v4469_v59 = vpop.f32.mrf.mxu3  ;;  %v7883_v7 = vor.u32 %v8696_v51, %v7880_v35  ;;  %v8112_v38 = vld [vmem:[#allocation8 + $0x3f8] sm:$0xf0]  ;;  %v8736_v43 = vld [vmem:[#allocation8 + $0x364] sm:$0xf]  ;;  %v8088_v13 = vld [vmem:[#allocation8 + $0x3c8] sm:$0xf0] }
 0x518   :  { %5533 = vmatpush.bf16.msrb.mxu3 %v7979_v33  ;;  %5511 = vmatpush.bf16.msra.mxu1 %v7819_v9  ;;  %v7939_v33 = vor.u32 %v8710_v41, %v7936_v34  ;;  %v8708_v9 = vld [vmem:[#allocation8 + $0x284] sm:$0xf]  ;;  %v8115_v62 = vor.u32 %v8754_v45, %v8112_v38  ;;  %v8096_v57 = vld [vmem:[#allocation8 + $0x3d8] sm:$0xf0]  ;;  %v8734_v24 = vld [vmem:[#allocation8 + $0x354] sm:$0xf] }
 0x519   :  { %5423 = vmatmul.bf16.vlgmr.msrb.gmra.mxu2 %v9814_v32  ;;  %v8099_v6 = vor.u32 %v8750_v25, %v8096_v57  ;;  %v8080_v14 = vld [vmem:[#allocation8 + $0x3b8] sm:$0xf0]  ;;  %v8024_v48 = vld [vmem:[#allocation8 + $0x348] sm:$0xf0]  ;;  %v8744_v15 = vld [vmem:[#allocation8 + $0x3a4] sm:$0xf] }
 0x51a   :  { %5519 = vmatpush.bf16.msrb.mxu2 %v7923_v30  ;;  %5497 = vmatpush.bf16.msra.mxu0 %v7763_v36  ;;  %v8694_v30 = vld [vmem:[#allocation8 + $0x214] sm:$0xf]  ;;  %v7931_v36 = vor.u32 %v8708_v9, %v7928_v3  ;;  %v8728_v51 = vld [vmem:[#allocation8 + $0x324] sm:$0xf]  ;;  %v8008_v35 = vld [vmem:[#allocation8 + $0x328] sm:$0xf0] }
 0x51b   :  { %v8730_v34 = vld [vmem:[#allocation8 + $0x334] sm:$0xf]  ;;  %v8011_v9 = vor.u32 %v8728_v51, %v8008_v35  ;;  %v8724_v38 = vld [vmem:[#allocation8 + $0x304] sm:$0xf] }
 0x51c   :  { %5534 = vmatpush.bf16.msrb.mxu3 %v7971_v2  ;;  %5512 = vmatpush.bf16.msra.mxu1 %v7811_v37  ;;  %v7875_v2 = vor.u32 %v8694_v30, %v7872_v1  ;;  %v8104_v37 = vld [vmem:[#allocation8 + $0x3e8] sm:$0xf0]  ;;  %v8726_v3 = vld [vmem:[#allocation8 + $0x314] sm:$0xf] }
 0x51d   :  { %v7992_v30 = vld [vmem:[#allocation8 + $0x308] sm:$0xf0]  ;;  %v8770_v57 = vld [vmem:[#allocation10 + $0x70] sm:$0xff] }
 0x51e   :  { %5520 = vmatpush.bf16.msrb.mxu2 %v7915_v39  ;;  %5498 = vmatpush.bf16.msra.mxu0 %v7755_v55  ;;  %v8738_v39 = vld [vmem:[#allocation8 + $0x374] sm:$0xf]  ;;  %v7867_v55 = vor.u32 %v8692_v17, %v7864_v23  ;;  %v8757_v17 = vld [vmem:[#allocation10 + $0x8] sm:$0xff] }
 0x520   :  { %5535 = vmatpush.bf16.msrb.mxu3 %v7963_v5  ;;  %5513 = vmatpush.bf16.msra.mxu1 %v7803_v53  ;;  %v8051_v5 = vor.u32 %v8738_v39, %v8048_v18  ;;  %v8756_v39 = vld [vmem:[#allocation10] sm:$0xff] }
 0x521   :  { %v4717_v18 = vld [vmem:[%s9856_s11] sm:$0x3]  ;;  %s8980_s11 = smov [#allocation11]  }
 0x522   :  { %5521 = vmatpush.bf16.msrb.mxu2 %v7907_v28  ;;  %5499 = vmatpush.bf16.msra.mxu0 %v7747_v58  ;;  %v8040_v28 = vld [vmem:[#allocation8 + $0x368] sm:$0xf0]  ;;  %v8748_v58 = vld [vmem:[#allocation8 + $0x3c4] sm:$0xf]  ;;  %s5745_s30 = sshll.u32 %s8980_s11, 4  ;;  %s5746_s30 = int_to_ptr.vmem [resolvable:$true] %s5745_s30 }
 0x523   :  { %5488 = vmatmul.bf16.vlgmr.msra.gmra.mxu3 %v9786_v44  ;;  %v3507_v44 = vperm.slane %v9773_v27, 6  ;;  %v8043_v61 = vor.u32 %v8736_v43, %v8040_v28  ;;  %v8091_v63 = vor.u32 %v8748_v58, %v8088_v13  ;;  %v8768_v28 = vld [vmem:[#allocation10 + $0x60] sm:$0xff] }
 0x524   :  { %5536 = vmatpush.bf16.msrb.mxu3 %v7955_v31  ;;  %v8032_v31 = vld [vmem:[#allocation8 + $0x358] sm:$0xf0] }
 0x525   :  { %v3523_v59 = vadd.f32 %v3507_v44, %v9744_v26  ;;  %v8740_v44 = vld [vmem:[#allocation8 + $0x384] sm:$0xf] }
 0x526   :  { %5522 = vmatpush.bf16.msrb.mxu2 %v7899_v20  ;;  %5500 = vmatpush.bf16.msra.mxu0 %v7739_v47  ;;  %v8035_v20 = vor.u32 %v8734_v24, %v8032_v31  ;;  %v8732_v47 = vld [vmem:[#allocation8 + $0x344] sm:$0xf]  ;;  %v8767_v24 = vld [vmem:[#allocation10 + $0x58] sm:$0xff] }
 0x527   :  { %v8027_v41 = vor.u32 %v8732_v47, %v8024_v48 }
 0x528   :  { %5537 = vmatpush.bf16.msrb.mxu3 %v7947_v40  ;;  %v8072_v40 = vld [vmem:[#allocation8 + $0x3a8] sm:$0xf0] }
 0x529   :  { %v4545_v19 = vpop.f32.mrf.mxu1  ;;  %5475 = vmatmul.bf16.vlgmr.msra.gmra.mxu2 %v9790_v50 }
 0x52a   :  { %v4546_v0 = vadd.f32 %v4545_v19, %v9776_v16  ;;  %5523 = vmatpush.bf16.msrb.mxu2 %v7891_v12  ;;  %v8016_v19 = vld [vmem:[#allocation8 + $0x338] sm:$0xf0]  ;;  %v8075_v12 = vor.u32 %v8744_v15, %v8072_v40  ;;  %v8765_v15 = vld [vmem:[#allocation10 + $0x48] sm:$0xff] }
 0x52c   :  { %v4556_v8 = vadd.f32 %v4546_v0, %v3524_v52  ;;  %5538 = vmatpush.bf16.msrb.mxu3 %v7939_v33  ;;  %v8064_v52 = vld [vmem:[#allocation8 + $0x398] sm:$0xf0]  ;;  %v8019_v0 = vor.u32 %v8730_v34, %v8016_v19  ;;  %v8764_v19 = vld [vmem:[#allocation10 + $0x40] sm:$0xff] }
 0x52e   :  { %vm4564_vm8 = vcmp.gt.f32.partialorder %v4556_v8, 0.0  ;;  %v4572_v29 = vmul.f32 0.2, %v4556_v8  ;;  %5524 = vmatpush.bf16.msrb.mxu2 %v7883_v7 }
 0x52f   :  { %v4519_v16 = vpop.f32.mrf.mxu3 }
 0x530   :  { %v4580_v54 = vsel %vm4564_vm8, %v4556_v8, %v4572_v29  ;;  %v4520_v27 = vadd.f32 %v4519_v16, %v9783_v10  ;;  %5539 = vmatpush.bf16.msrb.mxu3 %v7931_v36  ;;  %v8107_v10 = vor.u32 %v8752_v60, %v8104_v37  ;;  %v8056_v8 = vld [vmem:[#allocation8 + $0x388] sm:$0xf0]  ;;  %v7995_v29 = vor.u32 %v8724_v38, %v7992_v30  ;;  %v8763_v16 = vld [vmem:[#allocation10 + $0x38] sm:$0xff] }
 0x531   :  { %v9825_v50 = vpack.c.bf16 %v4580_v54, %v4580_v54  ;;  %v4547_v21 = vpop.f32.mrf.mxu1  ;;  %v8059_v7 = vor.u32 %v8740_v44, %v8056_v8  ;;  %v8759_v37 = vld [vmem:[#allocation10 + $0x18] sm:$0xff] }
 0x532   :  { %v4555_v56 = vadd.f32 %v4520_v27, %v3523_v59  ;;  %5525 = vmatpush.bf16.msrb.mxu2 %v7875_v2  ;;  %v8762_v59 = vld [vmem:[#allocation10 + $0x30] sm:$0xff]  ;;  %v8760_v2 = vld [vmem:[#allocation10 + $0x20] sm:$0xff] }
 0x533   :  { %5462 = vmatmul.bf16.vlgmr.msrb.gmra.mxu1 %v9825_v50  ;;  %5540 = vmatmul.bf16.vlgmr.msrb.gmra.mxu3 %v9811_v11  ;;  %v8746_v11 = vld [vmem:[#allocation8 + $0x3b4] sm:$0xf] }
 0x534   :  { %vm4563_vm9 = vcmp.gt.f32.partialorder %v4555_v56, 0.0  ;;  %v4571_v26 = vmul.f32 0.2, %v4555_v56  ;;  %5558 = vmatpush.bf16.msrb.mxu1 %v8115_v62  ;;  %v8083_v4 = vor.u32 %v8746_v11, %v8080_v14  ;;  %v8761_v62 = vld [vmem:[#allocation10 + $0x28] sm:$0xff]  ;;  %v8766_v11 = vld [vmem:[#allocation10 + $0x50] sm:$0xff] }
 0x536   :  { %v4579_v46 = vsel %vm4563_vm9, %v4555_v56, %v4571_v26  ;;  %5526 = vmatpush.bf16.msrb.mxu2 %v7867_v55  ;;  %v4719_v55 = vperm.slane %v4717_v18, 0 }
 0x537   :  { %v4587_v53 = vpack.c.bf16 %v4579_v46, %v4579_v46  ;;  %v4521_v42 = vpop.f32.mrf.mxu3 }
 0x538   :  { %5559 = vmatpush.bf16.msrb.mxu1 %v8107_v10  ;;  %v8771_v10 = vld [vmem:[#allocation10 + $0x78] sm:$0xff] }
 0x539   :  { %5449 = vmatmul.bf16.vlgmr.msrb.gmra.mxu0 %v4587_v53  ;;  %5527 = vmatmul.bf16.vlgmr.msrb.gmra.mxu2 %v9814_v32  ;;  %v8742_v32 = vld [vmem:[#allocation8 + $0x394] sm:$0xf] }
 0x53a   :  { %5545 = vmatpush.bf16.msrb.mxu0 %v8051_v5  ;;  %v8067_v33 = vor.u32 %v8742_v32, %v8064_v52  ;;  %5713 = vmatpush.bf16.msra.mxu2 %v8763_v16 }
 0x53b   :  { %5726 = vmatpush.bf16.msra.mxu3 %v8771_v10 }
 0x53c   :  { %5560 = vmatpush.bf16.msrb.mxu1 %v8099_v6 }
 0x53e   :  { %5546 = vmatpush.bf16.msrb.mxu0 %v8043_v61  ;;  %5714 = vmatpush.bf16.msra.mxu2 %v8762_v59 }
 0x53f   :  { %5727 = vmatpush.bf16.msra.mxu3 %v8770_v57 }
 0x540   :  { %5561 = vmatpush.bf16.msrb.mxu1 %v8091_v63 }
 0x542   :  { %5547 = vmatpush.bf16.msrb.mxu0 %v8035_v20  ;;  %5715 = vmatpush.bf16.msra.mxu2 %v8761_v62 }
 0x543   :  { %5514 = vmatmul.bf16.vlgmr.msra.gmra.mxu1 %v9799_v49  ;;  %v8000_v49 = vld [vmem:[#allocation8 + $0x318] sm:$0xf0] }
 0x544   :  { %5562 = vmatpush.bf16.msrb.mxu1 %v8083_v4  ;;  %v8003_v45 = vor.u32 %v8726_v3, %v8000_v49 }
 0x546   :  { %5548 = vmatpush.bf16.msrb.mxu0 %v8027_v41  ;;  %5716 = vmatpush.bf16.msra.mxu2 %v8760_v2 }
 0x548   :  { %5563 = vmatpush.bf16.msrb.mxu1 %v8075_v12 }
 0x549   :  { %5501 = vmatmul.bf16.vlgmr.msra.gmra.mxu0 %v9803_v22 }
 0x54a   :  { %5549 = vmatpush.bf16.msrb.mxu0 %v8019_v0  ;;  %5717 = vmatpush.bf16.msra.mxu2 %v8759_v37  ;;  %v4720_v0 = vperm.slane %v4717_v18, 1  ;;  %v8787_v37 = vld [vmem:[%s9858_s13] ss:$0 sm:$0xff] }
 0x54c   :  { %5564 = vmatpush.bf16.msrb.mxu1 %v8067_v33 }
 0x54e   :  { %5550 = vmatpush.bf16.msrb.mxu0 %v8011_v9 }
 0x550   :  { %5565 = vmatpush.bf16.msrb.mxu1 %v8059_v7 }
 0x552   :  { %5551 = vmatpush.bf16.msrb.mxu0 %v8003_v45 }
 0x553   :  { %5566 = vmatmul.bf16.vlgmr.msrb.gmra.mxu1 %v9825_v50  ;;  %v8758_v50 = vld [vmem:[#allocation10 + $0x10] sm:$0xff] }
 0x554   :  { %5718 = vmatpush.bf16.msra.mxu2 %v8758_v50 }
 0x556   :  { %5552 = vmatpush.bf16.msrb.mxu0 %v7995_v29 }
 0x558   :  { %5719 = vmatpush.bf16.msra.mxu2 %v8757_v17 }
 0x559   :  { %5553 = vmatmul.bf16.vlgmr.msrb.gmra.mxu0 %v4587_v53  ;;  %v8769_v53 = vld [vmem:[#allocation10 + $0x68] sm:$0xff] }
 0x55a   :  { %5728 = vmatpush.bf16.msra.mxu3 %v8769_v53 }
 0x55c   :  { %5720 = vmatpush.bf16.msra.mxu2 %v8756_v39 }
 0x55e   :  { %5729 = vmatpush.bf16.msra.mxu3 %v8768_v28 }
 0x562   :  { %5730 = vmatpush.bf16.msra.mxu3 %v8767_v24 }
 0x566   :  { %5731 = vmatpush.bf16.msra.mxu3 %v8766_v11 }
 0x56a   :  { %5732 = vmatpush.bf16.msra.mxu3 %v8765_v15 }
 0x56e   :  { %5733 = vmatpush.bf16.msra.mxu3 %v8764_v19 }
 0x576   :  { %v5385_v22 = vpop.f32.mrf.mxu3 }
 0x57c   :  { %v5372_v1 = vpop.f32.mrf.mxu2 }
 0x57d   :  { %v5373_v46 = vadd.f32 %v5372_v1, %v4719_v55 }
 0x57e   :  { %v5387_v36 = vpop.f32.mrf.mxu3 }
 0x57f   :  { %v5386_v42 = vadd.f32 %v5385_v22, %v5373_v46 }
 0x580   :  { %v5411_v54 = vpop.f32.mrf.mxu1 }
 0x584   :  { %v5374_v27 = vpop.f32.mrf.mxu2 }
 0x586   :  { %v5398_v21 = vpop.f32.mrf.mxu0 }
 0x587   :  { %v5399_v6 = vadd.f32 %v5398_v21, %v5386_v42 }
 0x588   :  { %v5413_v60 = vpop.f32.mrf.mxu1 }
 0x589   :  { %v5412_v58 = vadd.f32 %v5411_v54, %v5399_v6 }
 0x58e   :  { %v5400_v56 = vpop.f32.mrf.mxu0 }
 0x596   :  { %v5437_v23 = vpop.f32.mrf.mxu3 }
 0x59c   :  { %v5424_v26 = vpop.f32.mrf.mxu2 }
 0x59d   :  { %v5425_v31 = vadd.f32 %v5424_v26, %v5412_v58 }
 0x59e   :  { %v5439_v25 = vpop.f32.mrf.mxu3 }
 0x59f   :  { %v5438_v14 = vadd.f32 %v5437_v23, %v5425_v31 }
 0x5a4   :  { %v5426_v5 = vpop.f32.mrf.mxu2 }
 0x5a6   :  { %v5489_v43 = vpop.f32.mrf.mxu3 }
 0x5ac   :  { %v5476_v13 = vpop.f32.mrf.mxu2 }
 0x5ad   :  { %v5477_v44 = vadd.f32 %v5476_v13, %v4720_v0 }
 0x5ae   :  { %v5491_v63 = vpop.f32.mrf.mxu3 }
 0x5af   :  { %v5490_v9 = vadd.f32 %v5489_v43, %v5477_v44 }
 0x5b0   :  { %v5463_v61 = vpop.f32.mrf.mxu1 }
 0x5b4   :  { %v5478_v48 = vpop.f32.mrf.mxu2 }
 0x5b6   :  { %v5450_v20 = vpop.f32.mrf.mxu0  ;;  %v5541_v41 = vpop.f32.mrf.mxu3 }
 0x5b7   :  { %v5451_v47 = vadd.f32 %v5450_v20, %v5438_v14 }
 0x5b8   :  { %v5465_v4 = vpop.f32.mrf.mxu1 }
 0x5b9   :  { %v5464_v40 = vadd.f32 %v5463_v61, %v5451_v47 }
 0x5bb   :  { %vm5571_vm10 = vcmp.gt.f32.partialorder %v5464_v40, 0.0  ;;  %v5573_v34 = vmul.f32 0.2, %v5464_v40 }
 0x5bc   :  { %v5528_v51 = vpop.f32.mrf.mxu2 }
 0x5bd   :  { %v5575_v12 = vsel %vm5571_vm10, %v5464_v40, %v5573_v34 }
 0x5be   :  { %v5579_v32 = vpack.c.bf16 %v5575_v12, %v5575_v12  ;;  %5577 = vst [vmem:[#allocation11] sm:$0xff] %v5575_v12  ;;  %v5452_v52 = vpop.f32.mrf.mxu0  ;;  %v5543_v33 = vpop.f32.mrf.mxu3 }
 0x5c0   :  { %v5515_v35 = vpop.f32.mrf.mxu1  ;;  %5721 = vmatmul.bf16.vlgmr.msra.gmra.mxu2 %v5579_v32 }
 0x5c4   :  { %v5530_v3 = vpop.f32.mrf.mxu2 }
 0x5c6   :  { %v5502_v8 = vpop.f32.mrf.mxu0 }
 0x5c7   :  { %v5503_v7 = vadd.f32 %v5502_v8, %v5490_v9 }
 0x5c8   :  { %v5517_v49 = vpop.f32.mrf.mxu1 }
 0x5c9   :  { %v5516_v45 = vadd.f32 %v5515_v35, %v5503_v7 }
 0x5cb   :  { %v5529_v29 = vadd.f32 %v5528_v51, %v5516_v45 }
 0x5cd   :  { %v5542_v22 = vadd.f32 %v5541_v41, %v5529_v29 }
 0x5ce   :  { %v5504_v38 = vpop.f32.mrf.mxu0 }
 0x5d0   :  { %v5567_v30 = vpop.f32.mrf.mxu1 }
 0x5d6   :  { %v5554_v1 = vpop.f32.mrf.mxu0 }
 0x5d7   :  { %v5555_v16 = vadd.f32 %v5554_v1, %v5542_v22 }
 0x5d8   :  { %v5569_v36 = vpop.f32.mrf.mxu1 }
 0x5d9   :  { %v5568_v59 = vadd.f32 %v5567_v30, %v5555_v16 }
 0x5db   :  { %vm5572_vm11 = vcmp.gt.f32.partialorder %v5568_v59, 0.0  ;;  %v5574_v54 = vmul.f32 0.2, %v5568_v59 }
 0x5dd   :  { %v5576_v27 = vsel %vm5572_vm11, %v5568_v59, %v5574_v54 }
 0x5de   :  { %v5580_v62 = vpack.c.bf16 %v5576_v27, %v5576_v27  ;;  %5578 = vst [vmem:[#allocation11 + $0x8] sm:$0xff] %v5576_v27  ;;  %v5556_v21 = vpop.f32.mrf.mxu0 }
 0x5df   :  { %5750 = dma.vmem_to_hbm [thread:$0]  %s5746_s30, 256, %s5748_s25, [#allocation4]  }
 0x5e0   :  { %5734 = vmatmul.bf16.vlgmr.msra.gmra.mxu3 %v5580_v62 }
 0x643   :  { %v5722_v2 = vpop.f32.mrf.mxu2 }
 0x644   :  { %v5723_v56 = vadd.f32 %v8787_v37, %v5722_v2 }
 0x64b   :  { %v5724_v60 = vpop.f32.mrf.mxu2 }
 0x663   :  { %v5735_v50 = vpop.f32.mrf.mxu3 }
 0x664   :  { %v5736_v17 = vadd.f32 %v5735_v50, %v5723_v56 }
 0x666   :  { %5739 = vst [vmem:[#allocation12] sm:$0xff] %v5736_v17 }
 0x667   :  { %5761 = dma.vmem_to_hbm [thread:$0]  %s5757_s8, 128, %s5759_s18, [#allocation13]  }
 0x66b   :  { %v5737_v23 = vpop.f32.mrf.mxu3 }
 0x66c   :  { %8963 = dma.done.wait [#allocation4], 256  }
 0x66d   :  { %8964 = vsyncadd [#allocation4], 4294967040 }
 0x66e   :  { %8965 = dma.done.wait [#allocation13], 128  }
 0x66f   :  { %8966 = vsyncadd [#allocation13], 4294967168 }
 0x670   :  { %5770 = vsyncpa [#allocation3], 1 }
 0x671   :  { %5771 = vsyncpa [#allocation6], 1 }
 0x672   :  { %5772 = vsyncpa [#allocation9], 1 }
 0x673   :  { %5773 = vsyncpa [#allocation4], 1 }
 0x674   :  { %5774 = vsyncpa [#allocation13], 1 }

</bundles_post_ra>
